<compile_context>
chip_gen: v6e
topology: v6e:2x2x1
jax: 0.10.0
libtpu: 0.0.40
codegen_flags: <defaults>
</compile_context>

<pallas_src>
import functools
import math

import jax
import jax.numpy as jnp
from jax.experimental import pallas as pl
from jax.experimental.pallas import tpu as pltpu


# ----------------------------- Pallas kernel ------------------------------- #
def _transform_kernel(params_ref, x_ref, o_ref, *, H, W):
    """out[r, p] = x[r, src(p)] (0 where the composed transform maps p outside
    the image), via an in-VMEM one-hot selection matrix fed to the MXU.

    params (SMEM, f32[8]): [cos, sin, shift_y, shift_x, flip_a, flip_b, 0, 0]
      flip:  x_flipped = flip_a * x + flip_b      (identity or mirror)
      crop:  src = rotated + (shift_y, shift_x), zero fill outside the image
    """
    HW = H * W
    c = params_ref[0]
    s = params_ref[1]
    sy = params_ref[2]
    sx = params_ref[3]
    fa = params_ref[4]
    fb = params_ref[5]

    # Output-pixel coordinates (row-major p = y*W + x), pure f32 vector math
    # (the floor trick is exact for HW < 2^22; avoids vector integer division).
    p = jax.lax.broadcasted_iota(jnp.int32, (1, HW), 1).astype(jnp.float32)
    y_o = jnp.floor((p + 0.5) * (1.0 / W))
    x_o = p - y_o * W

    # (3) horizontal flip (applied last in the forward pipeline -> inverted first).
    x1 = fa * x_o + fb
    # (2) inverse rotation about the image center, nearest neighbor, zero fill.
    cy = (H - 1) * 0.5
    cx = (W - 1) * 0.5
    yc = y_o - cy
    xc = x1 - cx
    yr = jnp.round(c * yc - s * xc + cy)
    xr = jnp.round(s * yc + c * xc + cx)
    valid = (yr >= 0) & (yr <= H - 1) & (xr >= 0) & (xr <= W - 1)
    # (1) crop with padding=5: shift by (dy-5, dx-5), zero fill outside.
    ys = yr + sy
    xs = xr + sx
    valid = valid & (ys >= 0) & (ys <= H - 1) & (xs >= 0) & (xs <= W - 1)

    src = jnp.where(valid, ys * W + xs, -1.0).astype(jnp.int32)     # (1, HW)

    # One-hot selection matrix, built in VMEM only (never touches HBM).
    # src == -1 columns are all-zero -> correct zero fill.
    cdtype = jnp.bfloat16 if o_ref.dtype == jnp.bfloat16 else jnp.float32
    k_in = jax.lax.broadcasted_iota(jnp.int32, (HW, HW), 0)
    m = (k_in == src).astype(cdtype)                                # (HW_in, HW_out)

    a = x_ref[...].astype(cdtype)                                   # (RT, HW_in)
    out = jnp.dot(a, m, preferred_element_type=jnp.float32)         # MXU
    o_ref[...] = out.astype(o_ref.dtype)


# --------------------------- transform parameters -------------------------- #
def _build_params(key, H, W, flip_enabled):
    """Draw the per-batch augmentation parameters (one draw per batched call,
    matching the PyTorch module's whole-tensor semantics)."""
    k_cp, k_co, k_rp, k_ra, k_fl = jax.random.split(key, 5)
    pad = 5

    # RandomCrop(p=0.8): pad 5 each side, top-left offset in [0, 10];
    # offset == pad is the identity crop.
    apply_crop = jax.random.uniform(k_cp) < 0.8
    off = jax.random.randint(k_co, (2,), 0, 2 * pad + 1)
    sy = jnp.where(apply_crop, off[0] - pad, 0).astype(jnp.float32)
    sx = jnp.where(apply_crop, off[1] - pad, 0).astype(jnp.float32)

    # RandomRotation(10, p=0.5): angle ~ U(-10, 10) deg, nearest, fill=0.
    apply_rot = jax.random.uniform(k_rp) < 0.5
    angle_deg = jax.random.uniform(k_ra, (), minval=-10.0, maxval=10.0)
    angle = jnp.where(apply_rot, angle_deg, 0.0) * (math.pi / 180.0)
    c = jnp.cos(angle)
    s = jnp.sin(angle)

    # RandomHorizontalFlip(p=0.5) (cifar only): x -> fa * x + fb.
    do_flip = jnp.logical_and(flip_enabled, jax.random.uniform(k_fl) < 0.5)
    fa = jnp.where(do_flip, -1.0, 1.0)
    fb = jnp.where(do_flip, float(W - 1), 0.0)

    zero = jnp.float32(0.0)
    return jnp.stack([c, s, sy, sx, fa, fb, zero, zero]).astype(jnp.float32)


# ------------------------------- module wrapper ----------------------------- #
@functools.partial(jax.jit, static_argnames=("dataset_name",))
def post_tensor_transform(x, key, dataset_name="cifar"):
    """JAX/Pallas equivalent of PostTensorTransform.forward (batched NCHW)."""
    N, C, H, W = x.shape
    HW = H * W
    R = N * C
    params = _build_params(key, H, W, dataset_name == "cifar")      # (8,) f32

    a = x.reshape(R, HW)                      # metadata-only view change
    RT = R if R <= 128 else 128               # whole batch, or 128-row tiles
    grid = (pl.cdiv(R, RT),)

    out = pl.pallas_call(
        functools.partial(_transform_kernel, H=H, W=W),
        out_shape=jax.ShapeDtypeStruct((R, HW), x.dtype),
        grid=grid,
        in_specs=[
            pl.BlockSpec(memory_space=pltpu.MemorySpace.SMEM),      # params
            pl.BlockSpec((RT, HW), lambda i: (i, 0)),               # images
        ],
        out_specs=pl.BlockSpec((RT, HW), lambda i: (i, 0)),
        compiler_params=pltpu.CompilerParams(
            dimension_semantics=("parallel",),
            vmem_limit_bytes=24 * 1024 * 1024,
        ),
    )(params, a)
    return out.reshape(N, C, H, W)


if __name__ == "__main__":
    key = jax.random.PRNGKey(0)
    k_data, k_aug = jax.random.split(key)

    # dataset_name='cifar' -> 3-channel 32x32 images; small batch of 2, NCHW.
    x = jax.random.uniform(k_data, (2, 3, 32, 32), dtype=jnp.float32)

    y = post_tensor_transform(x, k_aug, dataset_name="cifar")
    jax.block_until_ready(y)

    assert y.shape == x.shape and y.dtype == x.dtype
    print("KERNEL_OK")
</pallas_src>

<mosaic_0001>
module attributes {stable_mosaic.version = 11 : i64} {
  func.func @_transform_kernel(%arg0: i32, %arg1: memref<8xf32, #tpu.memory_space<smem>>, %arg2: memref<6x1024xf32, #tpu.memory_space<vmem>>, %arg3: memref<6x1024xf32, #tpu.memory_space<vmem>>) attributes {dimension_semantics = [#tpu.dimension_semantics<parallel>], iteration_bounds = array<i64: 1>, scalar_prefetch = 0 : i64, scratch_operands = 0 : i64, tpu.core_type = #tpu.core_type<tc>, window_params = [{transform_indices = @transform_0, window_bounds = array<i64: 8>}, {transform_indices = @transform_1, window_bounds = array<i64: 6, 1024>}, {transform_indices = @transform_2, window_bounds = array<i64: 6, 1024>}]} {
    %c0 = arith.constant 0 : index
    %0 = memref.load %arg1[%c0] : memref<8xf32, #tpu.memory_space<smem>>
    %c1 = arith.constant 1 : index
    %1 = memref.load %arg1[%c1] : memref<8xf32, #tpu.memory_space<smem>>
    %c2 = arith.constant 2 : index
    %2 = memref.load %arg1[%c2] : memref<8xf32, #tpu.memory_space<smem>>
    %c3 = arith.constant 3 : index
    %3 = memref.load %arg1[%c3] : memref<8xf32, #tpu.memory_space<smem>>
    %c4 = arith.constant 4 : index
    %4 = memref.load %arg1[%c4] : memref<8xf32, #tpu.memory_space<smem>>
    %c5 = arith.constant 5 : index
    %5 = memref.load %arg1[%c5] : memref<8xf32, #tpu.memory_space<smem>>
    %6 = tpu.iota {dimensions = array<i32: 1>} : vector<1x1024xi32>
    %7 = arith.sitofp %6 : vector<1x1024xi32> to vector<1x1024xf32>
    %cst = arith.constant 5.000000e-01 : f32
    %8 = vector.broadcast %cst : f32 to vector<1x1024xf32>
    %9 = arith.addf %7, %8 : vector<1x1024xf32>
    %cst_0 = arith.constant 3.125000e-02 : f32
    %10 = vector.broadcast %cst_0 : f32 to vector<1x1024xf32>
    %11 = arith.mulf %9, %10 : vector<1x1024xf32>
    %12 = math.floor %11 : vector<1x1024xf32>
    %cst_1 = arith.constant 3.200000e+01 : f32
    %13 = vector.broadcast %cst_1 : f32 to vector<1x1024xf32>
    %14 = arith.mulf %12, %13 : vector<1x1024xf32>
    %15 = arith.subf %7, %14 : vector<1x1024xf32>
    %16 = vector.broadcast %4 : f32 to vector<1x1024xf32>
    %17 = arith.mulf %16, %15 : vector<1x1024xf32>
    %18 = vector.broadcast %5 : f32 to vector<1x1024xf32>
    %19 = arith.addf %17, %18 : vector<1x1024xf32>
    %cst_2 = arith.constant 1.550000e+01 : f32
    %20 = vector.broadcast %cst_2 : f32 to vector<1x1024xf32>
    %21 = arith.subf %12, %20 : vector<1x1024xf32>
    %cst_3 = arith.constant 1.550000e+01 : f32
    %22 = vector.broadcast %cst_3 : f32 to vector<1x1024xf32>
    %23 = arith.subf %19, %22 : vector<1x1024xf32>
    %24 = vector.broadcast %0 : f32 to vector<1x1024xf32>
    %25 = arith.mulf %24, %21 : vector<1x1024xf32>
    %26 = vector.broadcast %1 : f32 to vector<1x1024xf32>
    %27 = arith.mulf %26, %23 : vector<1x1024xf32>
    %28 = arith.subf %25, %27 : vector<1x1024xf32>
    %cst_4 = arith.constant 1.550000e+01 : f32
    %29 = vector.broadcast %cst_4 : f32 to vector<1x1024xf32>
    %30 = arith.addf %28, %29 : vector<1x1024xf32>
    %31 = math.roundeven %30 : vector<1x1024xf32>
    %32 = vector.broadcast %1 : f32 to vector<1x1024xf32>
    %33 = arith.mulf %32, %21 : vector<1x1024xf32>
    %34 = vector.broadcast %0 : f32 to vector<1x1024xf32>
    %35 = arith.mulf %34, %23 : vector<1x1024xf32>
    %36 = arith.addf %33, %35 : vector<1x1024xf32>
    %cst_5 = arith.constant 1.550000e+01 : f32
    %37 = vector.broadcast %cst_5 : f32 to vector<1x1024xf32>
    %38 = arith.addf %36, %37 : vector<1x1024xf32>
    %39 = math.roundeven %38 : vector<1x1024xf32>
    %cst_6 = arith.constant 0.000000e+00 : f32
    %40 = vector.broadcast %cst_6 : f32 to vector<1x1024xf32>
    %41 = arith.cmpf oge, %31, %40 : vector<1x1024xf32>
    %cst_7 = arith.constant 3.100000e+01 : f32
    %42 = vector.broadcast %cst_7 : f32 to vector<1x1024xf32>
    %43 = arith.cmpf ole, %31, %42 : vector<1x1024xf32>
    %44 = arith.andi %41, %43 : vector<1x1024xi1>
    %cst_8 = arith.constant 0.000000e+00 : f32
    %45 = vector.broadcast %cst_8 : f32 to vector<1x1024xf32>
    %46 = arith.cmpf oge, %39, %45 : vector<1x1024xf32>
    %47 = arith.andi %44, %46 : vector<1x1024xi1>
    %cst_9 = arith.constant 3.100000e+01 : f32
    %48 = vector.broadcast %cst_9 : f32 to vector<1x1024xf32>
    %49 = arith.cmpf ole, %39, %48 : vector<1x1024xf32>
    %50 = arith.andi %47, %49 : vector<1x1024xi1>
    %51 = vector.broadcast %2 : f32 to vector<1x1024xf32>
    %52 = arith.addf %31, %51 : vector<1x1024xf32>
    %53 = vector.broadcast %3 : f32 to vector<1x1024xf32>
    %54 = arith.addf %39, %53 : vector<1x1024xf32>
    %cst_10 = arith.constant 0.000000e+00 : f32
    %55 = vector.broadcast %cst_10 : f32 to vector<1x1024xf32>
    %56 = arith.cmpf oge, %52, %55 : vector<1x1024xf32>
    %57 = arith.andi %50, %56 : vector<1x1024xi1>
    %cst_11 = arith.constant 3.100000e+01 : f32
    %58 = vector.broadcast %cst_11 : f32 to vector<1x1024xf32>
    %59 = arith.cmpf ole, %52, %58 : vector<1x1024xf32>
    %60 = arith.andi %57, %59 : vector<1x1024xi1>
    %cst_12 = arith.constant 0.000000e+00 : f32
    %61 = vector.broadcast %cst_12 : f32 to vector<1x1024xf32>
    %62 = arith.cmpf oge, %54, %61 : vector<1x1024xf32>
    %63 = arith.andi %60, %62 : vector<1x1024xi1>
    %cst_13 = arith.constant 3.100000e+01 : f32
    %64 = vector.broadcast %cst_13 : f32 to vector<1x1024xf32>
    %65 = arith.cmpf ole, %54, %64 : vector<1x1024xf32>
    %66 = arith.andi %63, %65 : vector<1x1024xi1>
    %cst_14 = arith.constant 3.200000e+01 : f32
    %67 = vector.broadcast %cst_14 : f32 to vector<1x1024xf32>
    %68 = arith.mulf %52, %67 : vector<1x1024xf32>
    %69 = arith.addf %68, %54 : vector<1x1024xf32>
    %cst_15 = arith.constant -1.000000e+00 : f32
    %70 = vector.broadcast %cst_15 : f32 to vector<1x1024xf32>
    %71 = arith.select %66, %69, %70 : vector<1x1024xi1>, vector<1x1024xf32>
    %72 = arith.fptosi %71 : vector<1x1024xf32> to vector<1x1024xi32>
    %73 = tpu.iota {dimensions = array<i32: 0>} : vector<1024x1024xi32>
    %74 = vector.broadcast %72 : vector<1x1024xi32> to vector<1024x1024xi32>
    %75 = arith.cmpi eq, %73, %74 : vector<1024x1024xi32>
    %76 = arith.extui %75 : vector<1024x1024xi1> to vector<1024x1024xi32>
    %77 = arith.sitofp %76 : vector<1024x1024xi32> to vector<1024x1024xf32>
    %c0_16 = arith.constant 0 : index
    %c0_17 = arith.constant 0 : index
    %78 = vector.load %arg2[%c0_16, %c0_17] : memref<6x1024xf32, #tpu.memory_space<vmem>>, vector<6x1024xf32>
    %cst_18 = arith.constant dense<0.000000e+00> : vector<6x1024xf32>
    %79 = tpu.matmul %78, %77, %cst_18 {dimension_numbers = #tpu.dot_dimension_numbers<[1], [0], [0], [1], [0, 0, 1, 1], [], []>} : vector<6x1024xf32>, vector<1024x1024xf32>, vector<6x1024xf32> -> vector<6x1024xf32>
    %c0_19 = arith.constant 0 : index
    %c0_20 = arith.constant 0 : index
    %80 = vector.load %arg3[%c0_19, %c0_20] : memref<6x1024xf32, #tpu.memory_space<vmem>>, vector<6x1024xf32>
    tpu.vector_store %arg3[%c0_19, %c0_20], %79 {strides = array<i32>} : memref<6x1024xf32, #tpu.memory_space<vmem>>, vector<6x1024xf32>,
    return
  }
  func.func @transform_0(%arg0: i32) -> i32 {
    %c0_i32 = arith.constant 0 : i32
    %c0_i32_0 = arith.constant 0 : i32
    return %c0_i32 : i32
  }
  func.func @transform_1(%arg0: i32) -> (i32, i32) {
    %c0_i32 = arith.constant 0 : i32
    %c0_i32_0 = arith.constant 0 : i32
    return %arg0, %c0_i32 : i32, i32
  }
  func.func @transform_2(%arg0: i32) -> (i32, i32) {
    %c0_i32 = arith.constant 0 : i32
    %c0_i32_0 = arith.constant 0 : i32
    return %arg0, %c0_i32 : i32, i32
  }
}

</mosaic_0001>

<bundles_post_ra>
// kernel: post_tensor_transform.1
= control target key start
LH: loop header
LB: loop body
LE: loop exit
PB: predicated region body
PF: predicated region fallthrough
CT: control target
= control target key end

     0   :  { %7 = vsyncpa [#allocation3], 0  ;;  %s12013_s0 = inlined_call_operand.vmem [shape: f32[8], index: 0, kind: input, shape index: {}]   ;;  %s12014_s1 = inlined_call_operand.vmem [shape: f32[6,1024], index: 1, kind: input, shape index: {}]   ;;  %s12015_s2 = inlined_call_operand.vmem [shape: f32[6,1024], index: 2, kind: output, shape index: {}]  }
   0x1   :  { %s14_s11 = sshll.u32 %s12013_s0, 4  ;;  %s15_s11 = int_to_ptr.vmem [resolvable:$true] %s14_s11 }
   0x2   :  { %s6970_s12 = scalar_lea.vmem %s15_s11, 16  ;;  %p6975_p1 = scmp.lt.s32.totalorder %s15_s11, %s15_s11 }
   0x3   :  { %p6971_p0 = scmp.ne.s32.totalorder %s15_s11, %s6970_s12  ;;  %p6976_p2 = scmp.lt.s32.totalorder %s6970_s12, %s6970_s12 }
   0x5   :  { %p6977_p3 = por %p6976_p2, %p6975_p1 }
   0x7   :  { %p6978_p4 = pnand %p6977_p3, %p6971_p0 }
   0x9   :  { %6981 = shalt.err (!%p6978_p4)
}
   0xa   :  { %s6984_s13 = smov [#allocation2]  }
   0xb   :  { %17 = dma.vmem_to_smem %s15_s11, 16, %s6984_s13, [#allocation3]  }
   0xc   :  { %6982 = dma.done.wait [#allocation3], 16  }
   0xd   :  { %6983 = vsyncadd [#allocation3], 4294967280 }
   0xe   :  { %23 = sfence }
   0xf   :  { %v30_v0 = vlaneseq  ;;  %v3575_v1 = vld [vmem:[%s12014_s1 + $0x8] sm:$0x3f]  ;;  %v3577_v2 = vld [vmem:[%s12014_s1 + $0x18] sm:$0x3f]  ;;  %s4734_s17 = sld [smem:[#allocation2 + $0x4]] }
  0x10   :  { %3646 = vmatprep.mubr.f32.mxu0 %v3575_v1  ;;  %3717 = vmatprep.mubr.f32.mxu1 %v3577_v2  ;;  %s4735_s18 = sld [smem:[#allocation2 + $0x5]] }
  0x11   :  { %v7011_v3 = vand.u32 127, %v30_v0  ;;  %s24_s19 = sld [smem:[#allocation2]] }
  0x12   :  { %s4731_s20 = sld [smem:[#allocation2 + $0x1]] }
  0x13   :  { %12377 = vst [vmem:[#allocation5_spill] sm:$0xff] %v7011_v3  ;;  %v32_v4 = vadd.s32 128, %v7011_v3  ;;  %v39_v5 = vcvt.s32.f32 %v7011_v3  ;;  %s4732_s21 = sld [smem:[#allocation2 + $0x2]] }
  0x14   :  { %s4733_s22 = sld [smem:[#allocation2 + $0x3]] }
  0x15   :  { %v40_v6 = vcvt.s32.f32 %v32_v4  ;;  %v47_v7 = vadd.f32 0.5, %v39_v5  ;;  %v7015_v14 = vstv %s4734_s17 }
  0x16   :  { %12378 = vst [vmem:[#allocation6_spill] sm:$0xff] %v7015_v14  ;;  %v7017_v17 = vstv %s4735_s18 }
  0x17   :  { %v48_v8 = vadd.f32 0.5, %v40_v6  ;;  %v55_v9 = vmul.f32 0.03125, %v47_v7  ;;  %12379 = vst [vmem:[#allocation7_spill] sm:$0xff] %v7017_v17  ;;  %v7020_v22 = vstv %s24_s19 }
  0x18   :  { %12380 = vst [vmem:[#allocation8_spill] sm:$0xff] %v7020_v22  ;;  %v7024_v25 = vstv %s4731_s20 }
  0x19   :  { %v56_v10 = vmul.f32 0.03125, %v48_v8  ;;  %v63_v11 = vfloor.f32 %v55_v9  ;;  %12381 = vst [vmem:[#allocation9_spill] sm:$0xff] %v7024_v25 }
  0x1a   :  { %v7037_v7 = vstv %s4733_s22 }
  0x1b   :  { %v64_v12 = vfloor.f32 %v56_v10  ;;  %v71_v13 = vmul.f32 32.0, %v63_v11  ;;  %v4736_v20 = vadd.f32 -15.5, %v63_v11 }
  0x1d   :  { %v72_v15 = vmul.f32 32.0, %v64_v12  ;;  %v79_v16 = vsub.f32 %v39_v5, %v71_v13  ;;  %v4737_v21 = vadd.f32 -15.5, %v64_v12  ;;  %v122_v28 = vmul.f32 %v4736_v20, %v7020_v22 }
  0x1e   :  { %v163_v29 = vmul.f32 %v4736_v20, %v7024_v25  ;;  %v7035_v5 = vstv %s4732_s21 }
  0x1f   :  { %v80_v18 = vsub.f32 %v40_v6, %v72_v15  ;;  %v88_v19 = vmul.f32 %v7015_v14, %v79_v16  ;;  %v123_v30 = vmul.f32 %v4737_v21, %v7020_v22  ;;  %v164_v32 = vmul.f32 %v4737_v21, %v7024_v25 }
  0x21   :  { %v89_v23 = vmul.f32 %v7015_v14, %v80_v18  ;;  %v97_v24 = vadd.f32 %v7017_v17, %v88_v19 }
  0x23   :  { %v98_v26 = vadd.f32 %v7017_v17, %v89_v23  ;;  %v4744_v27 = vadd.f32 -15.5, %v97_v24  ;;  %v7053_v23 = vshrl.u32 %v30_v0, 7 }
  0x25   :  { %v4745_v31 = vadd.f32 -15.5, %v98_v26  ;;  %v131_v33 = vmul.f32 %v4744_v27, %v7024_v25  ;;  %v171_v34 = vmul.f32 %v4744_v27, %v7020_v22  ;;  %12386 = vst [vmem:[#allocation10_spill] sm:$0xff] %v7053_v23  ;;  %v7062_v0 = vadd.s32 376, %v7053_v23 }
  0x26   :  { %v7366_v11 = vadd.s32 224, %v7053_v23  ;;  %v7387_v15 = vadd.s32 472, %v7053_v23 }
  0x27   :  { %v132_v35 = vmul.f32 %v4745_v31, %v7024_v25  ;;  %v172_v36 = vmul.f32 %v4745_v31, %v7020_v22  ;;  %v139_v37 = vsub.f32 %v122_v28, %v131_v33  ;;  %v179_v38 = vadd.f32 %v171_v34, %v163_v29  ;;  %12388 = vst [vmem:[#allocation12_spill] sm:$0xff] %v7062_v0 }
  0x28   :  { %v7059_v29 = vadd.s32 120, %v7053_v23  ;;  %v7073_v34 = vadd.s32 112, %v7053_v23  ;;  %12424 = vst [vmem:[#allocation48_spill] sm:$0xff] %v7366_v11  ;;  %12427 = vst [vmem:[#allocation51_spill] sm:$0xff] %v7387_v15 }
  0x29   :  { %v140_v39 = vsub.f32 %v123_v30, %v132_v35  ;;  %v180_v40 = vadd.f32 %v172_v36, %v164_v32  ;;  %v147_v41 = vadd.f32 15.5, %v139_v37  ;;  %v187_v42 = vadd.f32 15.5, %v179_v38 }
  0x2a   :  { %12387 = vst [vmem:[#allocation11_spill] sm:$0xff] %v7059_v29  ;;  %v12126_v32 = vmov 1.0   ;;  %12389 = vst [vmem:[#allocation13_spill] sm:$0xff] %v7073_v34  ;;  %v7076_v35 = vadd.s32 368, %v7053_v23  ;;  %v7079_v37 = vadd.s32 104, %v7053_v23  ;;  %v7082_v38 = vadd.s32 360, %v7053_v23 }
  0x2b   :  { %v148_v43 = vadd.f32 15.5, %v140_v39  ;;  %v188_v44 = vadd.f32 15.5, %v180_v40  ;;  %v6802_v45 = vcvt.f32.s32 %v147_v41  ;;  %v6866_v46 = vcvt.f32.s32 %v187_v42 }
  0x2c   :  { %v6800_v48 = vand.u32 2147483647, %v147_v41  ;;  %v6805_v52 = vand.u32 2147483648, %v147_v41  ;;  %v6869_v56 = vand.u32 2147483648, %v187_v42  ;;  %v6864_v62 = vand.u32 2147483647, %v187_v42 }
  0x2d   :  { %v6810_v47 = vcvt.f32.s32 %v148_v43  ;;  %v6808_v49 = vand.u32 2147483647, %v148_v43  ;;  %v6874_v50 = vcvt.f32.s32 %v188_v44  ;;  %v6803_v51 = vcvt.s32.f32 %v6802_v45  ;;  %12390 = vst [vmem:[#allocation14_spill] sm:$0xff] %v7076_v35  ;;  %12391 = vst [vmem:[#allocation15_spill] sm:$0xff] %v7079_v37 }
  0x2e   :  { %v6813_v54 = vand.u32 2147483648, %v148_v43  ;;  %v6872_v55 = vand.u32 2147483647, %v188_v44  ;;  %v6877_v58 = vand.u32 2147483648, %v188_v44  ;;  %v6867_v60 = vcvt.s32.f32 %v6866_v46  ;;  %12392 = vst [vmem:[#allocation16_spill] sm:$0xff] %v7082_v38 }
  0x2f   :  { %v6811_v53 = vcvt.s32.f32 %v6810_v47  ;;  %v6875_v57 = vcvt.s32.f32 %v6874_v50  ;;  %v6804_v59 = vand.u32 2147483647, %v6803_v51  ;;  %vm6801_vm0 = vcmp.lt.f32.partialorder %v6800_v48, 8388608.0 }
  0x30   :  { %vm6809_vm1 = vcmp.lt.f32.partialorder %v6808_v49, 8388608.0  ;;  %v6868_v2 = vand.u32 2147483647, %v6867_v60  ;;  %vm6873_vm2 = vcmp.lt.f32.partialorder %v6872_v55, 8388608.0  ;;  %vm7039_vm3 = vcmp.lt.f32.partialorder %v6864_v62, 8388608.0 }
  0x31   :  { %v6812_v61 = vand.u32 2147483647, %v6811_v53  ;;  %v6876_v63 = vand.u32 2147483647, %v6875_v57  ;;  %v6806_v1 = vor.u32 %v6805_v52, %v6804_v59  ;;  %v7091_v40 = vadd.s32 96, %v7053_v23 }
  0x32   :  { %v6870_v9 = vor.u32 %v6869_v56, %v6868_v2  ;;  %v7132_v45 = vadd.s32 336, %v7053_v23  ;;  %v7147_v46 = vadd.s32 72, %v7053_v23  ;;  %v7150_v47 = vadd.s32 328, %v7053_v23 }
  0x33   :  { %v6814_v4 = vor.u32 %v6813_v54, %v6812_v61  ;;  %v6878_v6 = vor.u32 %v6877_v58, %v6876_v63  ;;  %v6807_v8 = vsel %vm6801_vm0, %v6806_v1, %v147_v41  ;;  %12393 = vst [vmem:[#allocation17_spill] sm:$0xff] %v7091_v40  ;;  %v7094_v41 = vadd.s32 352, %v7053_v23 }
  0x34   :  { %vm203_vm4 = vcmp.ge.f32.partialorder %v6807_v8, 0.0  ;;  %vm211_vm5 = vcmp.le.f32.partialorder %v6807_v8, 31.0  ;;  %v260_v18 = vadd.f32 %v6807_v8, %v7035_v5  ;;  %v6871_v20 = vsel %vm7039_vm3, %v6870_v9, %v187_v42  ;;  %12398 = vst [vmem:[#allocation22_spill] sm:$0xff] %v7132_v45  ;;  %12399 = vst [vmem:[#allocation23_spill] sm:$0xff] %v7147_v46 }
  0x35   :  { %v6815_v10 = vsel %vm6809_vm1, %v6814_v4, %v148_v43  ;;  %v6879_v12 = vsel %vm6873_vm2, %v6878_v6, %v188_v44  ;;  %vm7044_vm8 = vmand %vm203_vm4, %vm211_vm5  ;;  %vm227_vm5 = vcmp.ge.f32.partialorder %v6871_v20, 0.0  ;;  %v269_v24 = vadd.f32 %v6871_v20, %v7037_v7  ;;  %12394 = vst [vmem:[#allocation18_spill] sm:$0xff] %v7094_v41 }
  0x36   :  { %vm204_vm6 = vcmp.ge.f32.partialorder %v6815_v10, 0.0  ;;  %vm212_vm7 = vcmp.le.f32.partialorder %v6815_v10, 31.0  ;;  %v261_v13 = vadd.f32 %v6815_v10, %v7035_v5  ;;  %vm228_vm10 = vcmp.ge.f32.partialorder %v6879_v12, 0.0  ;;  %vm235_vm3 = vmand %vm7044_vm8, %vm227_vm5  ;;  %12400 = vst [vmem:[#allocation24_spill] sm:$0xff] %v7150_v47 }
  0x37   :  { %vm220_vm9 = vmand %vm204_vm6, %vm212_vm7  ;;  %vm244_vm11 = vcmp.le.f32.partialorder %v6879_v12, 31.0  ;;  %v270_v16 = vadd.f32 %v6879_v12, %v7037_v7  ;;  %vm243_vm7 = vcmp.le.f32.partialorder %v6871_v20, 31.0  ;;  %v341_v26 = vmul.f32 32.0, %v260_v18 }
  0x38   :  { %vm236_vm12 = vmand %vm220_vm9, %vm228_vm10  ;;  %vm278_vm13 = vcmp.ge.f32.partialorder %v261_v13, 0.0  ;;  %vm294_vm14 = vcmp.le.f32.partialorder %v261_v13, 31.0  ;;  %v342_v19 = vmul.f32 32.0, %v261_v13  ;;  %vm277_vm10 = vcmp.ge.f32.partialorder %v260_v18, 0.0 }
  0x39   :  { %vm252_vm15 = vmand %vm236_vm12, %vm244_vm11  ;;  %vm310_vm0 = vcmp.ge.f32.partialorder %v270_v16, 0.0  ;;  %vm326_vm2 = vcmp.le.f32.partialorder %v270_v16, 31.0  ;;  %vm293_vm11 = vcmp.le.f32.partialorder %v260_v18, 31.0  ;;  %v349_v30 = vadd.f32 %v341_v26, %v269_v24 }
  0x3a   :  { %vm286_vm1 = vmand %vm252_vm15, %vm278_vm13  ;;  %v350_v21 = vadd.f32 %v342_v19, %v270_v16  ;;  %vm309_vm13 = vcmp.ge.f32.partialorder %v269_v24, 0.0  ;;  %vm325_vm15 = vcmp.le.f32.partialorder %v269_v24, 31.0  ;;  %v7111_v42 = vadd.s32 88, %v7053_v23 }
  0x3b   :  { %vm302_vm4 = vmand %vm286_vm1, %vm294_vm14  ;;  %v7114_v43 = vadd.s32 344, %v7053_v23  ;;  %v7129_v44 = vadd.s32 80, %v7053_v23  ;;  %v7165_v48 = vadd.s32 64, %v7053_v23  ;;  %v7168_v49 = vadd.s32 320, %v7053_v23 }
  0x3c   :  { %vm318_vm6 = vmand %vm302_vm4, %vm310_vm0  ;;  %12395 = vst [vmem:[#allocation19_spill] sm:$0xff] %v7111_v42  ;;  %v7183_v50 = vadd.s32 56, %v7053_v23  ;;  %v7186_v51 = vadd.s32 312, %v7053_v23  ;;  %v7201_v52 = vadd.s32 48, %v7053_v23  ;;  %v7204_v53 = vadd.s32 304, %v7053_v23 }
  0x3d   :  { %vm334_vm9 = vmand %vm318_vm6, %vm326_vm2  ;;  %12396 = vst [vmem:[#allocation20_spill] sm:$0xff] %v7114_v43  ;;  %v7219_v54 = vadd.s32 40, %v7053_v23  ;;  %v7222_v55 = vadd.s32 296, %v7053_v23  ;;  %v7237_v56 = vadd.s32 32, %v7053_v23  ;;  %v7240_v57 = vadd.s32 288, %v7053_v23 }
  0x3e   :  { %v358_v27 = vsel %vm334_vm9, %v350_v21, -1.0  ;;  %vm251_vm12 = vmand %vm235_vm3, %vm243_vm7  ;;  %12397 = vst [vmem:[#allocation21_spill] sm:$0xff] %v7129_v44  ;;  %v7255_v58 = vadd.s32 24, %v7053_v23  ;;  %v7258_v59 = vadd.s32 280, %v7053_v23  ;;  %v7273_v60 = vadd.s32 16, %v7053_v23 }
  0x3f   :  { %v6930_v28 = vtrunc.f32 %v358_v27  ;;  %vm285_vm14 = vmand %vm251_vm12, %vm277_vm10  ;;  %12401 = vst [vmem:[#allocation25_spill] sm:$0xff] %v7165_v48  ;;  %v7276_v61 = vadd.s32 272, %v7053_v23  ;;  %v7291_v62 = vadd.s32 8, %v7053_v23  ;;  %v7294_v63 = vadd.s32 264, %v7053_v23 }
  0x40   :  { %vm301_vm0 = vmand %vm285_vm14, %vm293_vm11  ;;  %12402 = vst [vmem:[#allocation26_spill] sm:$0xff] %v7168_v49  ;;  %v7309_v1 = vadd.s32 256, %v7053_v23  ;;  %v7324_v2 = vadd.s32 248, %v7053_v23  ;;  %v7327_v4 = vadd.s32 504, %v7053_v23  ;;  %v7342_v6 = vadd.s32 240, %v7053_v23 }
  0x41   :  { %v7064_v31 = vcvt.f32.s32 %v6930_v28  ;;  %vm317_vm1 = vmand %vm301_vm0, %vm309_vm13  ;;  %12403 = vst [vmem:[#allocation27_spill] sm:$0xff] %v7183_v50  ;;  %v7345_v8 = vadd.s32 496, %v7053_v23  ;;  %v7354_v9 = vadd.s32 232, %v7053_v23  ;;  %v7357_v10 = vadd.s32 488, %v7053_v23 }
  0x42   :  { %vm333_vm4 = vmand %vm317_vm1, %vm325_vm15  ;;  %12404 = vst [vmem:[#allocation28_spill] sm:$0xff] %v7186_v51  ;;  %v7369_v12 = vadd.s32 480, %v7053_v23  ;;  %v7384_v13 = vadd.s32 216, %v7053_v23  ;;  %v7402_v16 = vadd.s32 208, %v7053_v23  ;;  %v7405_v18 = vadd.s32 464, %v7053_v23 }
  0x43   :  { %vm623_vm8 = vcmp.eq.s32.totalorder %v7059_v29, %v7064_v31  ;;  %vm879_vm2 = vcmp.eq.s32.totalorder %v7062_v0, %v7064_v31  ;;  %v357_v33 = vsel %vm333_vm4, %v349_v30, -1.0  ;;  %vm615_vm5 = vcmp.eq.s32.totalorder %v7073_v34, %v7064_v31  ;;  %12405 = vst [vmem:[#allocation29_spill] sm:$0xff] %v7201_v52  ;;  %12406 = vst [vmem:[#allocation30_spill] sm:$0xff] %v7204_v53 }
  0x44   :  { %5776 = vmatprep.subr.msk.mxu0 %vm623_vm8, %v12126_v32  ;;  %5840 = vmatprep.subr.msk.mxu1 %vm879_vm2, %v12126_v32  ;;  %v6928_v36 = vtrunc.f32 %v357_v33  ;;  %vm871_vm6 = vcmp.eq.s32.totalorder %v7076_v35, %v7064_v31  ;;  %vm607_vm11 = vcmp.eq.s32.totalorder %v7079_v37, %v7064_v31  ;;  %vm863_vm12 = vcmp.eq.s32.totalorder %v7082_v38, %v7064_v31 }
  0x45   :  { %vm599_vm15 = vcmp.eq.s32.totalorder %v7091_v40, %v7064_v31  ;;  %vm855_vm0 = vcmp.eq.s32.totalorder %v7094_v41, %v7064_v31  ;;  %vm591_vm2 = vcmp.eq.s32.totalorder %v7111_v42, %v7064_v31  ;;  %vm847_vm4 = vcmp.eq.s32.totalorder %v7114_v43, %v7064_v31  ;;  %12407 = vst [vmem:[#allocation31_spill] sm:$0xff] %v7219_v54 }
  0x46   :  { %v7084_v39 = vcvt.f32.s32 %v6928_v36  ;;  %12408 = vst [vmem:[#allocation32_spill] sm:$0xff] %v7222_v55  ;;  %12409 = vst [vmem:[#allocation33_spill] sm:$0xff] %v7237_v56  ;;  %v7420_v19 = vadd.s32 200, %v7053_v23  ;;  %v7423_v20 = vadd.s32 456, %v7053_v23  ;;  %v7438_v21 = vadd.s32 192, %v7053_v23 }
  0x47   :  { %12410 = vst [vmem:[#allocation34_spill] sm:$0xff] %v7240_v57  ;;  %12411 = vst [vmem:[#allocation35_spill] sm:$0xff] %v7255_v58  ;;  %v7441_v24 = vadd.s32 448, %v7053_v23  ;;  %v7456_v26 = vadd.s32 184, %v7053_v23  ;;  %v7459_v27 = vadd.s32 440, %v7053_v23  ;;  %v7474_v28 = vadd.s32 176, %v7053_v23 }
  0x48   :  { %vm622_vm7 = vcmp.eq.s32.totalorder %v7059_v29, %v7084_v39  ;;  %vm878_vm9 = vcmp.eq.s32.totalorder %v7062_v0, %v7084_v39  ;;  %vm614_vm10 = vcmp.eq.s32.totalorder %v7073_v34, %v7084_v39  ;;  %vm870_vm3 = vcmp.eq.s32.totalorder %v7076_v35, %v7084_v39  ;;  %12412 = vst [vmem:[#allocation36_spill] sm:$0xff] %v7258_v59 }
  0x49   :  { %5777 = vmatpush1.msk.msra.mxu0 %vm622_vm7, %v12126_v32  ;;  %5841 = vmatpush1.msk.msra.mxu1 %vm878_vm9, %v12126_v32  ;;  %vm606_vm13 = vcmp.eq.s32.totalorder %v7079_v37, %v7084_v39  ;;  %vm862_vm14 = vcmp.eq.s32.totalorder %v7082_v38, %v7084_v39  ;;  %vm598_vm1 = vcmp.eq.s32.totalorder %v7091_v40, %v7084_v39  ;;  %v7477_v30 = vadd.s32 432, %v7053_v23 }
  0x4a   :  { %5778 = vmatprep.subr.msk.mxu0 %vm615_vm5, %v12126_v32  ;;  %5842 = vmatprep.subr.msk.mxu1 %vm871_vm6, %v12126_v32  ;;  %vm854_vm8 = vcmp.eq.s32.totalorder %v7094_v41, %v7084_v39  ;;  %vm590_vm5 = vcmp.eq.s32.totalorder %v7111_v42, %v7084_v39  ;;  %vm846_vm6 = vcmp.eq.s32.totalorder %v7114_v43, %v7084_v39  ;;  %v7492_v33 = vadd.s32 168, %v7053_v23 }
  0x4b   :  { %5779 = vmatpush1.msk.msra.mxu0 %vm614_vm10, %v12126_v32  ;;  %5843 = vmatpush1.msk.msra.mxu1 %vm870_vm3, %v12126_v32  ;;  %vm583_vm7 = vcmp.eq.s32.totalorder %v7129_v44, %v7064_v31  ;;  %vm839_vm9 = vcmp.eq.s32.totalorder %v7132_v45, %v7064_v31  ;;  %vm582_vm10 = vcmp.eq.s32.totalorder %v7129_v44, %v7084_v39  ;;  %v7495_v36 = vadd.s32 424, %v7053_v23 }
  0x4c   :  { %5780 = vmatprep.subr.msk.mxu0 %vm607_vm11, %v12126_v32  ;;  %5844 = vmatprep.subr.msk.mxu1 %vm863_vm12, %v12126_v32  ;;  %vm838_vm3 = vcmp.eq.s32.totalorder %v7132_v45, %v7084_v39  ;;  %vm575_vm11 = vcmp.eq.s32.totalorder %v7147_v46, %v7064_v31  ;;  %vm831_vm12 = vcmp.eq.s32.totalorder %v7150_v47, %v7064_v31  ;;  %v7940_v45 = vadd.s32 752, %v7053_v23 }
  0x4d   :  { %5781 = vmatpush1.msk.msra.mxu0 %vm606_vm13, %v12126_v32  ;;  %5845 = vmatpush1.msk.msra.mxu1 %vm862_vm14, %v12126_v32  ;;  %vm574_vm13 = vcmp.eq.s32.totalorder %v7147_v46, %v7084_v39  ;;  %vm830_vm14 = vcmp.eq.s32.totalorder %v7150_v47, %v7084_v39  ;;  %12413 = vst [vmem:[#allocation37_spill] sm:$0xff] %v7273_v60  ;;  %12414 = vst [vmem:[#allocation38_spill] sm:$0xff] %v7276_v61  ;;  %v7904_v47 = vadd.s32 768, %v7053_v23  ;;  %v3576_v46 = vld [vmem:[%s12014_s1 + $0x10] sm:$0x3f] }
  0x4e   :  { %5782 = vmatprep.subr.msk.mxu0 %vm599_vm15, %v12126_v32  ;;  %5846 = vmatprep.subr.msk.mxu1 %vm855_vm0, %v12126_v32  ;;  %vm567_vm15 = vcmp.eq.s32.totalorder %v7165_v48, %v7064_v31  ;;  %vm823_vm0 = vcmp.eq.s32.totalorder %v7168_v49, %v7064_v31  ;;  %12415 = vst [vmem:[#allocation39_spill] sm:$0xff] %v7291_v62  ;;  %12416 = vst [vmem:[#allocation40_spill] sm:$0xff] %v7294_v63  ;;  %v7943_v44 = vadd.s32 1008, %v7053_v23 }
  0x4f   :  { %5783 = vmatpush1.msk.msra.mxu0 %vm598_vm1, %v12126_v32  ;;  %5847 = vmatpush1.msk.msra.mxu1 %vm854_vm8, %v12126_v32  ;;  %vm566_vm1 = vcmp.eq.s32.totalorder %v7165_v48, %v7084_v39  ;;  %vm822_vm8 = vcmp.eq.s32.totalorder %v7168_v49, %v7084_v39  ;;  %12417 = vst [vmem:[#allocation41_spill] sm:$0xff] %v7309_v1  ;;  %12418 = vst [vmem:[#allocation42_spill] sm:$0xff] %v7324_v2  ;;  %v7837_v49 = vadd.s32 256, %v7011_v3 }
  0x50   :  { %5784 = vmatprep.subr.msk.mxu0 %vm591_vm2, %v12126_v32  ;;  %5848 = vmatprep.subr.msk.mxu1 %vm847_vm4, %v12126_v32  ;;  %vm559_vm2 = vcmp.eq.s32.totalorder %v7183_v50, %v7064_v31  ;;  %vm815_vm4 = vcmp.eq.s32.totalorder %v7186_v51, %v7064_v31  ;;  %12419 = vst [vmem:[#allocation43_spill] sm:$0xff] %v7327_v4  ;;  %12420 = vst [vmem:[#allocation44_spill] sm:$0xff] %v7342_v6  ;;  %v7873_v48 = vadd.s32 776, %v7053_v23 }
  0x51   :  { %5785 = vmatpush1.msk.msra.mxu0 %vm590_vm5, %v12126_v32  ;;  %5849 = vmatpush1.msk.msra.mxu1 %vm846_vm6, %v12126_v32  ;;  %vm558_vm5 = vcmp.eq.s32.totalorder %v7183_v50, %v7084_v39  ;;  %vm814_vm6 = vcmp.eq.s32.totalorder %v7186_v51, %v7084_v39  ;;  %12421 = vst [vmem:[#allocation45_spill] sm:$0xff] %v7345_v8  ;;  %12422 = vst [vmem:[#allocation46_spill] sm:$0xff] %v7354_v9  ;;  %v7801_v51 = vadd.s32 800, %v7053_v23 }
  0x52   :  { %5786 = vmatprep.subr.msk.mxu0 %vm583_vm7, %v12126_v32  ;;  %5850 = vmatprep.subr.msk.mxu1 %vm839_vm9, %v12126_v32  ;;  %vm551_vm7 = vcmp.eq.s32.totalorder %v7201_v52, %v7064_v31  ;;  %vm807_vm9 = vcmp.eq.s32.totalorder %v7204_v53, %v7064_v31  ;;  %12423 = vst [vmem:[#allocation47_spill] sm:$0xff] %v7357_v10  ;;  %12425 = vst [vmem:[#allocation49_spill] sm:$0xff] %v7369_v12  ;;  %v7834_v50 = vadd.s32 792, %v7053_v23 }
  0x53   :  { %5787 = vmatpush1.msk.msra.mxu0 %vm582_vm10, %v12126_v32  ;;  %5851 = vmatpush1.msk.msra.mxu1 %vm838_vm3, %v12126_v32  ;;  %vm550_vm10 = vcmp.eq.s32.totalorder %v7201_v52, %v7084_v39  ;;  %vm806_vm3 = vcmp.eq.s32.totalorder %v7204_v53, %v7084_v39  ;;  %12426 = vst [vmem:[#allocation50_spill] sm:$0xff] %v7384_v13  ;;  %12428 = vst [vmem:[#allocation52_spill] sm:$0xff] %v7402_v16  ;;  %v7765_v53 = vadd.s32 816, %v7053_v23 }
  0x54   :  { %5788 = vmatprep.subr.msk.mxu0 %vm575_vm11, %v12126_v32  ;;  %5852 = vmatprep.subr.msk.mxu1 %vm831_vm12, %v12126_v32  ;;  %vm543_vm11 = vcmp.eq.s32.totalorder %v7219_v54, %v7064_v31  ;;  %vm799_vm12 = vcmp.eq.s32.totalorder %v7222_v55, %v7064_v31  ;;  %12429 = vst [vmem:[#allocation53_spill] sm:$0xff] %v7405_v18  ;;  %12430 = vst [vmem:[#allocation54_spill] sm:$0xff] %v7420_v19  ;;  %v7798_v52 = vadd.s32 544, %v7053_v23 }
  0x55   :  { %5789 = vmatpush1.msk.msra.mxu0 %vm574_vm13, %v12126_v32  ;;  %5853 = vmatpush1.msk.msra.mxu1 %vm830_vm14, %v12126_v32  ;;  %vm542_vm13 = vcmp.eq.s32.totalorder %v7219_v54, %v7084_v39  ;;  %vm798_vm14 = vcmp.eq.s32.totalorder %v7222_v55, %v7084_v39  ;;  %12431 = vst [vmem:[#allocation55_spill] sm:$0xff] %v7423_v20  ;;  %12432 = vst [vmem:[#allocation56_spill] sm:$0xff] %v7438_v21  ;;  %v7729_v55 = vadd.s32 832, %v7053_v23 }
  0x56   :  { %5790 = vmatprep.subr.msk.mxu0 %vm567_vm15, %v12126_v32  ;;  %5854 = vmatprep.subr.msk.mxu1 %vm823_vm0, %v12126_v32  ;;  %vm535_vm15 = vcmp.eq.s32.totalorder %v7237_v56, %v7064_v31  ;;  %vm791_vm0 = vcmp.eq.s32.totalorder %v7240_v57, %v7064_v31  ;;  %12433 = vst [vmem:[#allocation57_spill] sm:$0xff] %v7441_v24  ;;  %12434 = vst [vmem:[#allocation58_spill] sm:$0xff] %v7456_v26  ;;  %v7762_v54 = vadd.s32 560, %v7053_v23 }
  0x57   :  { %5791 = vmatpush1.msk.msra.mxu0 %vm566_vm1, %v12126_v32  ;;  %5855 = vmatpush1.msk.msra.mxu1 %vm822_vm8, %v12126_v32  ;;  %vm534_vm1 = vcmp.eq.s32.totalorder %v7237_v56, %v7084_v39  ;;  %vm790_vm8 = vcmp.eq.s32.totalorder %v7240_v57, %v7084_v39  ;;  %12435 = vst [vmem:[#allocation59_spill] sm:$0xff] %v7459_v27  ;;  %12436 = vst [vmem:[#allocation60_spill] sm:$0xff] %v7474_v28  ;;  %v7693_v57 = vadd.s32 848, %v7053_v23 }
  0x58   :  { %5792 = vmatprep.subr.msk.mxu0 %vm559_vm2, %v12126_v32  ;;  %5856 = vmatprep.subr.msk.mxu1 %vm815_vm4, %v12126_v32  ;;  %vm527_vm2 = vcmp.eq.s32.totalorder %v7255_v58, %v7064_v31  ;;  %vm783_vm4 = vcmp.eq.s32.totalorder %v7258_v59, %v7064_v31  ;;  %12437 = vst [vmem:[#allocation61_spill] sm:$0xff] %v7477_v30  ;;  %12438 = vst [vmem:[#allocation62_spill] sm:$0xff] %v7492_v33  ;;  %v7726_v56 = vadd.s32 576, %v7053_v23 }
  0x59   :  { %5793 = vmatpush1.msk.msra.mxu0 %vm558_vm5, %v12126_v32  ;;  %5857 = vmatpush1.msk.msra.mxu1 %vm814_vm6, %v12126_v32  ;;  %vm526_vm5 = vcmp.eq.s32.totalorder %v7255_v58, %v7084_v39  ;;  %vm782_vm6 = vcmp.eq.s32.totalorder %v7258_v59, %v7084_v39  ;;  %12439 = vst [vmem:[#allocation63_spill] sm:$0xff] %v7495_v36  ;;  %v7657_v59 = vadd.s32 864, %v7053_v23  ;;  %v7690_v58 = vadd.s32 592, %v7053_v23 }
  0x5a   :  { %5794 = vmatprep.subr.msk.mxu0 %vm551_vm7, %v12126_v32  ;;  %5858 = vmatprep.subr.msk.mxu1 %vm807_vm9, %v12126_v32  ;;  %vm519_vm7 = vcmp.eq.s32.totalorder %v7273_v60, %v7064_v31  ;;  %vm775_vm9 = vcmp.eq.s32.totalorder %v7276_v61, %v7064_v31  ;;  %12461 = vst [vmem:[#allocation85_spill] sm:$0xff] %v7693_v57  ;;  %12464 = vst [vmem:[#allocation88_spill] sm:$0xff] %v7726_v56  ;;  %v7946_v43 = vadd.s32 744, %v7053_v23 }
  0x5b   :  { %5795 = vmatpush1.msk.msra.mxu0 %vm550_vm10, %v12126_v32  ;;  %5859 = vmatpush1.msk.msra.mxu1 %vm806_vm3, %v12126_v32  ;;  %vm518_vm10 = vcmp.eq.s32.totalorder %v7273_v60, %v7084_v39  ;;  %vm774_vm3 = vcmp.eq.s32.totalorder %v7276_v61, %v7084_v39  ;;  %v7621_v61 = vadd.s32 880, %v7053_v23  ;;  %v7654_v60 = vadd.s32 608, %v7053_v23  ;;  %12457 = vst [vmem:[#allocation81_spill] sm:$0xff] %v7657_v59 }
  0x5c   :  { %5796 = vmatprep.subr.msk.mxu0 %vm543_vm11, %v12126_v32  ;;  %5860 = vmatprep.subr.msk.mxu1 %vm799_vm12, %v12126_v32  ;;  %vm511_vm11 = vcmp.eq.s32.totalorder %v7291_v62, %v7064_v31  ;;  %vm767_vm12 = vcmp.eq.s32.totalorder %v7294_v63, %v7064_v31  ;;  %12460 = vst [vmem:[#allocation84_spill] sm:$0xff] %v7690_v58  ;;  %12465 = vst [vmem:[#allocation89_spill] sm:$0xff] %v7729_v55 }
  0x5d   :  { %5797 = vmatpush1.msk.msra.mxu0 %vm542_vm13, %v12126_v32  ;;  %5861 = vmatpush1.msk.msra.mxu1 %vm798_vm14, %v12126_v32  ;;  %vm510_vm13 = vcmp.eq.s32.totalorder %v7291_v62, %v7084_v39  ;;  %vm766_vm14 = vcmp.eq.s32.totalorder %v7294_v63, %v7084_v39  ;;  %v7585_v63 = vadd.s32 384, %v7053_v23  ;;  %v7618_v62 = vadd.s32 624, %v7053_v23  ;;  %12453 = vst [vmem:[#allocation77_spill] sm:$0xff] %v7621_v61 }
  0x5e   :  { %5798 = vmatprep.subr.msk.mxu0 %vm535_vm15, %v12126_v32  ;;  %5862 = vmatprep.subr.msk.mxu1 %vm791_vm0, %v12126_v32  ;;  %vm503_vm15 = vcmp.eq.s32.totalorder %v7053_v23, %v7064_v31  ;;  %vm759_vm0 = vcmp.eq.s32.totalorder %v7309_v1, %v7064_v31  ;;  %12456 = vst [vmem:[#allocation80_spill] sm:$0xff] %v7654_v60  ;;  %12468 = vst [vmem:[#allocation92_spill] sm:$0xff] %v7762_v54 }
  0x5f   :  { %5799 = vmatpush1.msk.msra.mxu0 %vm534_vm1, %v12126_v32  ;;  %5863 = vmatpush1.msk.msra.mxu1 %vm790_vm8, %v12126_v32  ;;  %vm502_vm1 = vcmp.eq.s32.totalorder %v7053_v23, %v7084_v39  ;;  %vm758_vm8 = vcmp.eq.s32.totalorder %v7309_v1, %v7084_v39  ;;  %v7582_v1 = vadd.s32 128, %v7053_v23  ;;  %12449 = vst [vmem:[#allocation73_spill] sm:$0xff] %v7585_v63  ;;  %12452 = vst [vmem:[#allocation76_spill] sm:$0xff] %v7618_v62 }
  0x60   :  { %5800 = vmatprep.subr.msk.mxu0 %vm527_vm2, %v12126_v32  ;;  %5864 = vmatprep.subr.msk.mxu1 %vm783_vm4, %v12126_v32  ;;  %vm751_vm2 = vcmp.eq.s32.totalorder %v7324_v2, %v7064_v31  ;;  %vm1007_vm4 = vcmp.eq.s32.totalorder %v7327_v4, %v7064_v31  ;;  %12469 = vst [vmem:[#allocation93_spill] sm:$0xff] %v7765_v53  ;;  %12472 = vst [vmem:[#allocation96_spill] sm:$0xff] %v7798_v52 }
  0x61   :  { %5801 = vmatpush1.msk.msra.mxu0 %vm526_vm5, %v12126_v32  ;;  %5865 = vmatpush1.msk.msra.mxu1 %vm782_vm6, %v12126_v32  ;;  %vm750_vm5 = vcmp.eq.s32.totalorder %v7324_v2, %v7084_v39  ;;  %vm1006_vm6 = vcmp.eq.s32.totalorder %v7327_v4, %v7084_v39  ;;  %v7546_v4 = vadd.s32 144, %v7053_v23  ;;  %v7549_v2 = vadd.s32 400, %v7053_v23  ;;  %12448 = vst [vmem:[#allocation72_spill] sm:$0xff] %v7582_v1 }
  0x62   :  { %5802 = vmatprep.subr.msk.mxu0 %vm519_vm7, %v12126_v32  ;;  %5866 = vmatprep.subr.msk.mxu1 %vm775_vm9, %v12126_v32  ;;  %vm743_vm7 = vcmp.eq.s32.totalorder %v7342_v6, %v7064_v31  ;;  %vm999_vm9 = vcmp.eq.s32.totalorder %v7345_v8, %v7064_v31  ;;  %12473 = vst [vmem:[#allocation97_spill] sm:$0xff] %v7801_v51  ;;  %12474 = vst [vmem:[#allocation98_spill] sm:$0xff] %v7834_v50 }
  0x63   :  { %5803 = vmatpush1.msk.msra.mxu0 %vm518_vm10, %v12126_v32  ;;  %5867 = vmatpush1.msk.msra.mxu1 %vm774_vm3, %v12126_v32  ;;  %vm742_vm10 = vcmp.eq.s32.totalorder %v7342_v6, %v7084_v39  ;;  %vm998_vm3 = vcmp.eq.s32.totalorder %v7345_v8, %v7084_v39  ;;  %v7510_v8 = vadd.s32 160, %v7053_v23  ;;  %v7513_v6 = vadd.s32 416, %v7053_v23  ;;  %12444 = vst [vmem:[#allocation68_spill] sm:$0xff] %v7546_v4 }
  0x64   :  { %5804 = vmatprep.subr.msk.mxu0 %vm511_vm11, %v12126_v32  ;;  %5868 = vmatprep.subr.msk.mxu1 %vm767_vm12, %v12126_v32  ;;  %vm735_vm11 = vcmp.eq.s32.totalorder %v7354_v9, %v7064_v31  ;;  %vm991_vm12 = vcmp.eq.s32.totalorder %v7357_v10, %v7064_v31  ;;  %12445 = vst [vmem:[#allocation69_spill] sm:$0xff] %v7549_v2  ;;  %12478 = vst [vmem:[#allocation102_spill] sm:$0xff] %v7873_v48 }
  0x65   :  { %5805 = vmatpush1.msk.msra.mxu0 %vm510_vm13, %v12126_v32  ;;  %5869 = vmatpush1.msk.msra.mxu1 %vm766_vm14, %v12126_v32  ;;  %vm734_vm13 = vcmp.eq.s32.totalorder %v7354_v9, %v7084_v39  ;;  %vm990_vm14 = vcmp.eq.s32.totalorder %v7357_v10, %v7084_v39  ;;  %12440 = vst [vmem:[#allocation64_spill] sm:$0xff] %v7510_v8  ;;  %12441 = vst [vmem:[#allocation65_spill] sm:$0xff] %v7513_v6  ;;  %v7528_v10 = vadd.s32 152, %v7053_v23 }
  0x66   :  { %5806 = vmatprep.subr.msk.mxu0 %vm503_vm15, %v12126_v32  ;;  %5870 = vmatprep.subr.msk.mxu1 %vm759_vm0, %v12126_v32  ;;  %vm727_vm15 = vcmp.eq.s32.totalorder %v7366_v11, %v7064_v31  ;;  %vm983_vm0 = vcmp.eq.s32.totalorder %v7369_v12, %v7064_v31  ;;  %v7531_v9 = vadd.s32 408, %v7053_v23  ;;  %12480 = vst [vmem:[#allocation104_spill] sm:$0xff] %v7904_v47 }
  0x67   :  { %5807 = vmatpush1.msk.msra.mxu0 %vm502_vm1, %v12126_v32  ;;  %5871 = vmatpush1.msk.msra.mxu1 %vm758_vm8, %v12126_v32  ;;  %vm726_vm1 = vcmp.eq.s32.totalorder %v7366_v11, %v7084_v39  ;;  %vm982_vm8 = vcmp.eq.s32.totalorder %v7369_v12, %v7084_v39  ;;  %12442 = vst [vmem:[#allocation66_spill] sm:$0xff] %v7528_v10  ;;  %v7564_v12 = vadd.s32 136, %v7053_v23  ;;  %v7567_v11 = vadd.s32 392, %v7053_v23 }
  0x68   :  { %5808 = vmatprep.subr.msk.mxu0 %vm751_vm2, %v12126_v32  ;;  %5872 = vmatprep.subr.msk.mxu1 %vm1007_vm4, %v12126_v32  ;;  %vm719_vm2 = vcmp.eq.s32.totalorder %v7384_v13, %v7064_v31  ;;  %vm975_vm4 = vcmp.eq.s32.totalorder %v7387_v15, %v7064_v31  ;;  %12443 = vst [vmem:[#allocation67_spill] sm:$0xff] %v7531_v9 }
  0x69   :  { %5809 = vmatpush2.msk.msra.mxu0 %vm750_vm5, %v12126_v32  ;;  %5873 = vmatpush2.msk.msra.mxu1 %vm1006_vm6, %v12126_v32  ;;  %vm718_vm5 = vcmp.eq.s32.totalorder %v7384_v13, %v7084_v39  ;;  %vm974_vm6 = vcmp.eq.s32.totalorder %v7387_v15, %v7084_v39  ;;  %12446 = vst [vmem:[#allocation70_spill] sm:$0xff] %v7564_v12  ;;  %12447 = vst [vmem:[#allocation71_spill] sm:$0xff] %v7567_v11  ;;  %v7600_v15 = vadd.s32 632, %v7053_v23 }
  0x6a   :  { %5810 = vmatprep.subr.msk.mxu0 %vm743_vm7, %v12126_v32  ;;  %5874 = vmatprep.subr.msk.mxu1 %vm999_vm9, %v12126_v32  ;;  %vm711_vm7 = vcmp.eq.s32.totalorder %v7402_v16, %v7064_v31  ;;  %vm967_vm9 = vcmp.eq.s32.totalorder %v7405_v18, %v7064_v31  ;;  %v7603_v13 = vadd.s32 888, %v7053_v23 }
  0x6b   :  { %5811 = vmatpush2.msk.msra.mxu0 %vm742_vm10, %v12126_v32  ;;  %5875 = vmatpush2.msk.msra.mxu1 %vm998_vm3, %v12126_v32  ;;  %vm710_vm10 = vcmp.eq.s32.totalorder %v7402_v16, %v7084_v39  ;;  %vm966_vm3 = vcmp.eq.s32.totalorder %v7405_v18, %v7084_v39  ;;  %12450 = vst [vmem:[#allocation74_spill] sm:$0xff] %v7600_v15  ;;  %v7636_v18 = vadd.s32 616, %v7053_v23  ;;  %v7639_v16 = vadd.s32 872, %v7053_v23 }
  0x6c   :  { %5812 = vmatprep.subr.msk.mxu0 %vm735_vm11, %v12126_v32  ;;  %5876 = vmatprep.subr.msk.mxu1 %vm991_vm12, %v12126_v32  ;;  %vm703_vm11 = vcmp.eq.s32.totalorder %v7420_v19, %v7064_v31  ;;  %vm959_vm12 = vcmp.eq.s32.totalorder %v7423_v20, %v7064_v31  ;;  %12451 = vst [vmem:[#allocation75_spill] sm:$0xff] %v7603_v13 }
  0x6d   :  { %5813 = vmatpush2.msk.msra.mxu0 %vm734_vm13, %v12126_v32  ;;  %5877 = vmatpush2.msk.msra.mxu1 %vm990_vm14, %v12126_v32  ;;  %vm702_vm13 = vcmp.eq.s32.totalorder %v7420_v19, %v7084_v39  ;;  %vm958_vm14 = vcmp.eq.s32.totalorder %v7423_v20, %v7084_v39  ;;  %12454 = vst [vmem:[#allocation78_spill] sm:$0xff] %v7636_v18  ;;  %12455 = vst [vmem:[#allocation79_spill] sm:$0xff] %v7639_v16  ;;  %v7672_v20 = vadd.s32 600, %v7053_v23 }
  0x6e   :  { %5814 = vmatprep.subr.msk.mxu0 %vm727_vm15, %v12126_v32  ;;  %5878 = vmatprep.subr.msk.mxu1 %vm983_vm0, %v12126_v32  ;;  %vm695_vm15 = vcmp.eq.s32.totalorder %v7438_v21, %v7064_v31  ;;  %vm951_vm0 = vcmp.eq.s32.totalorder %v7441_v24, %v7064_v31  ;;  %v7675_v19 = vadd.s32 856, %v7053_v23 }
  0x6f   :  { %5815 = vmatpush2.msk.msra.mxu0 %vm726_vm1, %v12126_v32  ;;  %5879 = vmatpush2.msk.msra.mxu1 %vm982_vm8, %v12126_v32  ;;  %vm694_vm1 = vcmp.eq.s32.totalorder %v7438_v21, %v7084_v39  ;;  %vm950_vm8 = vcmp.eq.s32.totalorder %v7441_v24, %v7084_v39  ;;  %12458 = vst [vmem:[#allocation82_spill] sm:$0xff] %v7672_v20  ;;  %v7708_v24 = vadd.s32 584, %v7053_v23  ;;  %v7711_v21 = vadd.s32 840, %v7053_v23 }
  0x70   :  { %5816 = vmatprep.subr.msk.mxu0 %vm719_vm2, %v12126_v32  ;;  %5880 = vmatprep.subr.msk.mxu1 %vm975_vm4, %v12126_v32  ;;  %vm687_vm2 = vcmp.eq.s32.totalorder %v7456_v26, %v7064_v31  ;;  %vm943_vm4 = vcmp.eq.s32.totalorder %v7459_v27, %v7064_v31  ;;  %12459 = vst [vmem:[#allocation83_spill] sm:$0xff] %v7675_v19 }
  0x71   :  { %5817 = vmatpush2.msk.msra.mxu0 %vm718_vm5, %v12126_v32  ;;  %5881 = vmatpush2.msk.msra.mxu1 %vm974_vm6, %v12126_v32  ;;  %vm686_vm5 = vcmp.eq.s32.totalorder %v7456_v26, %v7084_v39  ;;  %vm942_vm6 = vcmp.eq.s32.totalorder %v7459_v27, %v7084_v39  ;;  %12462 = vst [vmem:[#allocation86_spill] sm:$0xff] %v7708_v24  ;;  %12463 = vst [vmem:[#allocation87_spill] sm:$0xff] %v7711_v21  ;;  %v7744_v27 = vadd.s32 568, %v7053_v23 }
  0x72   :  { %5818 = vmatprep.subr.msk.mxu0 %vm711_vm7, %v12126_v32  ;;  %5882 = vmatprep.subr.msk.mxu1 %vm967_vm9, %v12126_v32  ;;  %vm679_vm7 = vcmp.eq.s32.totalorder %v7474_v28, %v7064_v31  ;;  %vm935_vm9 = vcmp.eq.s32.totalorder %v7477_v30, %v7064_v31  ;;  %v7747_v26 = vadd.s32 824, %v7053_v23 }
  0x73   :  { %5819 = vmatpush2.msk.msra.mxu0 %vm710_vm10, %v12126_v32  ;;  %5883 = vmatpush2.msk.msra.mxu1 %vm966_vm3, %v12126_v32  ;;  %vm678_vm10 = vcmp.eq.s32.totalorder %v7474_v28, %v7084_v39  ;;  %vm934_vm3 = vcmp.eq.s32.totalorder %v7477_v30, %v7084_v39  ;;  %12466 = vst [vmem:[#allocation90_spill] sm:$0xff] %v7744_v27  ;;  %v7780_v30 = vadd.s32 552, %v7053_v23  ;;  %v7783_v28 = vadd.s32 808, %v7053_v23 }
  0x74   :  { %5820 = vmatprep.subr.msk.mxu0 %vm703_vm11, %v12126_v32  ;;  %5884 = vmatprep.subr.msk.mxu1 %vm959_vm12, %v12126_v32  ;;  %vm671_vm11 = vcmp.eq.s32.totalorder %v7492_v33, %v7064_v31  ;;  %vm927_vm12 = vcmp.eq.s32.totalorder %v7495_v36, %v7064_v31  ;;  %12467 = vst [vmem:[#allocation91_spill] sm:$0xff] %v7747_v26 }
  0x75   :  { %5821 = vmatpush2.msk.msra.mxu0 %vm702_vm13, %v12126_v32  ;;  %5885 = vmatpush2.msk.msra.mxu1 %vm958_vm14, %v12126_v32  ;;  %vm670_vm13 = vcmp.eq.s32.totalorder %v7492_v33, %v7084_v39  ;;  %vm926_vm14 = vcmp.eq.s32.totalorder %v7495_v36, %v7084_v39  ;;  %12470 = vst [vmem:[#allocation94_spill] sm:$0xff] %v7780_v30  ;;  %12471 = vst [vmem:[#allocation95_spill] sm:$0xff] %v7783_v28  ;;  %v7816_v36 = vadd.s32 536, %v7053_v23 }
  0x76   :  { %5822 = vmatprep.subr.msk.mxu0 %vm695_vm15, %v12126_v32  ;;  %5886 = vmatprep.subr.msk.mxu1 %vm951_vm0, %v12126_v32  ;;  %vm663_vm15 = vcmp.eq.s32.totalorder %v7510_v8, %v7064_v31  ;;  %vm919_vm0 = vcmp.eq.s32.totalorder %v7513_v6, %v7064_v31  ;;  %v7819_v33 = vadd.s32 384, %v7011_v3  ;;  %v7870_v3 = vadd.s32 520, %v7053_v23 }
  0x77   :  { %5823 = vmatpush2.msk.msra.mxu0 %vm694_vm1, %v12126_v32  ;;  %5887 = vmatpush2.msk.msra.mxu1 %vm950_vm8, %v12126_v32  ;;  %vm662_vm1 = vcmp.eq.s32.totalorder %v7510_v8, %v7084_v39  ;;  %vm918_vm8 = vcmp.eq.s32.totalorder %v7513_v6, %v7084_v39  ;;  %v7852_v6 = vadd.s32 528, %v7053_v23  ;;  %v7855_v8 = vadd.s32 784, %v7053_v23 }
  0x78   :  { %5824 = vmatprep.subr.msk.mxu0 %vm687_vm2, %v12126_v32  ;;  %5888 = vmatprep.subr.msk.mxu1 %vm943_vm4, %v12126_v32  ;;  %vm655_vm2 = vcmp.eq.s32.totalorder %v7528_v10, %v7064_v31  ;;  %vm911_vm4 = vcmp.eq.s32.totalorder %v7531_v9, %v7064_v31  ;;  %12477 = vst [vmem:[#allocation101_spill] sm:$0xff] %v7870_v3 }
  0x79   :  { %5825 = vmatpush2.msk.msra.mxu0 %vm686_vm5, %v12126_v32  ;;  %5889 = vmatpush2.msk.msra.mxu1 %vm942_vm6, %v12126_v32  ;;  %vm654_vm5 = vcmp.eq.s32.totalorder %v7528_v10, %v7084_v39  ;;  %vm910_vm6 = vcmp.eq.s32.totalorder %v7531_v9, %v7084_v39  ;;  %12475 = vst [vmem:[#allocation99_spill] sm:$0xff] %v7852_v6  ;;  %12476 = vst [vmem:[#allocation100_spill] sm:$0xff] %v7855_v8  ;;  %v7888_v9 = vadd.s32 512, %v7053_v23  ;;  %v3574_v10 = vld [vmem:[%s12014_s1] sm:$0x3f] }
  0x7a   :  { %5826 = vmatprep.subr.msk.mxu0 %vm679_vm7, %v12126_v32  ;;  %5890 = vmatprep.subr.msk.mxu1 %vm935_vm9, %v12126_v32  ;;  %vm647_vm7 = vcmp.eq.s32.totalorder %v7546_v4, %v7064_v31  ;;  %vm903_vm9 = vcmp.eq.s32.totalorder %v7549_v2, %v7064_v31 }
  0x7b   :  { %5827 = vmatpush2.msk.msra.mxu0 %vm678_vm10, %v12126_v32  ;;  %5891 = vmatpush2.msk.msra.mxu1 %vm934_vm3, %v12126_v32  ;;  %vm646_vm10 = vcmp.eq.s32.totalorder %v7546_v4, %v7084_v39  ;;  %vm902_vm3 = vcmp.eq.s32.totalorder %v7549_v2, %v7084_v39  ;;  %12479 = vst [vmem:[#allocation103_spill] sm:$0xff] %v7888_v9  ;;  %v7923_v2 = vadd.s32 760, %v7053_v23  ;;  %v7926_v4 = vadd.s32 1016, %v7053_v23 }
  0x7c   :  { %5828 = vmatprep.subr.msk.mxu0 %vm671_vm11, %v12126_v32  ;;  %5892 = vmatprep.subr.msk.mxu1 %vm927_vm12, %v12126_v32  ;;  %vm639_vm11 = vcmp.eq.s32.totalorder %v7564_v12, %v7064_v31  ;;  %vm895_vm12 = vcmp.eq.s32.totalorder %v7567_v11, %v7064_v31 }
  0x7d   :  { %5829 = vmatpush2.msk.msra.mxu0 %vm670_vm13, %v12126_v32  ;;  %5893 = vmatpush2.msk.msra.mxu1 %vm926_vm14, %v12126_v32  ;;  %vm638_vm13 = vcmp.eq.s32.totalorder %v7564_v12, %v7084_v39  ;;  %vm894_vm14 = vcmp.eq.s32.totalorder %v7567_v11, %v7084_v39  ;;  %12481 = vst [vmem:[#allocation105_spill] sm:$0xff] %v7926_v4  ;;  %v7949_v12 = vadd.s32 1000, %v7053_v23  ;;  %v12482_v11 = vcvt.s32.f32 %v7819_v33 }
  0x7e   :  { %5830 = vmatprep.subr.msk.mxu0 %vm663_vm15, %v12126_v32  ;;  %5894 = vmatprep.subr.msk.mxu1 %vm919_vm0, %v12126_v32  ;;  %vm631_vm15 = vcmp.eq.s32.totalorder %v7582_v1, %v7064_v31  ;;  %vm887_vm0 = vcmp.eq.s32.totalorder %v7585_v63, %v7064_v31 }
  0x7f   :  { %5831 = vmatpush2.msk.msra.mxu0 %vm662_vm1, %v12126_v32  ;;  %5895 = vmatpush2.msk.msra.mxu1 %vm918_vm8, %v12126_v32  ;;  %vm630_vm1 = vcmp.eq.s32.totalorder %v7582_v1, %v7084_v39  ;;  %vm886_vm8 = vcmp.eq.s32.totalorder %v7585_v63, %v7084_v39  ;;  %v50_v42 = vadd.f32 0.5, %v12482_v11  ;;  %v12483_v11 = vcvt.s32.f32 %v7837_v49 }
  0x80   :  { %5832 = vmatprep.subr.msk.mxu0 %vm655_vm2, %v12126_v32  ;;  %5896 = vmatprep.subr.msk.mxu1 %vm911_vm4, %v12126_v32  ;;  %vm1135_vm2 = vcmp.eq.s32.totalorder %v7600_v15, %v7064_v31  ;;  %vm1391_vm4 = vcmp.eq.s32.totalorder %v7603_v13, %v7064_v31  ;;  %v12484_v63 = vmov 1.0  }
  0x81   :  { %5833 = vmatpush2.msk.msra.mxu0 %vm654_vm5, %v12126_v32  ;;  %5897 = vmatpush2.msk.msra.mxu1 %vm910_vm6, %v12126_v32  ;;  %vm1134_vm5 = vcmp.eq.s32.totalorder %v7600_v15, %v7084_v39  ;;  %vm1390_vm6 = vcmp.eq.s32.totalorder %v7603_v13, %v7084_v39  ;;  %v49_v41 = vadd.f32 0.5, %v12483_v11  ;;  %v8073_v11 = vadd.s32 984, %v7053_v23 }
  0x82   :  { %5834 = vmatprep.subr.msk.mxu0 %vm647_vm7, %v12126_v32  ;;  %5898 = vmatprep.subr.msk.mxu1 %vm903_vm9, %v12126_v32  ;;  %vm1127_vm7 = vcmp.eq.s32.totalorder %v7618_v62, %v7064_v31  ;;  %vm1383_vm9 = vcmp.eq.s32.totalorder %v7621_v61, %v7064_v31 }
  0x83   :  { %5835 = vmatpush2.msk.msra.mxu0 %vm646_vm10, %v12126_v32  ;;  %5899 = vmatpush2.msk.msra.mxu1 %vm902_vm3, %v12126_v32  ;;  %vm1126_vm10 = vcmp.eq.s32.totalorder %v7618_v62, %v7084_v39  ;;  %vm1382_vm3 = vcmp.eq.s32.totalorder %v7621_v61, %v7084_v39 }
  0x84   :  { %5836 = vmatprep.subr.msk.mxu0 %vm639_vm11, %v12126_v32  ;;  %5900 = vmatprep.subr.msk.mxu1 %vm895_vm12, %v12126_v32  ;;  %vm1119_vm11 = vcmp.eq.s32.totalorder %v7636_v18, %v7064_v31  ;;  %vm1375_vm12 = vcmp.eq.s32.totalorder %v7639_v16, %v7064_v31 }
  0x85   :  { %5837 = vmatpush2.msk.msra.mxu0 %vm638_vm13, %v12126_v32  ;;  %5901 = vmatpush2.msk.msra.mxu1 %vm894_vm14, %v12126_v32  ;;  %vm1118_vm13 = vcmp.eq.s32.totalorder %v7636_v18, %v7084_v39  ;;  %vm1374_vm14 = vcmp.eq.s32.totalorder %v7639_v16, %v7084_v39  ;;  %v12487_v16 = vcvt.s32.f32 %v7819_v33 }
  0x86   :  { %5838 = vmatprep.subr.msk.mxu0 %vm631_vm15, %v12126_v32  ;;  %5902 = vmatprep.subr.msk.mxu1 %vm887_vm0, %v12126_v32  ;;  %vm1111_vm15 = vcmp.eq.s32.totalorder %v7654_v60, %v7064_v31  ;;  %vm1367_vm0 = vcmp.eq.s32.totalorder %v7657_v59, %v7064_v31 }
  0x87   :  { %5839 = vmatpush2.msk.msra.mxu0 %vm630_vm1, %v12126_v32  ;;  %5903 = vmatpush2.msk.msra.mxu1 %vm886_vm8, %v12126_v32  ;;  %v7990_v32 = vadd.s32 736, %v7053_v23  ;;  %vm1110_vm1 = vcmp.eq.s32.totalorder %v7654_v60, %v7084_v39  ;;  %vm1366_vm8 = vcmp.eq.s32.totalorder %v7657_v59, %v7084_v39  ;;  %v8137_v59 = vadd.s32 976, %v7053_v23 }
  0x88   :  { %3647 = vmatmul.mubr.f32.vlgmr.msra.gmra.mxu0 %v3574_v10  ;;  %3718 = vmatmul.mubr.f32.vlgmr.msra.gmra.mxu1 %v3576_v46  ;;  %v8007_v46 = vadd.s32 992, %v7053_v23  ;;  %v8023_v10 = vmul.f32 0.03125, %v50_v42  ;;  %v8039_v42 = vmul.f32 0.03125, %v49_v41  ;;  %v8056_v41 = vadd.s32 728, %v7053_v23 }
  0x89   :  { %5904 = vmatprep.subr.msk.mxu0 %vm1135_vm2, %v12484_v63  ;;  %5968 = vmatprep.subr.msk.mxu1 %vm1391_vm4, %v12484_v63  ;;  %vm1103_vm2 = vcmp.eq.s32.totalorder %v7672_v20, %v7064_v31  ;;  %vm1359_vm4 = vcmp.eq.s32.totalorder %v7675_v19, %v7064_v31 }
  0x8a   :  { %5905 = vmatpush1.msk.msra.mxu0 %vm1134_vm5, %v12484_v63  ;;  %5969 = vmatpush1.msk.msra.mxu1 %vm1390_vm6, %v12484_v63  ;;  %vm1102_vm5 = vcmp.eq.s32.totalorder %v7672_v20, %v7084_v39  ;;  %vm1358_vm6 = vcmp.eq.s32.totalorder %v7675_v19, %v7084_v39  ;;  %v66_v61 = vfloor.f32 %v8023_v10  ;;  %v65_v10 = vfloor.f32 %v8039_v42 }
  0x8b   :  { %5906 = vmatprep.subr.msk.mxu0 %vm1127_vm7, %v12484_v63  ;;  %5970 = vmatprep.subr.msk.mxu1 %vm1383_vm9, %v12484_v63  ;;  %vm1095_vm7 = vcmp.eq.s32.totalorder %v7690_v58, %v7064_v31  ;;  %vm1351_vm9 = vcmp.eq.s32.totalorder %v7693_v57, %v7064_v31  ;;  %v8120_v42 = vadd.s32 720, %v7053_v23  ;;  %v8182_v20 = vadd.s32 712, %v7053_v23 }
  0x8c   :  { %5907 = vmatpush1.msk.msra.mxu0 %vm1126_vm10, %v12484_v63  ;;  %5971 = vmatpush1.msk.msra.mxu1 %vm1382_vm3, %v12484_v63  ;;  %vm1094_vm10 = vcmp.eq.s32.totalorder %v7690_v58, %v7084_v39  ;;  %v74_v60 = vmul.f32 32.0, %v66_v61  ;;  %v73_v19 = vmul.f32 32.0, %v65_v10  ;;  %vm1302_vm3 = vcmp.eq.s32.totalorder %v7801_v51, %v7084_v39 }
  0x8d   :  { %5908 = vmatprep.subr.msk.mxu0 %vm1119_vm11, %v12484_v63  ;;  %5972 = vmatprep.subr.msk.mxu1 %vm1375_vm12, %v12484_v63  ;;  %vm1087_vm11 = vcmp.eq.s32.totalorder %v7708_v24, %v7064_v31  ;;  %vm1343_vm12 = vcmp.eq.s32.totalorder %v7711_v21, %v7064_v31  ;;  %v8214_v58 = vadd.s32 704, %v7053_v23 }
  0x8e   :  { %5909 = vmatpush1.msk.msra.mxu0 %vm1118_vm13, %v12484_v63  ;;  %5973 = vmatpush1.msk.msra.mxu1 %vm1374_vm14, %v12484_v63  ;;  %vm1342_vm13 = vcmp.eq.s32.totalorder %v7711_v21, %v7084_v39  ;;  %vm1079_vm14 = vcmp.eq.s32.totalorder %v7726_v56, %v7064_v31  ;;  %v82_v18 = vsub.f32 %v12487_v16, %v74_v60  ;;  %v8231_v21 = vadd.s32 960, %v7053_v23 }
  0x8f   :  { %5910 = vmatprep.subr.msk.mxu0 %vm1111_vm15, %v12484_v63  ;;  %5974 = vmatprep.subr.msk.mxu1 %vm1367_vm0, %v12484_v63  ;;  %vm1078_vm15 = vcmp.eq.s32.totalorder %v7726_v56, %v7084_v39  ;;  %vm1334_vm0 = vcmp.eq.s32.totalorder %v7729_v55, %v7084_v39  ;;  %v12489_v60 = vcvt.s32.f32 %v7837_v49  ;;  %v4739_v49 = vadd.f32 -15.5, %v66_v61 }
  0x90   :  { %5911 = vmatpush1.msk.msra.mxu0 %vm1110_vm1, %v12484_v63  ;;  %5975 = vmatpush1.msk.msra.mxu1 %vm1366_vm8, %v12484_v63  ;;  %vm1327_vm1 = vcmp.eq.s32.totalorder %v7747_v26, %v7064_v31  ;;  %vm1070_vm8 = vcmp.eq.s32.totalorder %v7744_v27, %v7084_v39  ;;  %v91_v33 = vmul.f32 %v7015_v14, %v82_v18  ;;  %v4738_v18 = vadd.f32 -15.5, %v65_v10 }
  0x91   :  { %5912 = vmatprep.subr.msk.mxu0 %vm1103_vm2, %v12484_v63  ;;  %5976 = vmatprep.subr.msk.mxu1 %vm1359_vm4, %v12484_v63  ;;  %vm1063_vm2 = vcmp.eq.s32.totalorder %v7762_v54, %v7064_v31  ;;  %vm1319_vm4 = vcmp.eq.s32.totalorder %v7765_v53, %v7064_v31  ;;  %v81_v16 = vsub.f32 %v12489_v60, %v73_v19  ;;  %v8274_v61 = vadd.s32 696, %v7053_v23 }
  0x92   :  { %5913 = vmatpush1.msk.msra.mxu0 %vm1102_vm5, %v12484_v63  ;;  %5977 = vmatpush1.msk.msra.mxu1 %vm1358_vm6, %v12484_v63  ;;  %vm1318_vm5 = vcmp.eq.s32.totalorder %v7765_v53, %v7084_v39  ;;  %vm1310_vm6 = vcmp.eq.s32.totalorder %v7783_v28, %v7084_v39  ;;  %v100_v10 = vadd.f32 %v7017_v17, %v91_v33  ;;  %v8290_v60 = vadd.s32 952, %v7053_v23 }
  0x93   :  { %5914 = vmatprep.subr.msk.mxu0 %vm1095_vm7, %v12484_v63  ;;  %5978 = vmatprep.subr.msk.mxu1 %vm1351_vm9, %v12484_v63  ;;  %vm12485_vm7 = vcmp.eq.s32.totalorder %v7693_v57, %v7084_v39  ;;  %vm1054_vm9 = vcmp.eq.s32.totalorder %v7780_v30, %v7084_v39  ;;  %v8199_v57 = vadd.s32 968, %v7053_v23  ;;  %v90_v19 = vmul.f32 %v7015_v14, %v81_v16 }
  0x94   :  { %5915 = vmatpush1.msk.msra.mxu0 %vm1094_vm10, %v12484_v63  ;;  %5979 = vmatpush1.msk.msra.mxu1 %vm12485_vm7, %v12484_v63  ;;  %vm1303_vm10 = vcmp.eq.s32.totalorder %v7801_v51, %v7064_v31  ;;  %vm12490_vm7 = vcmp.eq.s32.totalorder %v7744_v27, %v7064_v31  ;;  %v4747_v33 = vadd.f32 -15.5, %v100_v10  ;;  %v124_v53 = vmul.f32 %v4738_v18, %v7020_v22 }
  0x95   :  { %5916 = vmatprep.subr.msk.mxu0 %vm1087_vm11, %v12484_v63  ;;  %5980 = vmatprep.subr.msk.mxu1 %vm1343_vm12, %v12484_v63  ;;  %vm12486_vm11 = vcmp.eq.s32.totalorder %v7708_v24, %v7084_v39  ;;  %vm1039_vm12 = vcmp.eq.s32.totalorder %v7816_v36, %v7064_v31  ;;  %v99_v16 = vadd.f32 %v7017_v17, %v90_v19  ;;  %v8368_v27 = vadd.s32 680, %v7053_v23 }
  0x96   :  { %5917 = vmatpush1.msk.msra.mxu0 %vm12486_vm11, %v12484_v63  ;;  %5981 = vmatpush1.msk.msra.mxu1 %vm1342_vm13, %v12484_v63  ;;  %vm12488_vm13 = vcmp.eq.s32.totalorder %v7729_v55, %v7064_v31  ;;  %vm1038_vm11 = vcmp.eq.s32.totalorder %v7816_v36, %v7084_v39  ;;  %v166_v19 = vmul.f32 %v4739_v49, %v7024_v25  ;;  %v8381_v51 = vadd.s32 936, %v7053_v23 }
  0x97   :  { %5918 = vmatprep.subr.msk.mxu0 %vm1079_vm14, %v12484_v63  ;;  %5982 = vmatprep.subr.msk.mxu1 %vm12488_vm13, %v12484_v63  ;;  %vm1031_vm14 = vcmp.eq.s32.totalorder %v7852_v6, %v7064_v31  ;;  %vm1287_vm13 = vcmp.eq.s32.totalorder %v7855_v8, %v7064_v31  ;;  %v4746_v10 = vadd.f32 -15.5, %v99_v16  ;;  %v8334_v16 = vadd.s32 688, %v7053_v23 }
  0x98   :  { %5919 = vmatpush1.msk.msra.mxu0 %vm1078_vm15, %v12484_v63  ;;  %5983 = vmatpush1.msk.msra.mxu1 %vm1334_vm0, %v12484_v63  ;;  %vm1286_vm0 = vcmp.eq.s32.totalorder %v7855_v8, %v7084_v39  ;;  %vm1279_vm15 = vcmp.eq.s32.totalorder %v7873_v48, %v7064_v31 }
  0x99   :  { %5920 = vmatprep.subr.msk.mxu0 %vm12490_vm7, %v12484_v63  ;;  %5984 = vmatprep.subr.msk.mxu1 %vm1327_vm1, %v12484_v63  ;;  %vm12491_vm7 = vcmp.eq.s32.totalorder %v7747_v26, %v7084_v39  ;;  %vm1023_vm1 = vcmp.eq.s32.totalorder %v7870_v3, %v7064_v31  ;;  %v125_v26 = vmul.f32 %v4739_v49, %v7020_v22 }
  0x9a   :  { %5921 = vmatpush1.msk.msra.mxu0 %vm1070_vm8, %v12484_v63  ;;  %5985 = vmatpush1.msk.msra.mxu1 %vm12491_vm7, %v12484_v63  ;;  %vm1022_vm8 = vcmp.eq.s32.totalorder %v7870_v3, %v7084_v39  ;;  %vm1270_vm7 = vcmp.eq.s32.totalorder %v7904_v47, %v7084_v39  ;;  %v165_v49 = vmul.f32 %v4738_v18, %v7024_v25 }
  0x9b   :  { %5922 = vmatprep.subr.msk.mxu0 %vm1063_vm2, %v12484_v63  ;;  %5986 = vmatprep.subr.msk.mxu1 %vm1319_vm4, %v12484_v63  ;;  %vm12492_vm2 = vcmp.eq.s32.totalorder %v7762_v54, %v7084_v39  ;;  %vm1014_vm4 = vcmp.eq.s32.totalorder %v7888_v9, %v7084_v39  ;;  %v134_v18 = vmul.f32 %v4747_v33, %v7024_v25 }
  0x9c   :  { %5923 = vmatpush1.msk.msra.mxu0 %vm12492_vm2, %v12484_v63  ;;  %5987 = vmatpush1.msk.msra.mxu1 %vm1318_vm5, %v12484_v63  ;;  %vm12493_vm2 = vcmp.eq.s32.totalorder %v7780_v30, %v7064_v31  ;;  %vm12494_vm5 = vcmp.eq.s32.totalorder %v7783_v28, %v7064_v31  ;;  %v174_v54 = vmul.f32 %v4747_v33, %v7020_v22  ;;  %v8351_v28 = vadd.s32 944, %v7053_v23 }
  0x9d   :  { %5924 = vmatprep.subr.msk.mxu0 %vm12493_vm2, %v12484_v63  ;;  %5988 = vmatprep.subr.msk.mxu1 %vm12494_vm5, %v12484_v63  ;;  %vm1263_vm2 = vcmp.eq.s32.totalorder %v7923_v2, %v7064_v31  ;;  %v133_v33 = vmul.f32 %v4746_v10, %v7024_v25  ;;  %v173_v30 = vmul.f32 %v4746_v10, %v7020_v22 }
  0x9e   :  { %5925 = vmatpush1.msk.msra.mxu0 %vm1054_vm9, %v12484_v63  ;;  %5989 = vmatpush1.msk.msra.mxu1 %vm1310_vm6, %v12484_v63  ;;  %vm12495_vm9 = vcmp.eq.s32.totalorder %v7798_v52, %v7064_v31  ;;  %vm1262_vm6 = vcmp.eq.s32.totalorder %v7923_v2, %v7084_v39  ;;  %vm1511_vm5 = vcmp.eq.s32.totalorder %v7943_v44, %v7064_v31 }
  0x9f   :  { %5926 = vmatprep.subr.msk.mxu0 %vm12495_vm9, %v12484_v63  ;;  %5990 = vmatprep.subr.msk.mxu1 %vm1303_vm10, %v12484_v63  ;;  %vm12496_vm9 = vcmp.eq.s32.totalorder %v7798_v52, %v7084_v39  ;;  %vm1255_vm10 = vcmp.eq.s32.totalorder %v7940_v45, %v7064_v31  ;;  %v142_v10 = vsub.f32 %v125_v26, %v134_v18 }
  0xa0   :  { %5927 = vmatpush1.msk.msra.mxu0 %vm12496_vm9, %v12484_v63  ;;  %5991 = vmatpush1.msk.msra.mxu1 %vm1302_vm3, %v12484_v63  ;;  %v182_v55 = vadd.f32 %v174_v54, %v166_v19  ;;  %vm12497_vm3 = vcmp.eq.s32.totalorder %v7834_v50, %v7064_v31  ;;  %v141_v52 = vsub.f32 %v124_v53, %v133_v33 }
  0xa1   :  { %5928 = vmatprep.subr.msk.mxu0 %vm1039_vm12, %v12484_v63  ;;  %5992 = vmatprep.subr.msk.mxu1 %vm12497_vm3, %v12484_v63  ;;  %v181_v56 = vadd.f32 %v173_v30, %v165_v49  ;;  %vm12498_vm12 = vcmp.eq.s32.totalorder %v7834_v50, %v7084_v39  ;;  %vm1510_vm3 = vcmp.eq.s32.totalorder %v7943_v44, %v7084_v39  ;;  %v150_v54 = vadd.f32 15.5, %v142_v10 }
  0xa2   :  { %5929 = vmatpush1.msk.msra.mxu0 %vm1038_vm11, %v12484_v63  ;;  %5993 = vmatpush1.msk.msra.mxu1 %vm12498_vm12, %v12484_v63  ;;  %v8395_v26 = vadd.f32 15.5, %v182_v55  ;;  %vm1503_vm11 = vcmp.eq.s32.totalorder %v7949_v12, %v7064_v31  ;;  %vm1502_vm9 = vcmp.eq.s32.totalorder %v7949_v12, %v7084_v39  ;;  %v8411_v53 = vadd.f32 15.5, %v141_v52 }
  0xa3   :  { %5930 = vmatprep.subr.msk.mxu0 %vm1031_vm14, %v12484_v63  ;;  %5994 = vmatprep.subr.msk.mxu1 %vm1287_vm13, %v12484_v63  ;;  %vm12499_vm14 = vcmp.eq.s32.totalorder %v7852_v6, %v7084_v39  ;;  %vm1239_vm13 = vcmp.eq.s32.totalorder %v7990_v32, %v7064_v31  ;;  %vm1495_vm12 = vcmp.eq.s32.totalorder %v8007_v46, %v7064_v31  ;;  %v6826_v55 = vcvt.f32.s32 %v150_v54 }
  0xa4   :  { %5931 = vmatpush1.msk.msra.mxu0 %vm12499_vm14, %v12484_v63  ;;  %5995 = vmatpush1.msk.msra.mxu1 %vm1286_vm0, %v12484_v63  ;;  %v8425_v30 = vadd.f32 15.5, %v181_v56  ;;  %vm1238_vm0 = vcmp.eq.s32.totalorder %v7990_v32, %v7084_v39  ;;  %v6824_v52 = vand.u32 2147483647, %v150_v54  ;;  %v6890_v19 = vcvt.f32.s32 %v8395_v26 }
  0xa5   :  { %5932 = vmatprep.subr.msk.mxu0 %vm1023_vm1, %v12484_v63  ;;  %5996 = vmatprep.subr.msk.mxu1 %vm1279_vm15, %v12484_v63  ;;  %v6818_v49 = vcvt.f32.s32 %v8411_v53  ;;  %vm12500_vm1 = vcmp.eq.s32.totalorder %v7873_v48, %v7084_v39  ;;  %v6827_v56 = vcvt.s32.f32 %v6826_v55  ;;  %v6829_v18 = vand.u32 2147483648, %v150_v54 }
  0xa6   :  { %5933 = vmatpush1.msk.msra.mxu0 %vm1022_vm8, %v12484_v63  ;;  %5997 = vmatpush1.msk.msra.mxu1 %vm12500_vm1, %v12484_v63  ;;  %v6888_v33 = vand.u32 2147483647, %v8395_v26  ;;  %v6893_v10 = vand.u32 2147483648, %v8395_v26  ;;  %vm12501_vm15 = vcmp.eq.s32.totalorder %v7888_v9, %v7064_v31  ;;  %vm12502_vm8 = vcmp.eq.s32.totalorder %v7904_v47, %v7064_v31 }
  0xa7   :  { %5934 = vmatprep.subr.msk.mxu0 %vm12501_vm15, %v12484_v63  ;;  %5998 = vmatprep.subr.msk.mxu1 %vm12502_vm8, %v12484_v63  ;;  %v6891_v3 = vcvt.s32.f32 %v6890_v19  ;;  %v6816_v48 = vand.u32 2147483647, %v8411_v53  ;;  %v6819_v8 = vcvt.s32.f32 %v6818_v49  ;;  %v6821_v55 = vand.u32 2147483648, %v8411_v53 }
  0xa8   :  { %5935 = vmatpush1.msk.msra.mxu0 %vm1014_vm4, %v12484_v63  ;;  %5999 = vmatpush1.msk.msra.mxu1 %vm1270_vm7, %v12484_v63  ;;  %vm1494_vm14 = vcmp.eq.s32.totalorder %v8007_v46, %v7084_v39  ;;  %v6828_v6 = vand.u32 2147483647, %v6827_v56  ;;  %v6880_v19 = vand.u32 2147483647, %v8425_v30  ;;  %v6882_v49 = vcvt.f32.s32 %v8425_v30 }
  0xa9   :  { %5936 = vmatprep.subr.msk.mxu0 %vm1263_vm2, %v12484_v63  ;;  %vm12503_vm4 = vcmp.eq.s32.totalorder %v7926_v4, %v7064_v31  ;;  %vm1231_vm7 = vcmp.eq.s32.totalorder %v8056_v41, %v7064_v31  ;;  %vm8481_vm1 = vcmp.lt.f32.partialorder %v6824_v52, 8388608.0  ;;  %v6892_v56 = vand.u32 2147483647, %v6891_v3 }
  0xaa   :  { %6000 = vmatprep.subr.msk.mxu1 %vm12503_vm4, %v12484_v63  ;;  %v6820_v9 = vand.u32 2147483647, %v6819_v8  ;;  %5937 = vmatpush2.msk.msra.mxu0 %vm1262_vm6, %v12484_v63  ;;  %vm12506_vm2 = vcmp.eq.s32.totalorder %v7926_v4, %v7084_v39  ;;  %vm1487_vm15 = vcmp.eq.s32.totalorder %v8073_v11, %v7064_v31  ;;  %v6830_v50 = vor.u32 %v6829_v18, %v6828_v6 }
  0xab   :  { %6001 = vmatpush2.msk.msra.mxu1 %vm12506_vm2, %v12484_v63  ;;  %vm8495_vm8 = vcmp.lt.f32.partialorder %v6888_v33, 8388608.0  ;;  %v6883_v3 = vcvt.s32.f32 %v6882_v49  ;;  %5938 = vmatprep.subr.msk.mxu0 %vm1255_vm10, %v12484_v63  ;;  %v6894_v8 = vor.u32 %v6893_v10, %v6892_v56  ;;  %vm8507_vm6 = vcmp.lt.f32.partialorder %v6816_v48, 8388608.0 }
  0xac   :  { %6002 = vmatprep.subr.msk.mxu1 %vm1511_vm5, %v12484_v63  ;;  %v6822_v6 = vor.u32 %v6821_v55, %v6820_v9  ;;  %v6885_v18 = vand.u32 2147483648, %v8425_v30  ;;  %vm12511_vm4 = vcmp.eq.s32.totalorder %v7940_v45, %v7084_v39  ;;  %v6831_v48 = vsel %vm8481_vm1, %v6830_v50, %v150_v54  ;;  %v12524_v9 = vld [vmem:[#allocation19_spill] sm:$0xff] }
  0xad   :  { %5939 = vmatpush2.msk.msra.mxu0 %vm12511_vm4, %v12484_v63  ;;  %6003 = vmatpush2.msk.msra.mxu1 %vm1510_vm3, %v12484_v63  ;;  %vm8524_vm10 = vcmp.lt.f32.partialorder %v6880_v19, 8388608.0  ;;  %v6884_v33 = vand.u32 2147483647, %v6883_v3  ;;  %vm12514_vm2 = vcmp.eq.s32.totalorder %v7946_v43, %v7064_v31  ;;  %v6895_v47 = vsel %vm8495_vm8, %v6894_v8, %v8395_v26 }
  0xae   :  { %5940 = vmatprep.subr.msk.mxu0 %vm12514_vm2, %v12484_v63  ;;  %6004 = vmatprep.subr.msk.mxu1 %vm1503_vm11, %v12484_v63  ;;  %vm206_vm3 = vcmp.ge.f32.partialorder %v6831_v48, 0.0  ;;  %vm214_vm1 = vcmp.le.f32.partialorder %v6831_v48, 31.0  ;;  %v263_v50 = vadd.f32 %v6831_v48, %v7035_v5  ;;  %vm12515_vm4 = vcmp.eq.s32.totalorder %v7946_v43, %v7084_v39 }
  0xaf   :  { %5941 = vmatpush2.msk.msra.mxu0 %vm12515_vm4, %v12484_v63  ;;  %6005 = vmatpush2.msk.msra.mxu1 %vm1502_vm9, %v12484_v63  ;;  %vm222_vm2 = vmand %vm206_vm3, %vm214_vm1  ;;  %vm230_vm11 = vcmp.ge.f32.partialorder %v6895_v47, 0.0  ;;  %vm246_vm5 = vcmp.le.f32.partialorder %v6895_v47, 31.0  ;;  %v8549_v54 = vadd.f32 %v6895_v47, %v7037_v7  ;;  %v6823_v26 = vsel %vm8507_vm6, %v6822_v6, %v8411_v53 }
  0xb0   :  { %5942 = vmatprep.subr.msk.mxu0 %vm1239_vm13, %v12484_v63  ;;  %6006 = vmatprep.subr.msk.mxu1 %vm1495_vm12, %v12484_v63  ;;  %vm1486_vm9 = vcmp.eq.s32.totalorder %v8073_v11, %v7084_v39  ;;  %vm238_vm8 = vmand %vm222_vm2, %vm230_vm11  ;;  %vm280_vm3 = vcmp.ge.f32.partialorder %v263_v50, 0.0  ;;  %vm296_vm1 = vcmp.le.f32.partialorder %v263_v50, 31.0  ;;  %v6886_v10 = vor.u32 %v6885_v18, %v6884_v33 }
  0xb1   :  { %5943 = vmatpush2.msk.msra.mxu0 %vm1238_vm0, %v12484_v63  ;;  %6007 = vmatpush2.msk.msra.mxu1 %vm1494_vm14, %v12484_v63  ;;  %vm1223_vm12 = vcmp.eq.s32.totalorder %v8120_v42, %v7064_v31  ;;  %vm1479_vm13 = vcmp.eq.s32.totalorder %v8137_v59, %v7064_v31  ;;  %vm1222_vm6 = vcmp.eq.s32.totalorder %v8120_v42, %v7084_v39  ;;  %vm254_vm4 = vmand %vm238_vm8, %vm246_vm5  ;;  %vm312_vm2 = vcmp.ge.f32.partialorder %v8549_v54, 0.0 }
  0xb2   :  { %5944 = vmatprep.subr.msk.mxu0 %vm1231_vm7, %v12484_v63  ;;  %6008 = vmatprep.subr.msk.mxu1 %vm1487_vm15, %v12484_v63  ;;  %vm1478_vm0 = vcmp.eq.s32.totalorder %v8137_v59, %v7084_v39  ;;  %vm288_vm14 = vmand %vm254_vm4, %vm280_vm3  ;;  %vm328_vm11 = vcmp.le.f32.partialorder %v8549_v54, 31.0  ;;  %v6887_v4 = vsel %vm8524_vm10, %v6886_v10, %v8425_v30  ;;  %v262_v53 = vadd.f32 %v6823_v26, %v7035_v5 }
  0xb3   :  { %vm12516_vm7 = vcmp.eq.s32.totalorder %v8056_v41, %v7084_v39  ;;  %6009 = vmatpush2.msk.msra.mxu1 %vm1486_vm9, %v12484_v63  ;;  %vm1215_vm15 = vcmp.eq.s32.totalorder %v8182_v20, %v7064_v31  ;;  %vm1471_vm5 = vcmp.eq.s32.totalorder %v8199_v57, %v7064_v31  ;;  %vm304_vm10 = vmand %vm288_vm14, %vm296_vm1  ;;  %vm205_vm8 = vcmp.ge.f32.partialorder %v6823_v26, 0.0 }
  0xb4   :  { %5945 = vmatpush2.msk.msra.mxu0 %vm12516_vm7, %v12484_v63  ;;  %vm213_vm3 = vcmp.le.f32.partialorder %v6823_v26, 31.0  ;;  %6010 = vmatprep.subr.msk.mxu1 %vm1479_vm13, %v12484_v63  ;;  %vm1214_vm9 = vcmp.eq.s32.totalorder %v8182_v20, %v7084_v39  ;;  %vm1470_vm4 = vcmp.eq.s32.totalorder %v8199_v57, %v7084_v39  ;;  %vm320_vm1 = vmand %vm304_vm10, %vm312_vm2  ;;  %vm229_vm14 = vcmp.ge.f32.partialorder %v6887_v4, 0.0 }
  0xb5   :  { %5946 = vmatprep.subr.msk.mxu0 %vm1223_vm12, %v12484_v63  ;;  %v271_v30 = vadd.f32 %v6887_v4, %v7037_v7  ;;  %6011 = vmatpush2.msk.msra.mxu1 %vm1478_vm0, %v12484_v63  ;;  %vm1207_vm12 = vcmp.eq.s32.totalorder %v8214_v58, %v7064_v31  ;;  %vm1463_vm13 = vcmp.eq.s32.totalorder %v8231_v21, %v7064_v31  ;;  %vm8637_vm2 = vmand %vm320_vm1, %vm328_vm11  ;;  %v344_v19 = vmul.f32 32.0, %v263_v50 }
  0xb6   :  { %5947 = vmatpush2.msk.msra.mxu0 %vm1222_vm6, %v12484_v63  ;;  %vm245_vm7 = vcmp.le.f32.partialorder %v6887_v4, 31.0  ;;  %6012 = vmatprep.subr.msk.mxu1 %vm1471_vm5, %v12484_v63  ;;  %vm1206_vm6 = vcmp.eq.s32.totalorder %v8214_v58, %v7084_v39  ;;  %vm1462_vm0 = vcmp.eq.s32.totalorder %v8231_v21, %v7084_v39  ;;  %v8654_v49 = vadd.s32 672, %v7053_v23  ;;  %vm221_vm11 = vmand %vm205_vm8, %vm213_vm3 }
  0xb7   :  { %5948 = vmatprep.subr.msk.mxu0 %vm1215_vm15, %v12484_v63  ;;  %vm279_vm10 = vcmp.ge.f32.partialorder %v262_v53, 0.0  ;;  %6013 = vmatpush2.msk.msra.mxu1 %vm1470_vm4, %v12484_v63  ;;  %vm1199_vm15 = vcmp.eq.s32.totalorder %v8274_v61, %v7064_v31  ;;  %vm1455_vm5 = vcmp.eq.s32.totalorder %v8290_v60, %v7064_v31  ;;  %vm237_vm1 = vmand %vm221_vm11, %vm229_vm14  ;;  %vm295_vm8 = vcmp.le.f32.partialorder %v262_v53, 31.0 }
  0xb8   :  { %5949 = vmatpush2.msk.msra.mxu0 %vm1214_vm9, %v12484_v63  ;;  %v343_v56 = vmul.f32 32.0, %v262_v53  ;;  %6014 = vmatprep.subr.msk.mxu1 %vm1463_vm13, %v12484_v63  ;;  %vm1198_vm3 = vcmp.eq.s32.totalorder %v8274_v61, %v7084_v39  ;;  %vm1454_vm9 = vcmp.eq.s32.totalorder %v8290_v60, %v7084_v39  ;;  %v8684_v52 = vadd.s32 928, %v7053_v23  ;;  %vm253_vm4 = vmand %vm237_vm1, %vm245_vm7 }
  0xb9   :  { %5950 = vmatprep.subr.msk.mxu0 %vm1207_vm12, %v12484_v63  ;;  %vm311_vm14 = vcmp.ge.f32.partialorder %v271_v30, 0.0  ;;  %6015 = vmatpush2.msk.msra.mxu1 %vm1462_vm0, %v12484_v63  ;;  %vm1191_vm12 = vcmp.eq.s32.totalorder %v8334_v16, %v7064_v31  ;;  %vm1447_vm13 = vcmp.eq.s32.totalorder %v8351_v28, %v7064_v31  ;;  %v352_v3 = vadd.f32 %v344_v19, %v8549_v54  ;;  %vm287_vm7 = vmand %vm253_vm4, %vm279_vm10  ;;  %v3579_v19 = vld [vmem:[%s12014_s1 + $0x28] sm:$0x3f] }
  0xba   :  { %5951 = vmatpush2.msk.msra.mxu0 %vm1206_vm6, %v12484_v63  ;;  %vm327_vm11 = vcmp.le.f32.partialorder %v271_v30, 31.0  ;;  %6016 = vmatprep.subr.msk.mxu1 %vm1455_vm5, %v12484_v63  ;;  %vm1190_vm6 = vcmp.eq.s32.totalorder %v8334_v16, %v7084_v39  ;;  %vm1446_vm0 = vcmp.eq.s32.totalorder %v8351_v28, %v7084_v39  ;;  %v8714_v8 = vadd.s32 664, %v7053_v23  ;;  %vm303_vm10 = vmand %vm287_vm7, %vm295_vm8 }
  0xbb   :  { %5952 = vmatprep.subr.msk.mxu0 %vm1199_vm15, %v12484_v63  ;;  %6017 = vmatpush2.msk.msra.mxu1 %vm1454_vm9, %v12484_v63  ;;  %vm1183_vm15 = vcmp.eq.s32.totalorder %v8368_v27, %v7064_v31  ;;  %vm1439_vm5 = vcmp.eq.s32.totalorder %v8381_v51, %v7064_v31  ;;  %v8730_v6 = vadd.s32 920, %v7053_v23  ;;  %vm319_vm1 = vmand %vm303_vm10, %vm311_vm14  ;;  %v351_v18 = vadd.f32 %v343_v56, %v271_v30 }
  0xbc   :  { %5953 = vmatpush2.msk.msra.mxu0 %vm1198_vm3, %v12484_v63  ;;  %6018 = vmatprep.subr.msk.mxu1 %vm1447_vm13, %v12484_v63  ;;  %vm1182_vm8 = vcmp.eq.s32.totalorder %v8368_v27, %v7084_v39  ;;  %vm1438_vm3 = vcmp.eq.s32.totalorder %v8381_v51, %v7084_v39  ;;  %v8746_v48 = vadd.s32 656, %v7053_v23  ;;  %vm8749_vm9 = vmand %vm319_vm1, %vm327_vm11  ;;  %vm1175_vm4 = vcmp.eq.s32.totalorder %v8654_v49, %v7064_v31 }
  0xbd   :  { %5954 = vmatprep.subr.msk.mxu0 %vm1191_vm12, %v12484_v63  ;;  %6019 = vmatpush2.msk.msra.mxu1 %vm1446_vm0, %v12484_v63  ;;  %vm1431_vm14 = vcmp.eq.s32.totalorder %v8684_v52, %v7064_v31  ;;  %v8766_v33 = vadd.s32 912, %v7053_v23  ;;  %v360_v47 = vsel %vm8637_vm2, %v352_v3, -1.0  ;;  %vm1174_vm12 = vcmp.eq.s32.totalorder %v8654_v49, %v7084_v39  ;;  %v3581_v3 = vld [vmem:[%s12014_s1 + $0x38] sm:$0x3f] }
  0xbe   :  { %5955 = vmatpush2.msk.msra.mxu0 %vm1190_vm6, %v12484_v63  ;;  %6020 = vmatprep.subr.msk.mxu1 %vm1439_vm5, %v12484_v63  ;;  %vm1430_vm13 = vcmp.eq.s32.totalorder %v8684_v52, %v7084_v39  ;;  %v8783_v50 = vadd.s32 648, %v7053_v23  ;;  %vm1167_vm2 = vcmp.eq.s32.totalorder %v8714_v8, %v7064_v31  ;;  %vm1423_vm7 = vcmp.eq.s32.totalorder %v8730_v6, %v7064_v31 }
  0xbf   :  { %5956 = vmatprep.subr.msk.mxu0 %vm1183_vm15, %v12484_v63  ;;  %6021 = vmatpush2.msk.msra.mxu1 %vm1438_vm3, %v12484_v63  ;;  %v8792_v54 = vadd.s32 904, %v7053_v23  ;;  %v359_v26 = vsel %vm8749_vm9, %v351_v18, -1.0  ;;  %vm1166_vm11 = vcmp.eq.s32.totalorder %v8714_v8, %v7084_v39  ;;  %vm1422_vm6 = vcmp.eq.s32.totalorder %v8730_v6, %v7084_v39  ;;  %v12523_v18 = vld [vmem:[#allocation18_spill] sm:$0xff] }
  0xc0   :  { %5957 = vmatpush2.msk.msra.mxu0 %vm1182_vm8, %v12484_v63  ;;  %6022 = vmatprep.subr.msk.mxu1 %vm1431_vm14, %v12484_v63  ;;  %v6934_v10 = vtrunc.f32 %v360_v47  ;;  %vm1159_vm0 = vcmp.eq.s32.totalorder %v8746_v48, %v7064_v31  ;;  %vm1415_vm10 = vcmp.eq.s32.totalorder %v8766_v33, %v7064_v31  ;;  %v8809_v4 = vadd.s32 640, %v7053_v23  ;;  %v12525_v47 = vld [vmem:[#allocation20_spill] sm:$0xff] }
  0xc1   :  { %5958 = vmatprep.subr.msk.mxu0 %vm1175_vm4, %v12484_v63  ;;  %6023 = vmatpush2.msk.msra.mxu1 %vm1430_vm13, %v12484_v63  ;;  %v8812_v53 = vadd.s32 896, %v7053_v23  ;;  %vm1158_vm15 = vcmp.eq.s32.totalorder %v8746_v48, %v7084_v39  ;;  %vm1414_vm5 = vcmp.eq.s32.totalorder %v8766_v33, %v7084_v39  ;;  %v6932_v30 = vtrunc.f32 %v359_v26  ;;  %v12526_v26 = vld [vmem:[#allocation21_spill] sm:$0xff] }
  0xc2   :  { %5959 = vmatpush2.msk.msra.mxu0 %vm1174_vm12, %v12484_v63  ;;  %12521 = vst [vmem:[#allocation106_spill] sm:$0xff] %v8809_v4  ;;  %6024 = vmatprep.subr.msk.mxu1 %vm1423_vm7, %v12484_v63  ;;  %vm1151_vm1 = vcmp.eq.s32.totalorder %v8783_v50, %v7064_v31  ;;  %vm1407_vm8 = vcmp.eq.s32.totalorder %v8792_v54, %v7064_v31  ;;  %v8832_v55 = vcvt.f32.s32 %v6934_v10  ;;  %v12527_v10 = vld [vmem:[#allocation22_spill] sm:$0xff] }
  0xc3   :  { %12522 = vst [vmem:[#allocation107_spill] sm:$0xff] %v8812_v53  ;;  %5960 = vmatprep.subr.msk.mxu0 %vm1167_vm2, %v12484_v63  ;;  %6025 = vmatpush2.msk.msra.mxu1 %vm1422_vm6, %v12484_v63  ;;  %vm1150_vm3 = vcmp.eq.s32.totalorder %v8783_v50, %v7084_v39  ;;  %vm1406_vm9 = vcmp.eq.s32.totalorder %v8792_v54, %v7084_v39  ;;  %v8847_v56 = vcvt.f32.s32 %v6932_v30  ;;  %v12528_v30 = vld [vmem:[#allocation23_spill] sm:$0xff] }
  0xc4   :  { %5961 = vmatpush2.msk.msra.mxu0 %vm1166_vm11, %v12484_v63  ;;  %6026 = vmatprep.subr.msk.mxu1 %vm1415_vm10, %v12484_v63  ;;  %vm1143_vm4 = vcmp.eq.s32.totalorder %v8809_v4, %v7064_v31  ;;  %vm1399_vm14 = vcmp.eq.s32.totalorder %v8812_v53, %v7064_v31  ;;  %vm1142_vm12 = vcmp.eq.s32.totalorder %v8809_v4, %v7084_v39  ;;  %v3578_v31 = vld [vmem:[%s12014_s1 + $0x20] sm:$0x3f] }
  0xc5   :  { %5962 = vmatprep.subr.msk.mxu0 %vm1159_vm0, %v12484_v63  ;;  %6027 = vmatpush2.msk.msra.mxu1 %vm1414_vm5, %v12484_v63  ;;  %vm1398_vm13 = vcmp.eq.s32.totalorder %v8812_v53, %v7084_v39  ;;  %vm625_vm2 = vcmp.eq.s32.totalorder %v7059_v29, %v8832_v55  ;;  %vm881_vm7 = vcmp.eq.s32.totalorder %v7062_v0, %v8832_v55  ;;  %v3580_v39 = vld [vmem:[%s12014_s1 + $0x30] sm:$0x3f] }
  0xc6   :  { %5963 = vmatpush2.msk.msra.mxu0 %vm1158_vm15, %v12484_v63  ;;  %6028 = vmatprep.subr.msk.mxu1 %vm1407_vm8, %v12484_v63  ;;  %vm624_vm11 = vcmp.eq.s32.totalorder %v7059_v29, %v8847_v56  ;;  %vm880_vm6 = vcmp.eq.s32.totalorder %v7062_v0, %v8847_v56  ;;  %vm617_vm0 = vcmp.eq.s32.totalorder %v7073_v34, %v8832_v55 }
  0xc7   :  { %5964 = vmatprep.subr.msk.mxu0 %vm1151_vm1, %v12484_v63  ;;  %6029 = vmatpush2.msk.msra.mxu1 %vm1406_vm9, %v12484_v63  ;;  %vm873_vm10 = vcmp.eq.s32.totalorder %v7076_v35, %v8832_v55  ;;  %vm616_vm15 = vcmp.eq.s32.totalorder %v7073_v34, %v8847_v56  ;;  %vm872_vm5 = vcmp.eq.s32.totalorder %v7076_v35, %v8847_v56 }
  0xc8   :  { %5965 = vmatpush2.msk.msra.mxu0 %vm1150_vm3, %v12484_v63  ;;  %6030 = vmatprep.subr.msk.mxu1 %vm1399_vm14, %v12484_v63  ;;  %vm609_vm1 = vcmp.eq.s32.totalorder %v7079_v37, %v8832_v55  ;;  %vm865_vm8 = vcmp.eq.s32.totalorder %v7082_v38, %v8832_v55  ;;  %vm608_vm3 = vcmp.eq.s32.totalorder %v7079_v37, %v8847_v56 }
  0xc9   :  { %5966 = vmatprep.subr.msk.mxu0 %vm1143_vm4, %v12484_v63  ;;  %3788 = vmatprep.mubr.f32.mxu0 %v3579_v19  ;;  %vm864_vm9 = vcmp.eq.s32.totalorder %v7082_v38, %v8847_v56  ;;  %vm601_vm4 = vcmp.eq.s32.totalorder %v7091_v40, %v8832_v55  ;;  %vm857_vm14 = vcmp.eq.s32.totalorder %v12523_v18, %v8832_v55  ;;  %v12529_v19 = vld [vmem:[#allocation24_spill] sm:$0xff] }
  0xca   :  { %5967 = vmatpush2.msk.msra.mxu0 %vm1142_vm12, %v12484_v63  ;;  %6031 = vmatpush2.msk.msra.mxu1 %vm1398_vm13, %v12484_v63  ;;  %vm600_vm12 = vcmp.eq.s32.totalorder %v7091_v40, %v8847_v56  ;;  %vm856_vm13 = vcmp.eq.s32.totalorder %v12523_v18, %v8847_v56 }
  0xcb   :  { %3789 = vmatmul.mubr.f32.vlgmr.msra.gmra.mxu0 %v3578_v31  ;;  %3859 = vmatprep.mubr.f32.mxu1 %v3581_v3  ;;  %v12530_v31 = vld [vmem:[#allocation25_spill] sm:$0xff]  ;;  %v12531_v3 = vld [vmem:[#allocation26_spill] sm:$0xff] }
  0xcc   :  { %6032 = vmatprep.subr.msk.mxu0 %vm625_vm2, %v12484_v63  ;;  %6096 = vmatprep.subr.msk.mxu1 %vm881_vm7, %v12484_v63  ;;  %vm593_vm2 = vcmp.eq.s32.totalorder %v12524_v9, %v8832_v55  ;;  %vm849_vm7 = vcmp.eq.s32.totalorder %v12525_v47, %v8832_v55 }
  0xcd   :  { %3860 = vmatmul.mubr.f32.vlgmr.msra.gmra.mxu1 %v3580_v39  ;;  %6033 = vmatpush1.msk.msra.mxu0 %vm624_vm11, %v12484_v63  ;;  %vm592_vm11 = vcmp.eq.s32.totalorder %v12524_v9, %v8847_v56  ;;  %v12532_v39 = vld [vmem:[#allocation27_spill] sm:$0xff] }
  0xce   :  { %6097 = vmatpush1.msk.msra.mxu1 %vm880_vm6, %v12484_v63  ;;  %6034 = vmatprep.subr.msk.mxu0 %vm617_vm0, %v12484_v63  ;;  %vm848_vm6 = vcmp.eq.s32.totalorder %v12525_v47, %v8847_v56  ;;  %vm585_vm0 = vcmp.eq.s32.totalorder %v12526_v26, %v8832_v55 }
  0xcf   :  { %6098 = vmatprep.subr.msk.mxu1 %vm873_vm10, %v12484_v63  ;;  %6035 = vmatpush1.msk.msra.mxu0 %vm616_vm15, %v12484_v63  ;;  %vm841_vm10 = vcmp.eq.s32.totalorder %v12527_v10, %v8832_v55  ;;  %vm584_vm15 = vcmp.eq.s32.totalorder %v12526_v26, %v8847_v56 }
  0xd0   :  { %6099 = vmatpush1.msk.msra.mxu1 %vm872_vm5, %v12484_v63  ;;  %6036 = vmatprep.subr.msk.mxu0 %vm609_vm1, %v12484_v63  ;;  %vm840_vm5 = vcmp.eq.s32.totalorder %v12527_v10, %v8847_v56  ;;  %vm577_vm1 = vcmp.eq.s32.totalorder %v12528_v30, %v8832_v55 }
  0xd1   :  { %6100 = vmatprep.subr.msk.mxu1 %vm865_vm8, %v12484_v63  ;;  %6037 = vmatpush1.msk.msra.mxu0 %vm608_vm3, %v12484_v63  ;;  %vm833_vm8 = vcmp.eq.s32.totalorder %v12529_v19, %v8832_v55  ;;  %vm576_vm3 = vcmp.eq.s32.totalorder %v12528_v30, %v8847_v56  ;;  %v12544_v30 = vld [vmem:[#allocation5_spill] sm:$0xff] }
  0xd2   :  { %6101 = vmatpush1.msk.msra.mxu1 %vm864_vm9, %v12484_v63  ;;  %6038 = vmatprep.subr.msk.mxu0 %vm601_vm4, %v12484_v63  ;;  %vm832_vm9 = vcmp.eq.s32.totalorder %v12529_v19, %v8847_v56  ;;  %vm569_vm4 = vcmp.eq.s32.totalorder %v12530_v31, %v8832_v55  ;;  %v12533_v19 = vld [vmem:[#allocation28_spill] sm:$0xff]  ;;  %v9023_v10 = vadd.s32 640, %v12544_v30 }
  0xd3   :  { %6102 = vmatprep.subr.msk.mxu1 %vm857_vm14, %v12484_v63  ;;  %6039 = vmatpush1.msk.msra.mxu0 %vm600_vm12, %v12484_v63  ;;  %vm825_vm14 = vcmp.eq.s32.totalorder %v12531_v3, %v8832_v55  ;;  %vm568_vm12 = vcmp.eq.s32.totalorder %v12530_v31, %v8847_v56  ;;  %v12535_v31 = vld [vmem:[#allocation30_spill] sm:$0xff] }
  0xd4   :  { %6103 = vmatpush1.msk.msra.mxu1 %vm856_vm13, %v12484_v63  ;;  %6040 = vmatprep.subr.msk.mxu0 %vm593_vm2, %v12484_v63  ;;  %vm824_vm13 = vcmp.eq.s32.totalorder %v12531_v3, %v8847_v56  ;;  %vm561_vm2 = vcmp.eq.s32.totalorder %v12532_v39, %v8832_v55  ;;  %v12534_v3 = vld [vmem:[#allocation29_spill] sm:$0xff] }
  0xd5   :  { %6104 = vmatprep.subr.msk.mxu1 %vm849_vm7, %v12484_v63  ;;  %6041 = vmatpush1.msk.msra.mxu0 %vm592_vm11, %v12484_v63  ;;  %vm817_vm7 = vcmp.eq.s32.totalorder %v12533_v19, %v8832_v55  ;;  %vm560_vm11 = vcmp.eq.s32.totalorder %v12532_v39, %v8847_v56  ;;  %v12537_v39 = vld [vmem:[#allocation32_spill] sm:$0xff] }
  0xd6   :  { %6105 = vmatpush1.msk.msra.mxu1 %vm848_vm6, %v12484_v63  ;;  %6042 = vmatprep.subr.msk.mxu0 %vm585_vm0, %v12484_v63  ;;  %vm816_vm6 = vcmp.eq.s32.totalorder %v12533_v19, %v8847_v56  ;;  %vm553_vm0 = vcmp.eq.s32.totalorder %v12534_v3, %v8832_v55  ;;  %v12536_v19 = vld [vmem:[#allocation31_spill] sm:$0xff] }
  0xd7   :  { %6106 = vmatprep.subr.msk.mxu1 %vm841_vm10, %v12484_v63  ;;  %6043 = vmatpush1.msk.msra.mxu0 %vm584_vm15, %v12484_v63  ;;  %vm809_vm10 = vcmp.eq.s32.totalorder %v12535_v31, %v8832_v55  ;;  %vm552_vm15 = vcmp.eq.s32.totalorder %v12534_v3, %v8847_v56  ;;  %v12539_v3 = vld [vmem:[#allocation34_spill] sm:$0xff] }
  0xd8   :  { %6107 = vmatpush1.msk.msra.mxu1 %vm840_vm5, %v12484_v63  ;;  %6044 = vmatprep.subr.msk.mxu0 %vm577_vm1, %v12484_v63  ;;  %vm808_vm5 = vcmp.eq.s32.totalorder %v12535_v31, %v8847_v56  ;;  %vm545_vm1 = vcmp.eq.s32.totalorder %v12536_v19, %v8832_v55  ;;  %v12538_v31 = vld [vmem:[#allocation33_spill] sm:$0xff] }
  0xd9   :  { %6108 = vmatprep.subr.msk.mxu1 %vm833_vm8, %v12484_v63  ;;  %6045 = vmatpush1.msk.msra.mxu0 %vm576_vm3, %v12484_v63  ;;  %vm801_vm8 = vcmp.eq.s32.totalorder %v12537_v39, %v8832_v55  ;;  %vm544_vm3 = vcmp.eq.s32.totalorder %v12536_v19, %v8847_v56  ;;  %v12541_v19 = vld [vmem:[#allocation36_spill] sm:$0xff] }
  0xda   :  { %6109 = vmatpush1.msk.msra.mxu1 %vm832_vm9, %v12484_v63  ;;  %6046 = vmatprep.subr.msk.mxu0 %vm569_vm4, %v12484_v63  ;;  %vm800_vm9 = vcmp.eq.s32.totalorder %v12537_v39, %v8847_v56  ;;  %vm537_vm4 = vcmp.eq.s32.totalorder %v12538_v31, %v8832_v55  ;;  %v12540_v39 = vld [vmem:[#allocation35_spill] sm:$0xff] }
  0xdb   :  { %6110 = vmatprep.subr.msk.mxu1 %vm825_vm14, %v12484_v63  ;;  %6047 = vmatpush1.msk.msra.mxu0 %vm568_vm12, %v12484_v63  ;;  %vm793_vm14 = vcmp.eq.s32.totalorder %v12539_v3, %v8832_v55  ;;  %vm536_vm12 = vcmp.eq.s32.totalorder %v12538_v31, %v8847_v56  ;;  %v12543_v31 = vld [vmem:[#allocation38_spill] sm:$0xff] }
  0xdc   :  { %6111 = vmatpush1.msk.msra.mxu1 %vm824_vm13, %v12484_v63  ;;  %6048 = vmatprep.subr.msk.mxu0 %vm561_vm2, %v12484_v63  ;;  %vm792_vm13 = vcmp.eq.s32.totalorder %v12539_v3, %v8847_v56  ;;  %vm529_vm2 = vcmp.eq.s32.totalorder %v12540_v39, %v8832_v55  ;;  %v12542_v3 = vld [vmem:[#allocation37_spill] sm:$0xff] }
  0xdd   :  { %6112 = vmatprep.subr.msk.mxu1 %vm817_vm7, %v12484_v63  ;;  %6049 = vmatpush1.msk.msra.mxu0 %vm560_vm11, %v12484_v63  ;;  %vm785_vm7 = vcmp.eq.s32.totalorder %v12541_v19, %v8832_v55  ;;  %vm528_vm11 = vcmp.eq.s32.totalorder %v12540_v39, %v8847_v56  ;;  %v12546_v39 = vld [vmem:[#allocation40_spill] sm:$0xff] }
  0xde   :  { %6113 = vmatpush1.msk.msra.mxu1 %vm816_vm6, %v12484_v63  ;;  %6050 = vmatprep.subr.msk.mxu0 %vm553_vm0, %v12484_v63  ;;  %vm784_vm6 = vcmp.eq.s32.totalorder %v12541_v19, %v8847_v56  ;;  %vm521_vm0 = vcmp.eq.s32.totalorder %v12542_v3, %v8832_v55  ;;  %v12545_v19 = vld [vmem:[#allocation39_spill] sm:$0xff] }
  0xdf   :  { %6114 = vmatprep.subr.msk.mxu1 %vm809_vm10, %v12484_v63  ;;  %6051 = vmatpush1.msk.msra.mxu0 %vm552_vm15, %v12484_v63  ;;  %vm777_vm10 = vcmp.eq.s32.totalorder %v12543_v31, %v8832_v55  ;;  %vm520_vm15 = vcmp.eq.s32.totalorder %v12542_v3, %v8847_v56  ;;  %v12550_v3 = vld [vmem:[#allocation44_spill] sm:$0xff] }
  0xe0   :  { %6115 = vmatpush1.msk.msra.mxu1 %vm808_vm5, %v12484_v63  ;;  %6052 = vmatprep.subr.msk.mxu0 %vm545_vm1, %v12484_v63  ;;  %vm776_vm5 = vcmp.eq.s32.totalorder %v12543_v31, %v8847_v56  ;;  %vm513_vm1 = vcmp.eq.s32.totalorder %v12545_v19, %v8832_v55  ;;  %v12547_v31 = vld [vmem:[#allocation41_spill] sm:$0xff] }
  0xe1   :  { %6116 = vmatprep.subr.msk.mxu1 %vm801_vm8, %v12484_v63  ;;  %6053 = vmatpush1.msk.msra.mxu0 %vm544_vm3, %v12484_v63  ;;  %vm769_vm8 = vcmp.eq.s32.totalorder %v12546_v39, %v8832_v55  ;;  %vm512_vm3 = vcmp.eq.s32.totalorder %v12545_v19, %v8847_v56  ;;  %v12549_v19 = vld [vmem:[#allocation43_spill] sm:$0xff] }
  0xe2   :  { %6117 = vmatpush1.msk.msra.mxu1 %vm800_vm9, %v12484_v63  ;;  %6054 = vmatprep.subr.msk.mxu0 %vm537_vm4, %v12484_v63  ;;  %vm768_vm9 = vcmp.eq.s32.totalorder %v12546_v39, %v8847_v56  ;;  %vm505_vm4 = vcmp.eq.s32.totalorder %v7053_v23, %v8832_v55  ;;  %v12548_v39 = vld [vmem:[#allocation42_spill] sm:$0xff] }
  0xe3   :  { %6118 = vmatprep.subr.msk.mxu1 %vm793_vm14, %v12484_v63  ;;  %6055 = vmatpush1.msk.msra.mxu0 %vm536_vm12, %v12484_v63  ;;  %vm761_vm14 = vcmp.eq.s32.totalorder %v12547_v31, %v8832_v55  ;;  %vm504_vm12 = vcmp.eq.s32.totalorder %v7053_v23, %v8847_v56  ;;  %v12552_v23 = vcvt.s32.f32 %v9023_v10 }
  0xe4   :  { %6119 = vmatpush1.msk.msra.mxu1 %vm792_vm13, %v12484_v63  ;;  %6056 = vmatprep.subr.msk.mxu0 %vm529_vm2, %v12484_v63  ;;  %vm760_vm13 = vcmp.eq.s32.totalorder %v12547_v31, %v8847_v56  ;;  %vm753_vm2 = vcmp.eq.s32.totalorder %v12548_v39, %v8832_v55  ;;  %v12551_v31 = vld [vmem:[#allocation45_spill] sm:$0xff] }
  0xe5   :  { %6120 = vmatprep.subr.msk.mxu1 %vm785_vm7, %v12484_v63  ;;  %6057 = vmatpush1.msk.msra.mxu0 %vm528_vm11, %v12484_v63  ;;  %vm1009_vm7 = vcmp.eq.s32.totalorder %v12549_v19, %v8832_v55  ;;  %vm752_vm11 = vcmp.eq.s32.totalorder %v12548_v39, %v8847_v56  ;;  %v52_v26 = vadd.f32 0.5, %v12552_v23  ;;  %v12554_v39 = vld [vmem:[#allocation47_spill] sm:$0xff]  ;;  %v12555_v23 = vld [vmem:[#allocation48_spill] sm:$0xff] }
  0xe6   :  { %6121 = vmatpush1.msk.msra.mxu1 %vm784_vm6, %v12484_v63  ;;  %6058 = vmatprep.subr.msk.mxu0 %vm521_vm0, %v12484_v63  ;;  %vm1008_vm6 = vcmp.eq.s32.totalorder %v12549_v19, %v8847_v56  ;;  %vm745_vm0 = vcmp.eq.s32.totalorder %v12550_v3, %v8832_v55  ;;  %v12553_v19 = vld [vmem:[#allocation46_spill] sm:$0xff] }
  0xe7   :  { %6122 = vmatprep.subr.msk.mxu1 %vm777_vm10, %v12484_v63  ;;  %6059 = vmatpush1.msk.msra.mxu0 %vm520_vm15, %v12484_v63  ;;  %vm1001_vm10 = vcmp.eq.s32.totalorder %v12551_v31, %v8832_v55  ;;  %vm744_vm15 = vcmp.eq.s32.totalorder %v12550_v3, %v8847_v56  ;;  %v9100_v3 = vmul.f32 0.03125, %v52_v26  ;;  %v12558_v26 = vld [vmem:[#allocation51_spill] sm:$0xff] }
  0xe8   :  { %6123 = vmatpush1.msk.msra.mxu1 %vm776_vm5, %v12484_v63  ;;  %6060 = vmatprep.subr.msk.mxu0 %vm513_vm1, %v12484_v63  ;;  %vm1000_vm5 = vcmp.eq.s32.totalorder %v12551_v31, %v8847_v56  ;;  %vm737_vm1 = vcmp.eq.s32.totalorder %v12553_v19, %v8832_v55  ;;  %v12556_v31 = vld [vmem:[#allocation49_spill] sm:$0xff] }
  0xe9   :  { %6124 = vmatprep.subr.msk.mxu1 %vm769_vm8, %v12484_v63  ;;  %6061 = vmatpush1.msk.msra.mxu0 %vm512_vm3, %v12484_v63  ;;  %vm993_vm8 = vcmp.eq.s32.totalorder %v12554_v39, %v8832_v55  ;;  %vm736_vm3 = vcmp.eq.s32.totalorder %v12553_v19, %v8847_v56  ;;  %v9115_v19 = vadd.s32 512, %v12544_v30  ;;  %v12565_v30 = vfloor.f32 %v9100_v3 }
  0xea   :  { %6125 = vmatpush1.msk.msra.mxu1 %vm768_vm9, %v12484_v63  ;;  %6062 = vmatprep.subr.msk.mxu0 %vm505_vm4, %v12484_v63  ;;  %vm992_vm9 = vcmp.eq.s32.totalorder %v12554_v39, %v8847_v56  ;;  %vm729_vm4 = vcmp.eq.s32.totalorder %v12555_v23, %v8832_v55  ;;  %v12557_v39 = vld [vmem:[#allocation50_spill] sm:$0xff] }
  0xeb   :  { %6126 = vmatprep.subr.msk.mxu1 %vm761_vm14, %v12484_v63  ;;  %6063 = vmatpush1.msk.msra.mxu0 %vm504_vm12, %v12484_v63  ;;  %vm985_vm14 = vcmp.eq.s32.totalorder %v12556_v31, %v8832_v55  ;;  %vm728_vm12 = vcmp.eq.s32.totalorder %v12555_v23, %v8847_v56  ;;  %v12560_v23 = vld [vmem:[#allocation53_spill] sm:$0xff]  ;;  %v76_v47 = vmul.f32 32.0, %v12565_v30  ;;  %v12568_v30 = vcvt.s32.f32 %v9115_v19 }
  0xec   :  { %6127 = vmatpush1.msk.msra.mxu1 %vm760_vm13, %v12484_v63  ;;  %6064 = vmatprep.subr.msk.mxu0 %vm753_vm2, %v12484_v63  ;;  %vm984_vm13 = vcmp.eq.s32.totalorder %v12556_v31, %v8847_v56  ;;  %vm721_vm2 = vcmp.eq.s32.totalorder %v12557_v39, %v8832_v55  ;;  %v12559_v31 = vld [vmem:[#allocation52_spill] sm:$0xff] }
  0xed   :  { %6128 = vmatprep.subr.msk.mxu1 %vm1009_vm7, %v12484_v63  ;;  %6065 = vmatpush2.msk.msra.mxu0 %vm752_vm11, %v12484_v63  ;;  %vm977_vm7 = vcmp.eq.s32.totalorder %v12558_v26, %v8832_v55  ;;  %vm720_vm11 = vcmp.eq.s32.totalorder %v12557_v39, %v8847_v56  ;;  %v12562_v39 = vld [vmem:[#allocation55_spill] sm:$0xff]  ;;  %v51_v9 = vadd.f32 0.5, %v12568_v30  ;;  %v12571_v30 = vcvt.s32.f32 %v9023_v10 }
  0xee   :  { %6129 = vmatpush2.msk.msra.mxu1 %vm1008_vm6, %v12484_v63  ;;  %6066 = vmatprep.subr.msk.mxu0 %vm745_vm0, %v12484_v63  ;;  %vm976_vm6 = vcmp.eq.s32.totalorder %v12558_v26, %v8847_v56  ;;  %vm713_vm0 = vcmp.eq.s32.totalorder %v12559_v31, %v8832_v55  ;;  %v12561_v26 = vld [vmem:[#allocation54_spill] sm:$0xff]  ;;  %v12573_v10 = vld [vmem:[#allocation63_spill] sm:$0xff] }
  0xef   :  { %6130 = vmatprep.subr.msk.mxu1 %vm1001_vm10, %v12484_v63  ;;  %6067 = vmatpush2.msk.msra.mxu0 %vm744_vm15, %v12484_v63  ;;  %vm969_vm10 = vcmp.eq.s32.totalorder %v12560_v23, %v8832_v55  ;;  %vm712_vm15 = vcmp.eq.s32.totalorder %v12559_v31, %v8847_v56  ;;  %v12564_v31 = vld [vmem:[#allocation57_spill] sm:$0xff]  ;;  %v84_v18 = vsub.f32 %v12571_v30, %v76_v47  ;;  %v9197_v47 = vmul.f32 0.03125, %v51_v9  ;;  %v12574_v30 = vld [vmem:[#allocation64_spill] sm:$0xff] }
  0xf0   :  { %6131 = vmatpush2.msk.msra.mxu1 %vm1000_vm5, %v12484_v63  ;;  %6068 = vmatprep.subr.msk.mxu0 %vm737_vm1, %v12484_v63  ;;  %vm968_vm5 = vcmp.eq.s32.totalorder %v12560_v23, %v8847_v56  ;;  %vm705_vm1 = vcmp.eq.s32.totalorder %v12561_v26, %v8832_v55  ;;  %v12563_v23 = vld [vmem:[#allocation56_spill] sm:$0xff]  ;;  %v12575_v9 = vld [vmem:[#allocation65_spill] sm:$0xff] }
  0xf1   :  { %6132 = vmatprep.subr.msk.mxu1 %vm993_vm8, %v12484_v63  ;;  %6069 = vmatpush2.msk.msra.mxu0 %vm736_vm3, %v12484_v63  ;;  %vm961_vm8 = vcmp.eq.s32.totalorder %v12562_v39, %v8832_v55  ;;  %vm704_vm3 = vcmp.eq.s32.totalorder %v12561_v26, %v8847_v56  ;;  %v12567_v26 = vld [vmem:[#allocation59_spill] sm:$0xff] }
  0xf2   :  { %6133 = vmatpush2.msk.msra.mxu1 %vm992_vm9, %v12484_v63  ;;  %6070 = vmatprep.subr.msk.mxu0 %vm729_vm4, %v12484_v63  ;;  %vm960_vm9 = vcmp.eq.s32.totalorder %v12562_v39, %v8847_v56  ;;  %vm697_vm4 = vcmp.eq.s32.totalorder %v12563_v23, %v8832_v55  ;;  %v12566_v39 = vld [vmem:[#allocation58_spill] sm:$0xff] }
  0xf3   :  { %6134 = vmatprep.subr.msk.mxu1 %vm985_vm14, %v12484_v63  ;;  %6071 = vmatpush2.msk.msra.mxu0 %vm728_vm12, %v12484_v63  ;;  %vm953_vm14 = vcmp.eq.s32.totalorder %v12564_v31, %v8832_v55  ;;  %vm696_vm12 = vcmp.eq.s32.totalorder %v12563_v23, %v8847_v56  ;;  %v12570_v23 = vld [vmem:[#allocation61_spill] sm:$0xff] }
  0xf4   :  { %6135 = vmatpush2.msk.msra.mxu1 %vm984_vm13, %v12484_v63  ;;  %6072 = vmatprep.subr.msk.mxu0 %vm721_vm2, %v12484_v63  ;;  %vm952_vm13 = vcmp.eq.s32.totalorder %v12564_v31, %v8847_v56  ;;  %vm689_vm2 = vcmp.eq.s32.totalorder %v12566_v39, %v8832_v55  ;;  %v12569_v31 = vld [vmem:[#allocation60_spill] sm:$0xff] }
  0xf5   :  { %6136 = vmatprep.subr.msk.mxu1 %vm977_vm7, %v12484_v63  ;;  %6073 = vmatpush2.msk.msra.mxu0 %vm720_vm11, %v12484_v63  ;;  %vm945_vm7 = vcmp.eq.s32.totalorder %v12567_v26, %v8832_v55  ;;  %vm688_vm11 = vcmp.eq.s32.totalorder %v12566_v39, %v8847_v56 }
  0xf6   :  { %6137 = vmatpush2.msk.msra.mxu1 %vm976_vm6, %v12484_v63  ;;  %6074 = vmatprep.subr.msk.mxu0 %vm713_vm0, %v12484_v63  ;;  %vm944_vm6 = vcmp.eq.s32.totalorder %v12567_v26, %v8847_v56  ;;  %vm681_vm0 = vcmp.eq.s32.totalorder %v12569_v31, %v8832_v55  ;;  %v12572_v26 = vld [vmem:[#allocation62_spill] sm:$0xff] }
  0xf7   :  { %6138 = vmatprep.subr.msk.mxu1 %vm969_vm10, %v12484_v63  ;;  %6075 = vmatpush2.msk.msra.mxu0 %vm712_vm15, %v12484_v63  ;;  %vm937_vm10 = vcmp.eq.s32.totalorder %v12570_v23, %v8832_v55  ;;  %vm680_vm15 = vcmp.eq.s32.totalorder %v12569_v31, %v8847_v56 }
  0xf8   :  { %6139 = vmatpush2.msk.msra.mxu1 %vm968_vm5, %v12484_v63  ;;  %6076 = vmatprep.subr.msk.mxu0 %vm705_vm1, %v12484_v63  ;;  %vm936_vm5 = vcmp.eq.s32.totalorder %v12570_v23, %v8847_v56  ;;  %vm673_vm1 = vcmp.eq.s32.totalorder %v12572_v26, %v8832_v55  ;;  %v93_v23 = vmul.f32 %v7015_v14, %v84_v18 }
  0xf9   :  { %6140 = vmatprep.subr.msk.mxu1 %vm961_vm8, %v12484_v63  ;;  %6077 = vmatpush2.msk.msra.mxu0 %vm704_vm3, %v12484_v63  ;;  %vm929_vm8 = vcmp.eq.s32.totalorder %v12573_v10, %v8832_v55  ;;  %vm672_vm3 = vcmp.eq.s32.totalorder %v12572_v26, %v8847_v56  ;;  %v12577_v26 = vld [vmem:[#allocation67_spill] sm:$0xff] }
  0xfa   :  { %6141 = vmatpush2.msk.msra.mxu1 %vm960_vm9, %v12484_v63  ;;  %6078 = vmatprep.subr.msk.mxu0 %vm697_vm4, %v12484_v63  ;;  %vm928_vm9 = vcmp.eq.s32.totalorder %v12573_v10, %v8847_v56  ;;  %vm665_vm4 = vcmp.eq.s32.totalorder %v12574_v30, %v8832_v55  ;;  %v12576_v10 = vld [vmem:[#allocation66_spill] sm:$0xff]  ;;  %v102_v18 = vadd.f32 %v7017_v17, %v93_v23  ;;  %v12582_v23 = vfloor.f32 %v9197_v47 }
  0xfb   :  { %6142 = vmatprep.subr.msk.mxu1 %vm953_vm14, %v12484_v63  ;;  %6079 = vmatpush2.msk.msra.mxu0 %vm696_vm12, %v12484_v63  ;;  %vm921_vm14 = vcmp.eq.s32.totalorder %v12575_v9, %v8832_v55  ;;  %vm664_vm12 = vcmp.eq.s32.totalorder %v12574_v30, %v8847_v56  ;;  %v12579_v30 = vld [vmem:[#allocation69_spill] sm:$0xff] }
  0xfc   :  { %6143 = vmatpush2.msk.msra.mxu1 %vm952_vm13, %v12484_v63  ;;  %6080 = vmatprep.subr.msk.mxu0 %vm689_vm2, %v12484_v63  ;;  %vm920_vm13 = vcmp.eq.s32.totalorder %v12575_v9, %v8847_v56  ;;  %vm657_vm2 = vcmp.eq.s32.totalorder %v12576_v10, %v8832_v55  ;;  %v12578_v9 = vld [vmem:[#allocation68_spill] sm:$0xff]  ;;  %v75_v31 = vmul.f32 32.0, %v12582_v23  ;;  %v12584_v23 = vld [vmem:[#allocation73_spill] sm:$0xff]  ;;  %v4749_v39 = vadd.f32 -15.5, %v102_v18 }
  0xfd   :  { %6144 = vmatprep.subr.msk.mxu1 %vm945_vm7, %v12484_v63  ;;  %6081 = vmatpush2.msk.msra.mxu0 %vm688_vm11, %v12484_v63  ;;  %vm913_vm7 = vcmp.eq.s32.totalorder %v12577_v26, %v8832_v55  ;;  %vm656_vm11 = vcmp.eq.s32.totalorder %v12576_v10, %v8847_v56  ;;  %v12581_v10 = vld [vmem:[#allocation71_spill] sm:$0xff] }
  0xfe   :  { %6145 = vmatpush2.msk.msra.mxu1 %vm944_vm6, %v12484_v63  ;;  %6082 = vmatprep.subr.msk.mxu0 %vm681_vm0, %v12484_v63  ;;  %vm912_vm6 = vcmp.eq.s32.totalorder %v12577_v26, %v8847_v56  ;;  %vm649_vm0 = vcmp.eq.s32.totalorder %v12578_v9, %v8832_v55  ;;  %v12580_v26 = vld [vmem:[#allocation70_spill] sm:$0xff] }
  0xff   :  { %6146 = vmatprep.subr.msk.mxu1 %vm937_vm10, %v12484_v63  ;;  %6083 = vmatpush2.msk.msra.mxu0 %vm680_vm15, %v12484_v63  ;;  %vm905_vm10 = vcmp.eq.s32.totalorder %v12579_v30, %v8832_v55  ;;  %vm648_vm15 = vcmp.eq.s32.totalorder %v12578_v9, %v8847_v56 }
 0x100   :  { %6147 = vmatpush2.msk.msra.mxu1 %vm936_vm5, %v12484_v63  ;;  %6084 = vmatprep.subr.msk.mxu0 %vm673_vm1, %v12484_v63  ;;  %vm904_vm5 = vcmp.eq.s32.totalorder %v12579_v30, %v8847_v56  ;;  %vm641_vm1 = vcmp.eq.s32.totalorder %v12580_v26, %v8832_v55  ;;  %v12583_v30 = vfloor.f32 %v9100_v3  ;;  %v12585_v3 = vcvt.s32.f32 %v9115_v19 }
 0x101   :  { %6148 = vmatprep.subr.msk.mxu1 %vm929_vm8, %v12484_v63  ;;  %6085 = vmatpush2.msk.msra.mxu0 %vm672_vm3, %v12484_v63  ;;  %vm897_vm8 = vcmp.eq.s32.totalorder %v12581_v10, %v8832_v55  ;;  %vm640_vm3 = vcmp.eq.s32.totalorder %v12580_v26, %v8847_v56  ;;  %v136_v19 = vmul.f32 %v4749_v39, %v7024_v25  ;;  %v12606_v26 = vld [vmem:[#allocation97_spill] sm:$0xff] }
 0x102   :  { %6149 = vmatpush2.msk.msra.mxu1 %vm928_vm9, %v12484_v63  ;;  %6086 = vmatprep.subr.msk.mxu0 %vm665_vm4, %v12484_v63  ;;  %vm896_vm9 = vcmp.eq.s32.totalorder %v12581_v10, %v8847_v56  ;;  %v4741_v9 = vadd.f32 -15.5, %v12583_v30  ;;  %vm633_vm4 = vcmp.eq.s32.totalorder %v7582_v1, %v8832_v55  ;;  %v83_v30 = vsub.f32 %v12585_v3, %v75_v31  ;;  %v6947_v31 = vld [vmem:[%s12014_s1 + $0x18] sm:$0x3f]  ;;  %v6949_v3 = vld [vmem:[%s12014_s1 + $0x10] sm:$0x3f] }
 0x103   :  { %6150 = vmatprep.subr.msk.mxu1 %vm921_vm14, %v12484_v63  ;;  %6087 = vmatpush2.msk.msra.mxu0 %vm664_vm12, %v12484_v63  ;;  %vm889_vm14 = vcmp.eq.s32.totalorder %v12584_v23, %v8832_v55  ;;  %vm632_vm12 = vcmp.eq.s32.totalorder %v7582_v1, %v8847_v56  ;;  %v6946_v1 = vld [vmem:[%s12014_s1 + $0x8] sm:$0x3f] }
 0x104   :  { %6151 = vmatpush2.msk.msra.mxu1 %vm920_vm13, %v12484_v63  ;;  %6088 = vmatprep.subr.msk.mxu0 %vm657_vm2, %v12484_v63  ;;  %vm888_vm13 = vcmp.eq.s32.totalorder %v12584_v23, %v8847_v56  ;;  %v127_v18 = vmul.f32 %v4741_v9, %v7020_v22  ;;  %v168_v10 = vmul.f32 %v4741_v9, %v7024_v25  ;;  %v6948_v9 = vld [vmem:[%s12014_s1] sm:$0x3f] }
 0x105   :  { %6152 = vmatprep.subr.msk.mxu1 %vm913_vm7, %v12484_v63  ;;  %6089 = vmatpush2.msk.msra.mxu0 %vm656_vm11, %v12484_v63  ;;  %vm1137_vm2 = vcmp.eq.s32.totalorder %v7600_v15, %v8832_v55  ;;  %vm1393_vm7 = vcmp.eq.s32.totalorder %v7603_v13, %v8832_v55  ;;  %vm1136_vm11 = vcmp.eq.s32.totalorder %v7600_v15, %v8847_v56 }
 0x106   :  { %6153 = vmatpush2.msk.msra.mxu1 %vm912_vm6, %v12484_v63  ;;  %6090 = vmatprep.subr.msk.mxu0 %vm649_vm0, %v12484_v63  ;;  %vm1392_vm6 = vcmp.eq.s32.totalorder %v7603_v13, %v8847_v56  ;;  %vm1129_vm0 = vcmp.eq.s32.totalorder %v7618_v62, %v8832_v55  ;;  %v92_v23 = vmul.f32 %v7015_v14, %v83_v30  ;;  %v12588_v30 = vld [vmem:[#allocation78_spill] sm:$0xff] }
 0x107   :  { %6154 = vmatprep.subr.msk.mxu1 %vm905_vm10, %v12484_v63  ;;  %6091 = vmatpush2.msk.msra.mxu0 %vm648_vm15, %v12484_v63  ;;  %vm1128_vm15 = vcmp.eq.s32.totalorder %v7618_v62, %v8847_v56 }
 0x108   :  { %6155 = vmatpush2.msk.msra.mxu1 %vm904_vm5, %v12484_v63  ;;  %6092 = vmatprep.subr.msk.mxu0 %vm641_vm1, %v12484_v63  ;;  %vm1121_vm1 = vcmp.eq.s32.totalorder %v12588_v30, %v8832_v55  ;;  %v101_v13 = vadd.f32 %v7017_v17, %v92_v23  ;;  %v12593_v23 = vld [vmem:[#allocation83_spill] sm:$0xff] }
 0x109   :  { %6156 = vmatprep.subr.msk.mxu1 %vm897_vm8, %v12484_v63  ;;  %6093 = vmatpush2.msk.msra.mxu0 %vm640_vm3, %v12484_v63  ;;  %vm1120_vm3 = vcmp.eq.s32.totalorder %v12588_v30, %v8847_v56  ;;  %v12597_v30 = vld [vmem:[#allocation88_spill] sm:$0xff] }
 0x10a   :  { %6157 = vmatpush2.msk.msra.mxu1 %vm896_vm9, %v12484_v63  ;;  %6094 = vmatprep.subr.msk.mxu0 %vm633_vm4, %v12484_v63 }
 0x10b   :  { %6158 = vmatprep.subr.msk.mxu1 %vm889_vm14, %v12484_v63  ;;  %6095 = vmatpush2.msk.msra.mxu0 %vm632_vm12, %v12484_v63 }
 0x10c   :  { %3930 = vmatprep.mubr.f32.mxu0 %v6946_v1  ;;  %6159 = vmatpush2.msk.msra.mxu1 %vm888_vm13, %v12484_v63  ;;  %v176_v1 = vmul.f32 %v4749_v39, %v7020_v22  ;;  %v12587_v39 = vfloor.f32 %v9197_v47  ;;  %v12590_v47 = vld [vmem:[#allocation80_spill] sm:$0xff] }
 0x10d   :  { %4001 = vmatprep.mubr.f32.mxu1 %v6947_v31  ;;  %3931 = vmatmul.mubr.f32.vlgmr.msra.gmra.mxu0 %v6948_v9  ;;  %v12586_v31 = vld [vmem:[#allocation77_spill] sm:$0xff]  ;;  %vm1113_vm4 = vcmp.eq.s32.totalorder %v12590_v47, %v8832_v55  ;;  %vm1112_vm12 = vcmp.eq.s32.totalorder %v12590_v47, %v8847_v56 }
 0x10e   :  { %4002 = vmatmul.mubr.f32.vlgmr.msra.gmra.mxu1 %v6949_v3  ;;  %vm1385_vm10 = vcmp.eq.s32.totalorder %v12586_v31, %v8832_v55  ;;  %6160 = vmatprep.subr.msk.mxu0 %vm1137_vm2, %v12484_v63  ;;  %vm1384_vm5 = vcmp.eq.s32.totalorder %v12586_v31, %v8847_v56  ;;  %v4740_v9 = vadd.f32 -15.5, %v12587_v39  ;;  %v12589_v3 = vld [vmem:[#allocation79_spill] sm:$0xff]  ;;  %v144_v39 = vsub.f32 %v127_v18, %v136_v19  ;;  %v12591_v31 = vld [vmem:[#allocation81_spill] sm:$0xff] }
 0x10f   :  { %6224 = vmatprep.subr.msk.mxu1 %vm1393_vm7, %v12484_v63  ;;  %6161 = vmatpush1.msk.msra.mxu0 %vm1136_vm11, %v12484_v63  ;;  %vm1377_vm8 = vcmp.eq.s32.totalorder %v12589_v3, %v8832_v55  ;;  %vm1376_vm9 = vcmp.eq.s32.totalorder %v12589_v3, %v8847_v56  ;;  %vm1369_vm14 = vcmp.eq.s32.totalorder %v12591_v31, %v8832_v55 }
 0x110   :  { %6225 = vmatpush1.msk.msra.mxu1 %vm1392_vm6, %v12484_v63  ;;  %6162 = vmatprep.subr.msk.mxu0 %vm1129_vm0, %v12484_v63  ;;  %v184_v62 = vadd.f32 %v176_v1, %v168_v10  ;;  %vm1368_vm13 = vcmp.eq.s32.totalorder %v12591_v31, %v8847_v56  ;;  %v9348_v18 = vadd.f32 15.5, %v144_v39  ;;  %v126_v19 = vmul.f32 %v4740_v9, %v7020_v22  ;;  %v12592_v10 = vld [vmem:[#allocation82_spill] sm:$0xff] }
 0x111   :  { %6226 = vmatprep.subr.msk.mxu1 %vm1385_vm10, %v12484_v63  ;;  %6163 = vmatpush1.msk.msra.mxu0 %vm1128_vm15, %v12484_v63  ;;  %vm1105_vm2 = vcmp.eq.s32.totalorder %v12592_v10, %v8832_v55  ;;  %vm1361_vm7 = vcmp.eq.s32.totalorder %v12593_v23, %v8832_v55  ;;  %v4748_v1 = vadd.f32 -15.5, %v101_v13  ;;  %v167_v3 = vmul.f32 %v4740_v9, %v7024_v25  ;;  %v12594_v13 = vld [vmem:[#allocation84_spill] sm:$0xff]  ;;  %v12595_v9 = vld [vmem:[#allocation85_spill] sm:$0xff] }
 0x112   :  { %6227 = vmatpush1.msk.msra.mxu1 %vm1384_vm5, %v12484_v63  ;;  %6164 = vmatprep.subr.msk.mxu0 %vm1121_vm1, %v12484_v63  ;;  %vm1104_vm11 = vcmp.eq.s32.totalorder %v12592_v10, %v8847_v56  ;;  %vm1360_vm6 = vcmp.eq.s32.totalorder %v12593_v23, %v8847_v56  ;;  %vm1097_vm0 = vcmp.eq.s32.totalorder %v12594_v13, %v8832_v55  ;;  %v9379_v39 = vadd.f32 15.5, %v184_v62 }
 0x113   :  { %6228 = vmatprep.subr.msk.mxu1 %vm1377_vm8, %v12484_v63  ;;  %6165 = vmatpush1.msk.msra.mxu0 %vm1120_vm3, %v12484_v63  ;;  %vm1353_vm10 = vcmp.eq.s32.totalorder %v12595_v9, %v8832_v55  ;;  %v135_v31 = vmul.f32 %v4748_v1, %v7024_v25  ;;  %v175_v47 = vmul.f32 %v4748_v1, %v7020_v22  ;;  %v6842_v62 = vcvt.f32.s32 %v9348_v18  ;;  %v12596_v1 = vld [vmem:[#allocation87_spill] sm:$0xff]  ;;  %v12603_v25 = vld [vmem:[#allocation94_spill] sm:$0xff] }
 0x114   :  { %6229 = vmatpush1.msk.msra.mxu1 %vm1376_vm9, %v12484_v63  ;;  %6166 = vmatprep.subr.msk.mxu0 %vm1113_vm4, %v12484_v63  ;;  %vm1096_vm15 = vcmp.eq.s32.totalorder %v12594_v13, %v8847_v56  ;;  %vm1352_vm5 = vcmp.eq.s32.totalorder %v12595_v9, %v8847_v56  ;;  %vm1089_vm1 = vcmp.eq.s32.totalorder %v7708_v24, %v8832_v55  ;;  %v12602_v9 = vld [vmem:[#allocation93_spill] sm:$0xff]  ;;  %v12604_v22 = vld [vmem:[#allocation95_spill] sm:$0xff] }
 0x115   :  { %6230 = vmatprep.subr.msk.mxu1 %vm1369_vm14, %v12484_v63  ;;  %6167 = vmatpush1.msk.msra.mxu0 %vm1112_vm12, %v12484_v63  ;;  %vm1345_vm8 = vcmp.eq.s32.totalorder %v12596_v1, %v8832_v55  ;;  %v143_v23 = vsub.f32 %v126_v19, %v135_v31  ;;  %v183_v10 = vadd.f32 %v175_v47, %v167_v3  ;;  %v12598_v31 = vld [vmem:[#allocation89_spill] sm:$0xff]  ;;  %v6906_v3 = vcvt.f32.s32 %v9379_v39 }
 0x116   :  { %6231 = vmatpush1.msk.msra.mxu1 %vm1368_vm13, %v12484_v63  ;;  %6168 = vmatprep.subr.msk.mxu0 %vm1105_vm2, %v12484_v63  ;;  %vm1088_vm3 = vcmp.eq.s32.totalorder %v7708_v24, %v8847_v56  ;;  %vm1344_vm9 = vcmp.eq.s32.totalorder %v12596_v1, %v8847_v56  ;;  %vm1081_vm4 = vcmp.eq.s32.totalorder %v12597_v30, %v8832_v55  ;;  %v12599_v1 = vld [vmem:[#allocation90_spill] sm:$0xff] }
 0x117   :  { %6232 = vmatprep.subr.msk.mxu1 %vm1361_vm7, %v12484_v63  ;;  %6169 = vmatpush1.msk.msra.mxu0 %vm1104_vm11, %v12484_v63  ;;  %vm1337_vm14 = vcmp.eq.s32.totalorder %v12598_v31, %v8832_v55  ;;  %v9415_v47 = vadd.f32 15.5, %v143_v23  ;;  %v9417_v19 = vadd.f32 15.5, %v183_v10  ;;  %vm1080_vm12 = vcmp.eq.s32.totalorder %v12597_v30, %v8847_v56  ;;  %v12600_v10 = vld [vmem:[#allocation91_spill] sm:$0xff] }
 0x118   :  { %6233 = vmatpush1.msk.msra.mxu1 %vm1360_vm6, %v12484_v63  ;;  %6170 = vmatprep.subr.msk.mxu0 %vm1097_vm0, %v12484_v63  ;;  %vm1336_vm13 = vcmp.eq.s32.totalorder %v12598_v31, %v8847_v56  ;;  %vm1073_vm2 = vcmp.eq.s32.totalorder %v12599_v1, %v8832_v55  ;;  %v6843_v23 = vcvt.s32.f32 %v6842_v62  ;;  %vm1329_vm7 = vcmp.eq.s32.totalorder %v12600_v10, %v8832_v55  ;;  %v12601_v62 = vld [vmem:[#allocation92_spill] sm:$0xff] }
 0x119   :  { %6234 = vmatprep.subr.msk.mxu1 %vm1353_vm10, %v12484_v63  ;;  %6171 = vmatpush1.msk.msra.mxu0 %vm1096_vm15, %v12484_v63  ;;  %vm1072_vm11 = vcmp.eq.s32.totalorder %v12599_v1, %v8847_v56  ;;  %vm1328_vm6 = vcmp.eq.s32.totalorder %v12600_v10, %v8847_v56  ;;  %v6834_v24 = vcvt.f32.s32 %v9415_v47  ;;  %vm1065_vm0 = vcmp.eq.s32.totalorder %v12601_v62, %v8832_v55 }
 0x11a   :  { %6235 = vmatpush1.msk.msra.mxu1 %vm1352_vm5, %v12484_v63  ;;  %6172 = vmatprep.subr.msk.mxu0 %vm1089_vm1, %v12484_v63  ;;  %vm1321_vm10 = vcmp.eq.s32.totalorder %v12602_v9, %v8832_v55  ;;  %vm1064_vm15 = vcmp.eq.s32.totalorder %v12601_v62, %v8847_v56  ;;  %v6898_v13 = vcvt.f32.s32 %v9417_v19  ;;  %vm1320_vm5 = vcmp.eq.s32.totalorder %v12602_v9, %v8847_v56 }
 0x11b   :  { %6236 = vmatprep.subr.msk.mxu1 %vm1345_vm8, %v12484_v63  ;;  %6173 = vmatpush1.msk.msra.mxu0 %vm1088_vm3, %v12484_v63  ;;  %vm1057_vm1 = vcmp.eq.s32.totalorder %v12603_v25, %v8832_v55  ;;  %vm1313_vm8 = vcmp.eq.s32.totalorder %v12604_v22, %v8832_v55  ;;  %v6907_v15 = vcvt.s32.f32 %v6906_v3  ;;  %vm1056_vm3 = vcmp.eq.s32.totalorder %v12603_v25, %v8847_v56  ;;  %v12605_v3 = vld [vmem:[#allocation96_spill] sm:$0xff] }
 0x11c   :  { %6237 = vmatpush1.msk.msra.mxu1 %vm1344_vm9, %v12484_v63  ;;  %6174 = vmatprep.subr.msk.mxu0 %vm1081_vm4, %v12484_v63  ;;  %vm1312_vm9 = vcmp.eq.s32.totalorder %v12604_v22, %v8847_v56  ;;  %v6844_v31 = vand.u32 2147483647, %v6843_v23  ;;  %v6845_v30 = vand.u32 2147483648, %v9348_v18  ;;  %vm1049_vm4 = vcmp.eq.s32.totalorder %v12605_v3, %v8832_v55  ;;  %v12611_v25 = vld [vmem:[#allocation100_spill] sm:$0xff] }
 0x11d   :  { %6238 = vmatprep.subr.msk.mxu1 %vm1337_vm14, %v12484_v63  ;;  %6175 = vmatpush1.msk.msra.mxu0 %vm1080_vm12, %v12484_v63  ;;  %vm1305_vm14 = vcmp.eq.s32.totalorder %v12606_v26, %v8832_v55  ;;  %v6840_v23 = vand.u32 2147483647, %v9348_v18  ;;  %v6835_v17 = vcvt.s32.f32 %v6834_v24  ;;  %vm1048_vm12 = vcmp.eq.s32.totalorder %v12605_v3, %v8847_v56 }
 0x11e   :  { %6239 = vmatpush1.msk.msra.mxu1 %vm1336_vm13, %v12484_v63  ;;  %6176 = vmatprep.subr.msk.mxu0 %vm1073_vm2, %v12484_v63  ;;  %v6909_v10 = vand.u32 2147483648, %v9379_v39  ;;  %v6837_v1 = vand.u32 2147483648, %v9415_v47  ;;  %v6899_v14 = vcvt.s32.f32 %v6898_v13  ;;  %vm1304_vm13 = vcmp.eq.s32.totalorder %v12606_v26, %v8847_v56  ;;  %v12607_v13 = vld [vmem:[#allocation98_spill] sm:$0xff] }
 0x11f   :  { %6240 = vmatprep.subr.msk.mxu1 %vm1329_vm7, %v12484_v63  ;;  %6177 = vmatpush1.msk.msra.mxu0 %vm1072_vm11, %v12484_v63  ;;  %v6908_v24 = vand.u32 2147483647, %v6907_v15  ;;  %v6832_v40 = vand.u32 2147483647, %v9415_v47  ;;  %v6836_v38 = vand.u32 2147483647, %v6835_v17  ;;  %vm1041_vm2 = vcmp.eq.s32.totalorder %v7816_v36, %v8832_v55 }
 0x120   :  { %6241 = vmatpush1.msk.msra.mxu1 %vm1328_vm6, %v12484_v63  ;;  %6178 = vmatprep.subr.msk.mxu0 %vm1065_vm0, %v12484_v63  ;;  %vm1297_vm7 = vcmp.eq.s32.totalorder %v12607_v13, %v8832_v55  ;;  %v6846_v15 = vor.u32 %v6845_v30, %v6844_v31  ;;  %v6904_v9 = vand.u32 2147483647, %v9379_v39  ;;  %vm1040_vm11 = vcmp.eq.s32.totalorder %v7816_v36, %v8847_v56 }
 0x121   :  { %6242 = vmatprep.subr.msk.mxu1 %vm1321_vm10, %v12484_v63  ;;  %6179 = vmatpush1.msk.msra.mxu0 %vm1064_vm15, %v12484_v63  ;;  %vm9540_vm6 = vcmp.lt.f32.partialorder %v6840_v23, 8388608.0  ;;  %v6900_v30 = vand.u32 2147483647, %v6899_v14  ;;  %v6901_v31 = vand.u32 2147483648, %v9417_v19  ;;  %vm1296_vm0 = vcmp.eq.s32.totalorder %v12607_v13, %v8847_v56  ;;  %v12610_v23 = vld [vmem:[#allocation99_spill] sm:$0xff] }
 0x122   :  { %6243 = vmatpush1.msk.msra.mxu1 %vm1320_vm5, %v12484_v63  ;;  %6180 = vmatprep.subr.msk.mxu0 %vm1057_vm1, %v12484_v63  ;;  %vm1033_vm10 = vcmp.eq.s32.totalorder %v12610_v23, %v8832_v55  ;;  %v6838_v22 = vor.u32 %v6837_v1, %v6836_v38  ;;  %v6896_v14 = vand.u32 2147483647, %v9417_v19  ;;  %vm1289_vm15 = vcmp.eq.s32.totalorder %v12611_v25, %v8832_v55  ;;  %v12614_v1 = vld [vmem:[#allocation101_spill] sm:$0xff]  ;;  %v12647_v38 = vld [vmem:[#allocation16_spill] sm:$0xff] }
 0x123   :  { %6244 = vmatprep.subr.msk.mxu1 %vm1313_vm8, %v12484_v63  ;;  %6181 = vmatpush1.msk.msra.mxu0 %vm1056_vm3, %v12484_v63  ;;  %vm1032_vm5 = vcmp.eq.s32.totalorder %v12610_v23, %v8847_v56  ;;  %v6910_v62 = vor.u32 %v6909_v10, %v6908_v24  ;;  %vm9570_vm1 = vcmp.lt.f32.partialorder %v6832_v40, 8388608.0  ;;  %vm1288_vm8 = vcmp.eq.s32.totalorder %v12611_v25, %v8847_v56  ;;  %v12615_v10 = vld [vmem:[#allocation102_spill] sm:$0xff] }
 0x124   :  { %6245 = vmatpush1.msk.msra.mxu1 %vm1312_vm9, %v12484_v63  ;;  %6182 = vmatprep.subr.msk.mxu0 %vm1049_vm4, %v12484_v63  ;;  %vm1025_vm3 = vcmp.eq.s32.totalorder %v12614_v1, %v8832_v55  ;;  %v6847_v40 = vsel %vm9540_vm6, %v6846_v15, %v9348_v18  ;;  %vm6905_vm9 = vcmp.lt.f32.partialorder %v6904_v9, 8388608.0  ;;  %vm1281_vm4 = vcmp.eq.s32.totalorder %v12615_v10, %v8832_v55  ;;  %v12616_v18 = vld [vmem:[#allocation103_spill] sm:$0xff]  ;;  %v12617_v15 = vld [vmem:[#allocation104_spill] sm:$0xff] }
 0x125   :  { %6246 = vmatprep.subr.msk.mxu1 %vm1305_vm14, %v12484_v63  ;;  %6183 = vmatpush1.msk.msra.mxu0 %vm1048_vm12, %v12484_v63  ;;  %vm1024_vm14 = vcmp.eq.s32.totalorder %v12614_v1, %v8847_v56  ;;  %v6902_v24 = vor.u32 %v6901_v31, %v6900_v30  ;;  %vm1280_vm12 = vcmp.eq.s32.totalorder %v12615_v10, %v8847_v56  ;;  %vm216_vm6 = vcmp.le.f32.partialorder %v6847_v40, 31.0 }
 0x126   :  { %6247 = vmatpush1.msk.msra.mxu1 %vm1304_vm13, %v12484_v63  ;;  %6184 = vmatprep.subr.msk.mxu0 %vm1041_vm2, %v12484_v63  ;;  %vm1017_vm13 = vcmp.eq.s32.totalorder %v12616_v18, %v8832_v55  ;;  %v6839_v9 = vsel %vm9570_vm1, %v6838_v22, %v9415_v47  ;;  %vm6897_vm2 = vcmp.lt.f32.partialorder %v6896_v14, 8388608.0  ;;  %v6911_v17 = vsel %vm6905_vm9, %v6910_v62, %v9379_v39  ;;  %v12618_v22 = vld [vmem:[#allocation105_spill] sm:$0xff] }
 0x127   :  { %6248 = vmatprep.subr.msk.mxu1 %vm1297_vm7, %v12484_v63  ;;  %6185 = vmatpush1.msk.msra.mxu0 %vm1040_vm11, %v12484_v63  ;;  %vm1273_vm7 = vcmp.eq.s32.totalorder %v12617_v15, %v8832_v55  ;;  %vm208_vm11 = vcmp.ge.f32.partialorder %v6847_v40, 0.0  ;;  %v9652_v39 = vsel %vm6897_vm2, %v6902_v24, %v9417_v19  ;;  %vm207_vm1 = vcmp.ge.f32.partialorder %v6839_v9, 0.0  ;;  %v12648_v24 = vld [vmem:[#allocation17_spill] sm:$0xff] }
 0x128   :  { %6249 = vmatpush1.msk.msra.mxu1 %vm1296_vm0, %v12484_v63  ;;  %6186 = vmatprep.subr.msk.mxu0 %vm1033_vm10, %v12484_v63  ;;  %vm1016_vm0 = vcmp.eq.s32.totalorder %v12616_v18, %v8847_v56  ;;  %vm1272_vm10 = vcmp.eq.s32.totalorder %v12617_v15, %v8847_v56  ;;  %vm1520_vm9 = vcmp.eq.s32.totalorder %v12618_v22, %v8847_v56 }
 0x129   :  { %6250 = vmatprep.subr.msk.mxu1 %vm1289_vm15, %v12484_v63  ;;  %6187 = vmatpush1.msk.msra.mxu0 %vm1032_vm5, %v12484_v63  ;;  %vm1265_vm15 = vcmp.eq.s32.totalorder %v7923_v2, %v8832_v55  ;;  %vm1521_vm5 = vcmp.eq.s32.totalorder %v12618_v22, %v8832_v55  ;;  %vm1256_vm2 = vcmp.eq.s32.totalorder %v7940_v45, %v8847_v56 }
 0x12a   :  { %6251 = vmatpush1.msk.msra.mxu1 %vm1288_vm8, %v12484_v63  ;;  %6188 = vmatprep.subr.msk.mxu0 %vm1025_vm3, %v12484_v63  ;;  %vm215_vm8 = vcmp.le.f32.partialorder %v6839_v9, 31.0  ;;  %vm1264_vm3 = vcmp.eq.s32.totalorder %v7923_v2, %v8847_v56  ;;  %v9688_v19 = vadd.f32 %v6847_v40, %v7035_v5  ;;  %v9717_v31 = vadd.f32 %v6839_v9, %v7035_v5 }
 0x12b   :  { %6252 = vmatprep.subr.msk.mxu1 %vm1281_vm4, %v12484_v63  ;;  %6189 = vmatpush1.msk.msra.mxu0 %vm1024_vm14, %v12484_v63  ;;  %vm9668_vm4 = vmand %vm208_vm11, %vm216_vm6  ;;  %vm232_vm14 = vcmp.ge.f32.partialorder %v6911_v17, 0.0  ;;  %vm231_vm6 = vcmp.ge.f32.partialorder %v9652_v39, 0.0  ;;  %v274_v40 = vadd.f32 %v6911_v17, %v7037_v7 }
 0x12c   :  { %6253 = vmatpush1.msk.msra.mxu1 %vm1280_vm12, %v12484_v63  ;;  %6190 = vmatprep.subr.msk.mxu0 %vm1017_vm13, %v12484_v63  ;;  %vm1257_vm12 = vcmp.eq.s32.totalorder %v7940_v45, %v8832_v55  ;;  %vm1513_vm13 = vcmp.eq.s32.totalorder %v7943_v44, %v8832_v55  ;;  %vm9692_vm11 = vmand %vm207_vm1, %vm215_vm8  ;;  %vm1248_vm1 = vcmp.eq.s32.totalorder %v7946_v43, %v8847_v56  ;;  %v346_v62 = vmul.f32 32.0, %v9688_v19 }
 0x12d   :  { %6254 = vmatprep.subr.msk.mxu1 %vm1273_vm7, %v12484_v63  ;;  %6191 = vmatpush1.msk.msra.mxu0 %vm1016_vm0, %v12484_v63  ;;  %vm1512_vm7 = vcmp.eq.s32.totalorder %v7943_v44, %v8847_v56  ;;  %vm1249_vm0 = vcmp.eq.s32.totalorder %v7946_v43, %v8832_v55  ;;  %vm1504_vm8 = vcmp.eq.s32.totalorder %v7949_v12, %v8847_v56  ;;  %v345_v14 = vmul.f32 32.0, %v9717_v31 }
 0x12e   :  { %6255 = vmatpush1.msk.msra.mxu1 %vm1272_vm10, %v12484_v63  ;;  %6192 = vmatprep.subr.msk.mxu0 %vm1265_vm15, %v12484_v63  ;;  %vm1505_vm10 = vcmp.eq.s32.totalorder %v7949_v12, %v8832_v55  ;;  %vm9706_vm15 = vmand %vm9668_vm4, %vm232_vm14  ;;  %vm247_vm14 = vcmp.le.f32.partialorder %v9652_v39, 31.0 }
 0x12f   :  { %6256 = vmatprep.subr.msk.mxu1 %vm1521_vm5, %v12484_v63  ;;  %6193 = vmatpush2.msk.msra.mxu0 %vm1264_vm3, %v12484_v63  ;;  %vm248_vm5 = vcmp.le.f32.partialorder %v6911_v17, 31.0  ;;  %vm1241_vm3 = vcmp.eq.s32.totalorder %v7990_v32, %v8832_v55  ;;  %vm9735_vm4 = vmand %vm9692_vm11, %vm231_vm6  ;;  %vm1233_vm11 = vcmp.eq.s32.totalorder %v8056_v41, %v8832_v55  ;;  %vm1489_vm6 = vcmp.eq.s32.totalorder %v8073_v11, %v8832_v55 }
 0x130   :  { %6257 = vmatpush2.msk.msra.mxu1 %vm1520_vm9, %v12484_v63  ;;  %6194 = vmatprep.subr.msk.mxu0 %vm1257_vm12, %v12484_v63  ;;  %vm1497_vm9 = vcmp.eq.s32.totalorder %v8007_v46, %v8832_v55  ;;  %vm1240_vm12 = vcmp.eq.s32.totalorder %v7990_v32, %v8847_v56  ;;  %v273_v17 = vadd.f32 %v9652_v39, %v7037_v7 }
 0x131   :  { %6258 = vmatprep.subr.msk.mxu1 %vm1513_vm13, %v12484_v63  ;;  %6195 = vmatpush2.msk.msra.mxu0 %vm1256_vm2, %v12484_v63  ;;  %vm1496_vm13 = vcmp.eq.s32.totalorder %v8007_v46, %v8847_v56  ;;  %vm9749_vm2 = vmand %vm9706_vm15, %vm248_vm5  ;;  %vm281_vm5 = vcmp.ge.f32.partialorder %v9717_v31, 0.0 }
 0x132   :  { %6259 = vmatpush2.msk.msra.mxu1 %vm1512_vm7, %v12484_v63  ;;  %6196 = vmatprep.subr.msk.mxu0 %vm1249_vm0, %v12484_v63  ;;  %vm282_vm7 = vcmp.ge.f32.partialorder %v9688_v19, 0.0  ;;  %vm1232_vm0 = vcmp.eq.s32.totalorder %v8056_v41, %v8847_v56  ;;  %vm9771_vm15 = vmand %vm9735_vm4, %vm247_vm14  ;;  %vm1224_vm4 = vcmp.eq.s32.totalorder %v8120_v42, %v8847_v56  ;;  %vm1480_vm14 = vcmp.eq.s32.totalorder %v8137_v59, %v8847_v56 }
 0x133   :  { %6260 = vmatprep.subr.msk.mxu1 %vm1505_vm10, %v12484_v63  ;;  %6197 = vmatpush2.msk.msra.mxu0 %vm1248_vm1, %v12484_v63  ;;  %vm1488_vm10 = vcmp.eq.s32.totalorder %v8073_v11, %v8847_v56  ;;  %vm1225_vm1 = vcmp.eq.s32.totalorder %v8120_v42, %v8832_v55  ;;  %v353_v9 = vadd.f32 %v345_v14, %v273_v17  ;;  %v6952_v14 = vld [vmem:[%s12014_s1 + $0x38] sm:$0x3f] }
 0x134   :  { %6261 = vmatpush2.msk.msra.mxu1 %vm1504_vm8, %v12484_v63  ;;  %6198 = vmatprep.subr.msk.mxu0 %vm1241_vm3, %v12484_v63  ;;  %vm1481_vm8 = vcmp.eq.s32.totalorder %v8137_v59, %v8832_v55  ;;  %vm9786_vm3 = vmand %vm9749_vm2, %vm282_vm7  ;;  %vm297_vm7 = vcmp.le.f32.partialorder %v9717_v31, 31.0  ;;  %v354_v31 = vadd.f32 %v346_v62, %v274_v40 }
 0x135   :  { %6262 = vmatprep.subr.msk.mxu1 %vm1497_vm9, %v12484_v63  ;;  %6199 = vmatpush2.msk.msra.mxu0 %vm1240_vm12, %v12484_v63  ;;  %vm298_vm9 = vcmp.le.f32.partialorder %v9688_v19, 31.0  ;;  %vm1217_vm12 = vcmp.eq.s32.totalorder %v8182_v20, %v8832_v55  ;;  %vm9815_vm2 = vmand %vm9771_vm15, %vm281_vm5  ;;  %vm1209_vm15 = vcmp.eq.s32.totalorder %v8214_v58, %v8832_v55  ;;  %vm1465_vm5 = vcmp.eq.s32.totalorder %v8231_v21, %v8832_v55 }
 0x136   :  { %6263 = vmatpush2.msk.msra.mxu1 %vm1496_vm13, %v12484_v63  ;;  %6200 = vmatprep.subr.msk.mxu0 %vm1233_vm11, %v12484_v63  ;;  %vm1473_vm13 = vcmp.eq.s32.totalorder %v8199_v57, %v8832_v55  ;;  %vm1216_vm11 = vcmp.eq.s32.totalorder %v8182_v20, %v8847_v56 }
 0x137   :  { %6264 = vmatprep.subr.msk.mxu1 %vm1489_vm6, %v12484_v63  ;;  %6201 = vmatpush2.msk.msra.mxu0 %vm1232_vm0, %v12484_v63  ;;  %vm1472_vm6 = vcmp.eq.s32.totalorder %v8199_v57, %v8847_v56  ;;  %vm9830_vm0 = vmand %vm9786_vm3, %vm298_vm9  ;;  %vm313_vm9 = vcmp.ge.f32.partialorder %v273_v17, 0.0 }
 0x138   :  { %6265 = vmatpush2.msk.msra.mxu1 %vm1488_vm10, %v12484_v63  ;;  %6202 = vmatprep.subr.msk.mxu0 %vm1225_vm1, %v12484_v63  ;;  %vm314_vm10 = vcmp.ge.f32.partialorder %v274_v40, 0.0  ;;  %vm1208_vm1 = vcmp.eq.s32.totalorder %v8214_v58, %v8847_v56  ;;  %vm9851_vm3 = vmand %vm9815_vm2, %vm297_vm7  ;;  %vm1200_vm2 = vcmp.eq.s32.totalorder %v8274_v61, %v8847_v56  ;;  %vm1456_vm7 = vcmp.eq.s32.totalorder %v8290_v60, %v8847_v56 }
 0x139   :  { %6266 = vmatprep.subr.msk.mxu1 %vm1481_vm8, %v12484_v63  ;;  %6203 = vmatpush2.msk.msra.mxu0 %vm1224_vm4, %v12484_v63  ;;  %vm1464_vm8 = vcmp.eq.s32.totalorder %v8231_v21, %v8847_v56  ;;  %vm1201_vm4 = vcmp.eq.s32.totalorder %v8274_v61, %v8832_v55 }
 0x13a   :  { %6267 = vmatpush2.msk.msra.mxu1 %vm1480_vm14, %v12484_v63  ;;  %6204 = vmatprep.subr.msk.mxu0 %vm1217_vm12, %v12484_v63  ;;  %vm1457_vm14 = vcmp.eq.s32.totalorder %v8290_v60, %v8832_v55  ;;  %vm9864_vm12 = vmand %vm9830_vm0, %vm314_vm10  ;;  %vm329_vm10 = vcmp.le.f32.partialorder %v273_v17, 31.0 }
 0x13b   :  { %6268 = vmatprep.subr.msk.mxu1 %vm1473_vm13, %v12484_v63  ;;  %6205 = vmatpush2.msk.msra.mxu0 %vm1216_vm11, %v12484_v63  ;;  %vm330_vm13 = vcmp.le.f32.partialorder %v274_v40, 31.0  ;;  %vm1193_vm11 = vcmp.eq.s32.totalorder %v8334_v16, %v8832_v55  ;;  %vm9890_vm0 = vmand %vm9851_vm3, %vm313_vm9  ;;  %vm1441_vm3 = vcmp.eq.s32.totalorder %v8381_v51, %v8832_v55  ;;  %vm1184_vm9 = vcmp.eq.s32.totalorder %v8368_v27, %v8847_v56  ;;  %v12650_v40 = vld [vmem:[#allocation19_spill] sm:$0xff] }
 0x13c   :  { %6269 = vmatpush2.msk.msra.mxu1 %vm1472_vm6, %v12484_v63  ;;  %6206 = vmatprep.subr.msk.mxu0 %vm1209_vm15, %v12484_v63  ;;  %vm1449_vm6 = vcmp.eq.s32.totalorder %v8351_v28, %v8832_v55  ;;  %vm1192_vm15 = vcmp.eq.s32.totalorder %v8334_v16, %v8847_v56 }
 0x13d   :  { %6270 = vmatprep.subr.msk.mxu1 %vm1465_vm5, %v12484_v63  ;;  %6207 = vmatpush2.msk.msra.mxu0 %vm1208_vm1, %v12484_v63  ;;  %vm1448_vm5 = vcmp.eq.s32.totalorder %v8351_v28, %v8847_v56  ;;  %vm9909_vm1 = vmand %vm9864_vm12, %vm330_vm13  ;;  %vm1177_vm12 = vcmp.eq.s32.totalorder %v8654_v49, %v8832_v55  ;;  %vm1433_vm13 = vcmp.eq.s32.totalorder %v8684_v52, %v8832_v55 }
 0x13e   :  { %6271 = vmatpush2.msk.msra.mxu1 %vm1464_vm8, %v12484_v63  ;;  %6208 = vmatprep.subr.msk.mxu0 %vm1201_vm4, %v12484_v63  ;;  %vm1185_vm8 = vcmp.eq.s32.totalorder %v8368_v27, %v8832_v55  ;;  %vm1440_vm4 = vcmp.eq.s32.totalorder %v8381_v51, %v8847_v56  ;;  %v362_v39 = vsel %vm9909_vm1, %v354_v31, -1.0  ;;  %vm1160_vm1 = vcmp.eq.s32.totalorder %v8746_v48, %v8847_v56  ;;  %v6953_v31 = vld [vmem:[%s12014_s1 + $0x30] sm:$0x3f] }
 0x13f   :  { %6272 = vmatprep.subr.msk.mxu1 %vm1457_vm14, %v12484_v63  ;;  %6209 = vmatpush2.msk.msra.mxu0 %vm1200_vm2, %v12484_v63  ;;  %vm9928_vm14 = vmand %vm9890_vm0, %vm329_vm10  ;;  %vm1176_vm2 = vcmp.eq.s32.totalorder %v8654_v49, %v8847_v56  ;;  %vm1168_vm0 = vcmp.eq.s32.totalorder %v8714_v8, %v8847_v56  ;;  %vm1424_vm10 = vcmp.eq.s32.totalorder %v8730_v6, %v8847_v56  ;;  %v6938_v47 = vtrunc.f32 %v362_v39  ;;  %v12651_v39 = vld [vmem:[#allocation20_spill] sm:$0xff] }
 0x140   :  { %6273 = vmatpush2.msk.msra.mxu1 %vm1456_vm7, %v12484_v63  ;;  %6210 = vmatprep.subr.msk.mxu0 %vm1193_vm11, %v12484_v63  ;;  %vm1432_vm7 = vcmp.eq.s32.totalorder %v8684_v52, %v8847_v56  ;;  %vm1169_vm11 = vcmp.eq.s32.totalorder %v8714_v8, %v8832_v55  ;;  %v361_v17 = vsel %vm9928_vm14, %v353_v9, -1.0  ;;  %vm1408_vm14 = vcmp.eq.s32.totalorder %v8792_v54, %v8847_v56  ;;  %v12649_v9 = vld [vmem:[#allocation18_spill] sm:$0xff] }
 0x141   :  { %6274 = vmatprep.subr.msk.mxu1 %vm1449_vm6, %v12484_v63  ;;  %6211 = vmatpush2.msk.msra.mxu0 %vm1192_vm15, %v12484_v63  ;;  %vm1425_vm6 = vcmp.eq.s32.totalorder %v8730_v6, %v8832_v55  ;;  %vm1161_vm15 = vcmp.eq.s32.totalorder %v8746_v48, %v8832_v55  ;;  %v6936_v62 = vtrunc.f32 %v361_v17  ;;  %v9984_v30 = vcvt.f32.s32 %v6938_v47  ;;  %v12652_v17 = vld [vmem:[#allocation21_spill] sm:$0xff]  ;;  %v12653_v47 = vld [vmem:[#allocation22_spill] sm:$0xff] }
 0x142   :  { %6275 = vmatpush2.msk.msra.mxu1 %vm1448_vm5, %v12484_v63  ;;  %6212 = vmatprep.subr.msk.mxu0 %vm1185_vm8, %v12484_v63  ;;  %vm1417_vm5 = vcmp.eq.s32.totalorder %v8766_v33, %v8832_v55  ;;  %vm1416_vm8 = vcmp.eq.s32.totalorder %v8766_v33, %v8847_v56 }
 0x143   :  { %6276 = vmatprep.subr.msk.mxu1 %vm1441_vm3, %v12484_v63  ;;  %6213 = vmatpush2.msk.msra.mxu0 %vm1184_vm9, %v12484_v63  ;;  %vm1153_vm3 = vcmp.eq.s32.totalorder %v8783_v50, %v8832_v55  ;;  %vm1409_vm9 = vcmp.eq.s32.totalorder %v8792_v54, %v8832_v55  ;;  %v9996_v19 = vcvt.f32.s32 %v6936_v62  ;;  %v12654_v62 = vld [vmem:[#allocation23_spill] sm:$0xff] }
 0x144   :  { %6277 = vmatpush2.msk.msra.mxu1 %vm1440_vm4, %v12484_v63  ;;  %6214 = vmatprep.subr.msk.mxu0 %vm1177_vm12, %v12484_v63  ;;  %vm1152_vm4 = vcmp.eq.s32.totalorder %v8783_v50, %v8847_v56  ;;  %vm1145_vm12 = vcmp.eq.s32.totalorder %v8809_v4, %v8832_v55 }
 0x145   :  { %6278 = vmatprep.subr.msk.mxu1 %vm1433_vm13, %v12484_v63  ;;  %6215 = vmatpush2.msk.msra.mxu0 %vm1176_vm2, %v12484_v63  ;;  %vm1401_vm13 = vcmp.eq.s32.totalorder %v8812_v53, %v8832_v55  ;;  %vm1144_vm2 = vcmp.eq.s32.totalorder %v8809_v4, %v8847_v56  ;;  %v6950_v55 = vld [vmem:[%s12014_s1 + $0x28] sm:$0x3f] }
 0x146   :  { %6279 = vmatpush2.msk.msra.mxu1 %vm1432_vm7, %v12484_v63  ;;  %6216 = vmatprep.subr.msk.mxu0 %vm1169_vm11, %v12484_v63  ;;  %vm1400_vm7 = vcmp.eq.s32.totalorder %v8812_v53, %v8847_v56  ;;  %vm627_vm11 = vcmp.eq.s32.totalorder %v7059_v29, %v9984_v30  ;;  %v6951_v56 = vld [vmem:[%s12014_s1 + $0x20] sm:$0x3f] }
 0x147   :  { %6280 = vmatprep.subr.msk.mxu1 %vm1425_vm6, %v12484_v63  ;;  %6217 = vmatpush2.msk.msra.mxu0 %vm1168_vm0, %v12484_v63  ;;  %vm883_vm6 = vcmp.eq.s32.totalorder %v7062_v0, %v9984_v30  ;;  %vm626_vm0 = vcmp.eq.s32.totalorder %v7059_v29, %v9996_v19 }
 0x148   :  { %6281 = vmatpush2.msk.msra.mxu1 %vm1424_vm10, %v12484_v63  ;;  %6218 = vmatprep.subr.msk.mxu0 %vm1161_vm15, %v12484_v63  ;;  %vm882_vm10 = vcmp.eq.s32.totalorder %v7062_v0, %v9996_v19  ;;  %vm619_vm15 = vcmp.eq.s32.totalorder %v7073_v34, %v9984_v30 }
 0x149   :  { %6282 = vmatprep.subr.msk.mxu1 %vm1417_vm5, %v12484_v63  ;;  %6219 = vmatpush2.msk.msra.mxu0 %vm1160_vm1, %v12484_v63  ;;  %vm875_vm5 = vcmp.eq.s32.totalorder %v7076_v35, %v9984_v30  ;;  %vm618_vm1 = vcmp.eq.s32.totalorder %v7073_v34, %v9996_v19  ;;  %v12712_v34 = vld [vmem:[#allocation71_spill] sm:$0xff] }
 0x14a   :  { %6283 = vmatpush2.msk.msra.mxu1 %vm1416_vm8, %v12484_v63  ;;  %6220 = vmatprep.subr.msk.mxu0 %vm1153_vm3, %v12484_v63  ;;  %vm874_vm8 = vcmp.eq.s32.totalorder %v7076_v35, %v9996_v19  ;;  %vm611_vm3 = vcmp.eq.s32.totalorder %v7079_v37, %v9984_v30 }
 0x14b   :  { %6284 = vmatprep.subr.msk.mxu1 %vm1409_vm9, %v12484_v63  ;;  %6221 = vmatpush2.msk.msra.mxu0 %vm1152_vm4, %v12484_v63  ;;  %vm867_vm9 = vcmp.eq.s32.totalorder %v12647_v38, %v9984_v30  ;;  %vm610_vm4 = vcmp.eq.s32.totalorder %v7079_v37, %v9996_v19 }
 0x14c   :  { %6285 = vmatpush2.msk.msra.mxu1 %vm1408_vm14, %v12484_v63  ;;  %6222 = vmatprep.subr.msk.mxu0 %vm1145_vm12, %v12484_v63  ;;  %vm866_vm14 = vcmp.eq.s32.totalorder %v12647_v38, %v9996_v19  ;;  %vm603_vm12 = vcmp.eq.s32.totalorder %v12648_v24, %v9984_v30 }
 0x14d   :  { %6286 = vmatprep.subr.msk.mxu1 %vm1401_vm13, %v12484_v63  ;;  %6223 = vmatpush2.msk.msra.mxu0 %vm1144_vm2, %v12484_v63  ;;  %vm859_vm13 = vcmp.eq.s32.totalorder %v12649_v9, %v9984_v30  ;;  %vm602_vm2 = vcmp.eq.s32.totalorder %v12648_v24, %v9996_v19 }
 0x14e   :  { %4072 = vmatprep.mubr.f32.mxu0 %v6950_v55  ;;  %6287 = vmatpush2.msk.msra.mxu1 %vm1400_vm7, %v12484_v63  ;;  %vm858_vm7 = vcmp.eq.s32.totalorder %v12649_v9, %v9996_v19  ;;  %v12655_v55 = vld [vmem:[#allocation24_spill] sm:$0xff] }
 0x14f   :  { %4073 = vmatmul.mubr.f32.vlgmr.msra.gmra.mxu0 %v6951_v56  ;;  %4143 = vmatprep.mubr.f32.mxu1 %v6952_v14  ;;  %v12656_v56 = vld [vmem:[#allocation25_spill] sm:$0xff]  ;;  %v12657_v14 = vld [vmem:[#allocation26_spill] sm:$0xff] }
 0x150   :  { %6288 = vmatprep.subr.msk.mxu0 %vm627_vm11, %v12484_v63  ;;  %6352 = vmatprep.subr.msk.mxu1 %vm883_vm6, %v12484_v63  ;;  %vm595_vm11 = vcmp.eq.s32.totalorder %v12650_v40, %v9984_v30  ;;  %vm851_vm6 = vcmp.eq.s32.totalorder %v12651_v39, %v9984_v30 }
 0x151   :  { %4144 = vmatmul.mubr.f32.vlgmr.msra.gmra.mxu1 %v6953_v31  ;;  %6289 = vmatpush1.msk.msra.mxu0 %vm626_vm0, %v12484_v63  ;;  %vm594_vm0 = vcmp.eq.s32.totalorder %v12650_v40, %v9996_v19  ;;  %v12658_v31 = vld [vmem:[#allocation27_spill] sm:$0xff] }
 0x152   :  { %6353 = vmatpush1.msk.msra.mxu1 %vm882_vm10, %v12484_v63  ;;  %6290 = vmatprep.subr.msk.mxu0 %vm619_vm15, %v12484_v63  ;;  %vm850_vm10 = vcmp.eq.s32.totalorder %v12651_v39, %v9996_v19  ;;  %vm587_vm15 = vcmp.eq.s32.totalorder %v12652_v17, %v9984_v30 }
 0x153   :  { %6354 = vmatprep.subr.msk.mxu1 %vm875_vm5, %v12484_v63  ;;  %6291 = vmatpush1.msk.msra.mxu0 %vm618_vm1, %v12484_v63  ;;  %vm843_vm5 = vcmp.eq.s32.totalorder %v12653_v47, %v9984_v30  ;;  %vm586_vm1 = vcmp.eq.s32.totalorder %v12652_v17, %v9996_v19 }
 0x154   :  { %6355 = vmatpush1.msk.msra.mxu1 %vm874_vm8, %v12484_v63  ;;  %6292 = vmatprep.subr.msk.mxu0 %vm611_vm3, %v12484_v63  ;;  %vm842_vm8 = vcmp.eq.s32.totalorder %v12653_v47, %v9996_v19  ;;  %vm579_vm3 = vcmp.eq.s32.totalorder %v12654_v62, %v9984_v30  ;;  %v12672_v47 = vld [vmem:[#allocation40_spill] sm:$0xff] }
 0x155   :  { %6356 = vmatprep.subr.msk.mxu1 %vm867_vm9, %v12484_v63  ;;  %6293 = vmatpush1.msk.msra.mxu0 %vm610_vm4, %v12484_v63  ;;  %vm835_vm9 = vcmp.eq.s32.totalorder %v12655_v55, %v9984_v30  ;;  %vm578_vm4 = vcmp.eq.s32.totalorder %v12654_v62, %v9996_v19  ;;  %v12671_v62 = vld [vmem:[#allocation39_spill] sm:$0xff] }
 0x156   :  { %6357 = vmatpush1.msk.msra.mxu1 %vm866_vm14, %v12484_v63  ;;  %6294 = vmatprep.subr.msk.mxu0 %vm603_vm12, %v12484_v63  ;;  %vm834_vm14 = vcmp.eq.s32.totalorder %v12655_v55, %v9996_v19  ;;  %vm571_vm12 = vcmp.eq.s32.totalorder %v12656_v56, %v9984_v30  ;;  %v12659_v55 = vld [vmem:[#allocation28_spill] sm:$0xff] }
 0x157   :  { %6358 = vmatprep.subr.msk.mxu1 %vm859_vm13, %v12484_v63  ;;  %6295 = vmatpush1.msk.msra.mxu0 %vm602_vm2, %v12484_v63  ;;  %vm827_vm13 = vcmp.eq.s32.totalorder %v12657_v14, %v9984_v30  ;;  %vm570_vm2 = vcmp.eq.s32.totalorder %v12656_v56, %v9996_v19  ;;  %v12661_v56 = vld [vmem:[#allocation30_spill] sm:$0xff] }
 0x158   :  { %6359 = vmatpush1.msk.msra.mxu1 %vm858_vm7, %v12484_v63  ;;  %6296 = vmatprep.subr.msk.mxu0 %vm595_vm11, %v12484_v63  ;;  %vm826_vm7 = vcmp.eq.s32.totalorder %v12657_v14, %v9996_v19  ;;  %vm563_vm11 = vcmp.eq.s32.totalorder %v12658_v31, %v9984_v30  ;;  %v12660_v14 = vld [vmem:[#allocation29_spill] sm:$0xff] }
 0x159   :  { %6360 = vmatprep.subr.msk.mxu1 %vm851_vm6, %v12484_v63  ;;  %6297 = vmatpush1.msk.msra.mxu0 %vm594_vm0, %v12484_v63  ;;  %vm819_vm6 = vcmp.eq.s32.totalorder %v12659_v55, %v9984_v30  ;;  %vm562_vm0 = vcmp.eq.s32.totalorder %v12658_v31, %v9996_v19  ;;  %v12663_v31 = vld [vmem:[#allocation32_spill] sm:$0xff] }
 0x15a   :  { %6361 = vmatpush1.msk.msra.mxu1 %vm850_vm10, %v12484_v63  ;;  %6298 = vmatprep.subr.msk.mxu0 %vm587_vm15, %v12484_v63  ;;  %vm818_vm10 = vcmp.eq.s32.totalorder %v12659_v55, %v9996_v19  ;;  %vm555_vm15 = vcmp.eq.s32.totalorder %v12660_v14, %v9984_v30  ;;  %v12662_v55 = vld [vmem:[#allocation31_spill] sm:$0xff] }
 0x15b   :  { %6362 = vmatprep.subr.msk.mxu1 %vm843_vm5, %v12484_v63  ;;  %6299 = vmatpush1.msk.msra.mxu0 %vm586_vm1, %v12484_v63  ;;  %vm811_vm5 = vcmp.eq.s32.totalorder %v12661_v56, %v9984_v30  ;;  %vm554_vm1 = vcmp.eq.s32.totalorder %v12660_v14, %v9996_v19  ;;  %v12665_v14 = vld [vmem:[#allocation34_spill] sm:$0xff] }
 0x15c   :  { %6363 = vmatpush1.msk.msra.mxu1 %vm842_vm8, %v12484_v63  ;;  %6300 = vmatprep.subr.msk.mxu0 %vm579_vm3, %v12484_v63  ;;  %vm810_vm8 = vcmp.eq.s32.totalorder %v12661_v56, %v9996_v19  ;;  %vm547_vm3 = vcmp.eq.s32.totalorder %v12662_v55, %v9984_v30  ;;  %v12664_v56 = vld [vmem:[#allocation33_spill] sm:$0xff] }
 0x15d   :  { %6364 = vmatprep.subr.msk.mxu1 %vm835_vm9, %v12484_v63  ;;  %6301 = vmatpush1.msk.msra.mxu0 %vm578_vm4, %v12484_v63  ;;  %vm803_vm9 = vcmp.eq.s32.totalorder %v12663_v31, %v9984_v30  ;;  %vm546_vm4 = vcmp.eq.s32.totalorder %v12662_v55, %v9996_v19  ;;  %v12667_v55 = vld [vmem:[#allocation36_spill] sm:$0xff] }
 0x15e   :  { %6365 = vmatpush1.msk.msra.mxu1 %vm834_vm14, %v12484_v63  ;;  %6302 = vmatprep.subr.msk.mxu0 %vm571_vm12, %v12484_v63  ;;  %vm802_vm14 = vcmp.eq.s32.totalorder %v12663_v31, %v9996_v19  ;;  %vm539_vm12 = vcmp.eq.s32.totalorder %v12664_v56, %v9984_v30  ;;  %v12666_v31 = vld [vmem:[#allocation35_spill] sm:$0xff] }
 0x15f   :  { %6366 = vmatprep.subr.msk.mxu1 %vm827_vm13, %v12484_v63  ;;  %6303 = vmatpush1.msk.msra.mxu0 %vm570_vm2, %v12484_v63  ;;  %vm795_vm13 = vcmp.eq.s32.totalorder %v12665_v14, %v9984_v30  ;;  %vm538_vm2 = vcmp.eq.s32.totalorder %v12664_v56, %v9996_v19  ;;  %v12669_v56 = vld [vmem:[#allocation38_spill] sm:$0xff] }
 0x160   :  { %6367 = vmatpush1.msk.msra.mxu1 %vm826_vm7, %v12484_v63  ;;  %6304 = vmatprep.subr.msk.mxu0 %vm563_vm11, %v12484_v63  ;;  %vm794_vm7 = vcmp.eq.s32.totalorder %v12665_v14, %v9996_v19  ;;  %vm531_vm11 = vcmp.eq.s32.totalorder %v12666_v31, %v9984_v30  ;;  %v12668_v14 = vld [vmem:[#allocation37_spill] sm:$0xff] }
 0x161   :  { %6368 = vmatprep.subr.msk.mxu1 %vm819_vm6, %v12484_v63  ;;  %6305 = vmatpush1.msk.msra.mxu0 %vm562_vm0, %v12484_v63  ;;  %vm787_vm6 = vcmp.eq.s32.totalorder %v12667_v55, %v9984_v30  ;;  %vm530_vm0 = vcmp.eq.s32.totalorder %v12666_v31, %v9996_v19 }
 0x162   :  { %6369 = vmatpush1.msk.msra.mxu1 %vm818_vm10, %v12484_v63  ;;  %6306 = vmatprep.subr.msk.mxu0 %vm555_vm15, %v12484_v63  ;;  %vm786_vm10 = vcmp.eq.s32.totalorder %v12667_v55, %v9996_v19  ;;  %vm523_vm15 = vcmp.eq.s32.totalorder %v12668_v14, %v9984_v30  ;;  %v12670_v55 = vld [vmem:[#allocation5_spill] sm:$0xff] }
 0x163   :  { %6370 = vmatprep.subr.msk.mxu1 %vm811_vm5, %v12484_v63  ;;  %6307 = vmatpush1.msk.msra.mxu0 %vm554_vm1, %v12484_v63  ;;  %vm779_vm5 = vcmp.eq.s32.totalorder %v12669_v56, %v9984_v30  ;;  %vm522_vm1 = vcmp.eq.s32.totalorder %v12668_v14, %v9996_v19  ;;  %v10181_v31 = vadd.s32 896, %v12670_v55  ;;  %v10190_v17 = vadd.s32 768, %v12670_v55  ;;  %v12674_v55 = vld [vmem:[#allocation41_spill] sm:$0xff]  ;;  %v12676_v14 = vld [vmem:[#allocation43_spill] sm:$0xff] }
 0x164   :  { %6371 = vmatpush1.msk.msra.mxu1 %vm810_vm8, %v12484_v63  ;;  %6308 = vmatprep.subr.msk.mxu0 %vm547_vm3, %v12484_v63  ;;  %vm778_vm8 = vcmp.eq.s32.totalorder %v12669_v56, %v9996_v19  ;;  %vm515_vm3 = vcmp.eq.s32.totalorder %v12671_v62, %v9984_v30  ;;  %v12673_v56 = vld [vmem:[#allocation10_spill] sm:$0xff] }
 0x165   :  { %6372 = vmatprep.subr.msk.mxu1 %vm803_vm9, %v12484_v63  ;;  %6309 = vmatpush1.msk.msra.mxu0 %vm546_vm4, %v12484_v63  ;;  %vm771_vm9 = vcmp.eq.s32.totalorder %v12672_v47, %v9984_v30  ;;  %vm514_vm4 = vcmp.eq.s32.totalorder %v12671_v62, %v9996_v19  ;;  %v12675_v62 = vld [vmem:[#allocation42_spill] sm:$0xff]  ;;  %v12679_v39 = vcvt.s32.f32 %v10181_v31  ;;  %v12682_v40 = vcvt.s32.f32 %v10190_v17 }
 0x166   :  { %6373 = vmatpush1.msk.msra.mxu1 %vm802_vm14, %v12484_v63  ;;  %6310 = vmatprep.subr.msk.mxu0 %vm539_vm12, %v12484_v63  ;;  %vm770_vm14 = vcmp.eq.s32.totalorder %v12672_v47, %v9996_v19  ;;  %vm507_vm12 = vcmp.eq.s32.totalorder %v12673_v56, %v9984_v30  ;;  %v12677_v47 = vld [vmem:[#allocation44_spill] sm:$0xff]  ;;  %v12702_v37 = vcvt.s32.f32 %v10190_v17 }
 0x167   :  { %6374 = vmatprep.subr.msk.mxu1 %vm795_vm13, %v12484_v63  ;;  %6311 = vmatpush1.msk.msra.mxu0 %vm538_vm2, %v12484_v63  ;;  %vm763_vm13 = vcmp.eq.s32.totalorder %v12674_v55, %v9984_v30  ;;  %vm506_vm2 = vcmp.eq.s32.totalorder %v12673_v56, %v9996_v19  ;;  %v12681_v56 = vld [vmem:[#allocation47_spill] sm:$0xff]  ;;  %v53_v9 = vadd.f32 0.5, %v12682_v40 }
 0x168   :  { %6375 = vmatpush1.msk.msra.mxu1 %vm794_vm7, %v12484_v63  ;;  %6312 = vmatprep.subr.msk.mxu0 %vm531_vm11, %v12484_v63  ;;  %vm762_vm7 = vcmp.eq.s32.totalorder %v12674_v55, %v9996_v19  ;;  %vm755_vm11 = vcmp.eq.s32.totalorder %v12675_v62, %v9984_v30  ;;  %v12678_v55 = vld [vmem:[#allocation45_spill] sm:$0xff] }
 0x169   :  { %6376 = vmatprep.subr.msk.mxu1 %vm787_vm6, %v12484_v63  ;;  %6313 = vmatpush1.msk.msra.mxu0 %vm530_vm0, %v12484_v63  ;;  %vm1011_vm6 = vcmp.eq.s32.totalorder %v12676_v14, %v9984_v30  ;;  %vm754_vm0 = vcmp.eq.s32.totalorder %v12675_v62, %v9996_v19  ;;  %v12680_v62 = vld [vmem:[#allocation46_spill] sm:$0xff] }
 0x16a   :  { %6377 = vmatpush1.msk.msra.mxu1 %vm786_vm10, %v12484_v63  ;;  %6314 = vmatprep.subr.msk.mxu0 %vm523_vm15, %v12484_v63  ;;  %vm1010_vm10 = vcmp.eq.s32.totalorder %v12676_v14, %v9996_v19  ;;  %vm747_vm15 = vcmp.eq.s32.totalorder %v12677_v47, %v9984_v30  ;;  %v54_v14 = vadd.f32 0.5, %v12679_v39  ;;  %v12683_v39 = vld [vmem:[#allocation48_spill] sm:$0xff] }
 0x16b   :  { %6378 = vmatprep.subr.msk.mxu1 %vm779_vm5, %v12484_v63  ;;  %6315 = vmatpush1.msk.msra.mxu0 %vm522_vm1, %v12484_v63  ;;  %vm1003_vm5 = vcmp.eq.s32.totalorder %v12678_v55, %v9984_v30  ;;  %vm746_vm1 = vcmp.eq.s32.totalorder %v12677_v47, %v9996_v19  ;;  %v10272_v47 = vmul.f32 0.03125, %v53_v9  ;;  %v12688_v9 = vld [vmem:[#allocation53_spill] sm:$0xff] }
 0x16c   :  { %6379 = vmatpush1.msk.msra.mxu1 %vm778_vm8, %v12484_v63  ;;  %6316 = vmatprep.subr.msk.mxu0 %vm515_vm3, %v12484_v63  ;;  %vm1002_vm8 = vcmp.eq.s32.totalorder %v12678_v55, %v9996_v19  ;;  %vm739_vm3 = vcmp.eq.s32.totalorder %v12680_v62, %v9984_v30  ;;  %v12684_v55 = vld [vmem:[#allocation49_spill] sm:$0xff]  ;;  %v10264_v40 = vmul.f32 0.03125, %v54_v14  ;;  %v12687_v14 = vld [vmem:[#allocation52_spill] sm:$0xff] }
 0x16d   :  { %6380 = vmatprep.subr.msk.mxu1 %vm771_vm9, %v12484_v63  ;;  %6317 = vmatpush1.msk.msra.mxu0 %vm514_vm4, %v12484_v63  ;;  %vm995_vm9 = vcmp.eq.s32.totalorder %v12681_v56, %v9984_v30  ;;  %vm738_vm4 = vcmp.eq.s32.totalorder %v12680_v62, %v9996_v19  ;;  %v12686_v62 = vld [vmem:[#allocation51_spill] sm:$0xff]  ;;  %v12696_v24 = vfloor.f32 %v10272_v47 }
 0x16e   :  { %6381 = vmatpush1.msk.msra.mxu1 %vm770_vm14, %v12484_v63  ;;  %6318 = vmatprep.subr.msk.mxu0 %vm507_vm12, %v12484_v63  ;;  %vm994_vm14 = vcmp.eq.s32.totalorder %v12681_v56, %v9996_v19  ;;  %vm731_vm12 = vcmp.eq.s32.totalorder %v12683_v39, %v9984_v30  ;;  %v12685_v56 = vld [vmem:[#allocation50_spill] sm:$0xff]  ;;  %v12713_v0 = vfloor.f32 %v10264_v40 }
 0x16f   :  { %6382 = vmatprep.subr.msk.mxu1 %vm763_vm13, %v12484_v63  ;;  %6319 = vmatpush1.msk.msra.mxu0 %vm506_vm2, %v12484_v63  ;;  %vm987_vm13 = vcmp.eq.s32.totalorder %v12684_v55, %v9984_v30  ;;  %vm730_vm2 = vcmp.eq.s32.totalorder %v12683_v39, %v9996_v19  ;;  %v12693_v39 = vfloor.f32 %v10264_v40  ;;  %v77_v38 = vmul.f32 32.0, %v12696_v24  ;;  %v12715_v40 = vld [vmem:[#allocation73_spill] sm:$0xff] }
 0x170   :  { %6383 = vmatpush1.msk.msra.mxu1 %vm762_vm7, %v12484_v63  ;;  %6320 = vmatprep.subr.msk.mxu0 %vm755_vm11, %v12484_v63  ;;  %vm986_vm7 = vcmp.eq.s32.totalorder %v12684_v55, %v9996_v19  ;;  %vm723_vm11 = vcmp.eq.s32.totalorder %v12685_v56, %v9984_v30  ;;  %v12690_v55 = vld [vmem:[#allocation55_spill] sm:$0xff]  ;;  %v12699_v24 = vcvt.s32.f32 %v10181_v31  ;;  %v12703_v31 = vld [vmem:[#allocation6_spill] sm:$0xff]  ;;  %v4743_v29 = vadd.f32 -15.5, %v12713_v0  ;;  %v12714_v0 = vld [vmem:[#allocation72_spill] sm:$0xff] }
 0x171   :  { %6384 = vmatprep.subr.msk.mxu1 %vm1011_vm6, %v12484_v63  ;;  %6321 = vmatpush2.msk.msra.mxu0 %vm754_vm0, %v12484_v63  ;;  %vm979_vm6 = vcmp.eq.s32.totalorder %v12686_v62, %v9984_v30  ;;  %vm722_vm0 = vcmp.eq.s32.totalorder %v12685_v56, %v9996_v19  ;;  %v12689_v56 = vld [vmem:[#allocation54_spill] sm:$0xff]  ;;  %v85_v35 = vsub.f32 %v12702_v37, %v77_v38  ;;  %v12704_v37 = vld [vmem:[#allocation64_spill] sm:$0xff]  ;;  %v12705_v38 = vld [vmem:[#allocation65_spill] sm:$0xff] }
 0x172   :  { %6385 = vmatpush2.msk.msra.mxu1 %vm1010_vm10, %v12484_v63  ;;  %6322 = vmatprep.subr.msk.mxu0 %vm747_vm15, %v12484_v63  ;;  %vm978_vm10 = vcmp.eq.s32.totalorder %v12686_v62, %v9996_v19  ;;  %vm715_vm15 = vcmp.eq.s32.totalorder %v12687_v14, %v9984_v30  ;;  %v12691_v62 = vld [vmem:[#allocation56_spill] sm:$0xff] }
 0x173   :  { %6386 = vmatprep.subr.msk.mxu1 %vm1003_vm5, %v12484_v63  ;;  %6323 = vmatpush2.msk.msra.mxu0 %vm746_vm1, %v12484_v63  ;;  %vm971_vm5 = vcmp.eq.s32.totalorder %v12688_v9, %v9984_v30  ;;  %vm714_vm1 = vcmp.eq.s32.totalorder %v12687_v14, %v9996_v19  ;;  %v12695_v14 = vld [vmem:[#allocation59_spill] sm:$0xff]  ;;  %v94_v17 = vmul.f32 %v12703_v31, %v85_v35 }
 0x174   :  { %6387 = vmatpush2.msk.msra.mxu1 %vm1002_vm8, %v12484_v63  ;;  %6324 = vmatprep.subr.msk.mxu0 %vm739_vm3, %v12484_v63  ;;  %vm970_vm8 = vcmp.eq.s32.totalorder %v12688_v9, %v9996_v19  ;;  %vm707_vm3 = vcmp.eq.s32.totalorder %v12689_v56, %v9984_v30  ;;  %v12692_v9 = vld [vmem:[#allocation57_spill] sm:$0xff]  ;;  %v12708_v35 = vld [vmem:[#allocation7_spill] sm:$0xff] }
 0x175   :  { %6388 = vmatprep.subr.msk.mxu1 %vm995_vm9, %v12484_v63  ;;  %6325 = vmatpush2.msk.msra.mxu0 %vm738_vm4, %v12484_v63  ;;  %vm963_vm9 = vcmp.eq.s32.totalorder %v12690_v55, %v9984_v30  ;;  %vm706_vm4 = vcmp.eq.s32.totalorder %v12689_v56, %v9996_v19  ;;  %v12694_v56 = vld [vmem:[#allocation58_spill] sm:$0xff] }
 0x176   :  { %6389 = vmatpush2.msk.msra.mxu1 %vm994_vm14, %v12484_v63  ;;  %6326 = vmatprep.subr.msk.mxu0 %vm731_vm12, %v12484_v63  ;;  %vm962_vm14 = vcmp.eq.s32.totalorder %v12690_v55, %v9996_v19  ;;  %vm699_vm12 = vcmp.eq.s32.totalorder %v12691_v62, %v9984_v30  ;;  %v78_v55 = vmul.f32 32.0, %v12693_v39  ;;  %v12697_v39 = vld [vmem:[#allocation60_spill] sm:$0xff] }
 0x177   :  { %6390 = vmatprep.subr.msk.mxu1 %vm987_vm13, %v12484_v63  ;;  %6327 = vmatpush2.msk.msra.mxu0 %vm730_vm2, %v12484_v63  ;;  %vm955_vm13 = vcmp.eq.s32.totalorder %v12692_v9, %v9984_v30  ;;  %vm698_vm2 = vcmp.eq.s32.totalorder %v12691_v62, %v9996_v19  ;;  %v12701_v62 = vld [vmem:[#allocation63_spill] sm:$0xff] }
 0x178   :  { %6391 = vmatpush2.msk.msra.mxu1 %vm986_vm7, %v12484_v63  ;;  %6328 = vmatprep.subr.msk.mxu0 %vm723_vm11, %v12484_v63  ;;  %vm954_vm7 = vcmp.eq.s32.totalorder %v12692_v9, %v9996_v19  ;;  %vm691_vm11 = vcmp.eq.s32.totalorder %v12694_v56, %v9984_v30  ;;  %v12698_v9 = vld [vmem:[#allocation61_spill] sm:$0xff] }
 0x179   :  { %6392 = vmatprep.subr.msk.mxu1 %vm979_vm6, %v12484_v63  ;;  %6329 = vmatpush2.msk.msra.mxu0 %vm722_vm0, %v12484_v63  ;;  %vm947_vm6 = vcmp.eq.s32.totalorder %v12695_v14, %v9984_v30  ;;  %vm690_vm0 = vcmp.eq.s32.totalorder %v12694_v56, %v9996_v19  ;;  %v12700_v56 = vld [vmem:[#allocation62_spill] sm:$0xff] }
 0x17a   :  { %6393 = vmatpush2.msk.msra.mxu1 %vm978_vm10, %v12484_v63  ;;  %6330 = vmatprep.subr.msk.mxu0 %vm715_vm15, %v12484_v63  ;;  %vm946_vm10 = vcmp.eq.s32.totalorder %v12695_v14, %v9996_v19  ;;  %vm683_vm15 = vcmp.eq.s32.totalorder %v12697_v39, %v9984_v30  ;;  %v86_v14 = vsub.f32 %v12699_v24, %v78_v55  ;;  %v3648_v24 = vpop.f32.mrf.mxu0 }
 0x17b   :  { %6394 = vmatprep.subr.msk.mxu1 %vm971_vm5, %v12484_v63  ;;  %6331 = vmatpush2.msk.msra.mxu0 %vm714_vm1, %v12484_v63  ;;  %vm939_vm5 = vcmp.eq.s32.totalorder %v12698_v9, %v9984_v30  ;;  %vm682_vm1 = vcmp.eq.s32.totalorder %v12697_v39, %v9996_v19  ;;  %v12710_v39 = vld [vmem:[#allocation69_spill] sm:$0xff] }
 0x17c   :  { %6395 = vmatpush2.msk.msra.mxu1 %vm970_vm8, %v12484_v63  ;;  %6332 = vmatprep.subr.msk.mxu0 %vm707_vm3, %v12484_v63  ;;  %vm938_vm8 = vcmp.eq.s32.totalorder %v12698_v9, %v9996_v19  ;;  %vm675_vm3 = vcmp.eq.s32.totalorder %v12700_v56, %v9984_v30  ;;  %v95_v55 = vmul.f32 %v12703_v31, %v86_v14  ;;  %v3719_v9 = vpop.f32.mrf.mxu1  ;;  %v12706_v14 = vld [vmem:[#allocation66_spill] sm:$0xff] }
 0x17d   :  { %6396 = vmatprep.subr.msk.mxu1 %vm963_vm9, %v12484_v63  ;;  %6333 = vmatpush2.msk.msra.mxu0 %vm706_vm4, %v12484_v63  ;;  %vm931_vm9 = vcmp.eq.s32.totalorder %v12701_v62, %v9984_v30  ;;  %vm674_vm4 = vcmp.eq.s32.totalorder %v12700_v56, %v9996_v19  ;;  %v12709_v56 = vld [vmem:[#allocation68_spill] sm:$0xff] }
 0x17e   :  { %6397 = vmatpush2.msk.msra.mxu1 %vm962_vm14, %v12484_v63  ;;  %6334 = vmatprep.subr.msk.mxu0 %vm699_vm12, %v12484_v63  ;;  %vm930_vm14 = vcmp.eq.s32.totalorder %v12701_v62, %v9996_v19  ;;  %vm667_vm12 = vcmp.eq.s32.totalorder %v12704_v37, %v9984_v30  ;;  %v12707_v62 = vld [vmem:[#allocation67_spill] sm:$0xff]  ;;  %v104_v31 = vadd.f32 %v12708_v35, %v95_v55 }
 0x17f   :  { %6398 = vmatprep.subr.msk.mxu1 %vm955_vm13, %v12484_v63  ;;  %6335 = vmatpush2.msk.msra.mxu0 %vm698_vm2, %v12484_v63  ;;  %vm923_vm13 = vcmp.eq.s32.totalorder %v12705_v38, %v9984_v30  ;;  %vm666_vm2 = vcmp.eq.s32.totalorder %v12704_v37, %v9996_v19  ;;  %v3721_v37 = vpop.f32.mrf.mxu1  ;;  %v103_v55 = vadd.f32 %v12708_v35, %v94_v17 }
 0x180   :  { %6399 = vmatpush2.msk.msra.mxu1 %vm954_vm7, %v12484_v63  ;;  %6336 = vmatprep.subr.msk.mxu0 %vm691_vm11, %v12484_v63  ;;  %vm922_vm7 = vcmp.eq.s32.totalorder %v12705_v38, %v9996_v19  ;;  %vm659_vm11 = vcmp.eq.s32.totalorder %v12706_v14, %v9984_v30  ;;  %v3650_v38 = vpop.f32.mrf.mxu0 }
 0x181   :  { %6400 = vmatprep.subr.msk.mxu1 %vm947_vm6, %v12484_v63  ;;  %6337 = vmatpush2.msk.msra.mxu0 %vm690_vm0, %v12484_v63  ;;  %vm915_vm6 = vcmp.eq.s32.totalorder %v12707_v62, %v9984_v30  ;;  %vm658_vm0 = vcmp.eq.s32.totalorder %v12706_v14, %v9996_v19  ;;  %v12711_v14 = vld [vmem:[#allocation70_spill] sm:$0xff]  ;;  %v3722_v53 = vadd.f32 %v3721_v37, %v3650_v38  ;;  %v12716_v38 = vfloor.f32 %v10272_v47 }
 0x182   :  { %6401 = vmatpush2.msk.msra.mxu1 %vm946_vm10, %v12484_v63  ;;  %6338 = vmatprep.subr.msk.mxu0 %vm683_vm15, %v12484_v63  ;;  %vm914_vm10 = vcmp.eq.s32.totalorder %v12707_v62, %v9996_v19  ;;  %vm651_vm15 = vcmp.eq.s32.totalorder %v12709_v56, %v9984_v30  ;;  %v3720_v62 = vadd.f32 %v3719_v9, %v3648_v24  ;;  %v4751_v24 = vadd.f32 -15.5, %v104_v31 }
 0x183   :  { %6402 = vmatprep.subr.msk.mxu1 %vm939_vm5, %v12484_v63  ;;  %6339 = vmatpush2.msk.msra.mxu0 %vm682_vm1, %v12484_v63  ;;  %vm907_vm5 = vcmp.eq.s32.totalorder %v12710_v39, %v9984_v30  ;;  %vm650_vm1 = vcmp.eq.s32.totalorder %v12709_v56, %v9996_v19  ;;  %v4742_v17 = vadd.f32 -15.5, %v12716_v38  ;;  %v4750_v31 = vadd.f32 -15.5, %v103_v55  ;;  %v12720_v56 = vld [vmem:[#allocation9_spill] sm:$0xff] }
 0x184   :  { %6403 = vmatpush2.msk.msra.mxu1 %vm938_vm8, %v12484_v63  ;;  %6340 = vmatprep.subr.msk.mxu0 %vm675_vm3, %v12484_v63  ;;  %vm906_vm8 = vcmp.eq.s32.totalorder %v12710_v39, %v9996_v19  ;;  %vm643_vm3 = vcmp.eq.s32.totalorder %v12711_v14, %v9984_v30  ;;  %v138_v4 = vmul.f32 %v4751_v24, %v12720_v56 }
 0x185   :  { %6404 = vmatprep.subr.msk.mxu1 %vm931_vm9, %v12484_v63  ;;  %6341 = vmatpush2.msk.msra.mxu0 %vm674_vm4, %v12484_v63  ;;  %vm899_vm9 = vcmp.eq.s32.totalorder %v12712_v34, %v9984_v30  ;;  %vm642_vm4 = vcmp.eq.s32.totalorder %v12711_v14, %v9996_v19 }
 0x186   :  { %6405 = vmatpush2.msk.msra.mxu1 %vm930_vm14, %v12484_v63  ;;  %6342 = vmatprep.subr.msk.mxu0 %vm667_vm12, %v12484_v63  ;;  %vm898_vm14 = vcmp.eq.s32.totalorder %v12712_v34, %v9996_v19  ;;  %vm635_vm12 = vcmp.eq.s32.totalorder %v12714_v0, %v9984_v30  ;;  %v12719_v34 = vld [vmem:[#allocation8_spill] sm:$0xff] }
 0x187   :  { %6406 = vmatprep.subr.msk.mxu1 %vm923_vm13, %v12484_v63  ;;  %6343 = vmatpush2.msk.msra.mxu0 %vm666_vm2, %v12484_v63  ;;  %vm891_vm13 = vcmp.eq.s32.totalorder %v12715_v40, %v9984_v30  ;;  %vm634_vm2 = vcmp.eq.s32.totalorder %v12714_v0, %v9996_v19  ;;  %v129_v14 = vmul.f32 %v4743_v29, %v12719_v34 }
 0x188   :  { %6407 = vmatpush2.msk.msra.mxu1 %vm922_vm7, %v12484_v63  ;;  %6344 = vmatprep.subr.msk.mxu0 %vm659_vm11, %v12484_v63  ;;  %vm890_vm7 = vcmp.eq.s32.totalorder %v12715_v40, %v9996_v19  ;;  %v137_v0 = vmul.f32 %v4750_v31, %v12720_v56  ;;  %v178_v40 = vmul.f32 %v4751_v24, %v12719_v34 }
 0x189   :  { %6408 = vmatprep.subr.msk.mxu1 %vm915_vm6, %v12484_v63  ;;  %6345 = vmatpush2.msk.msra.mxu0 %vm658_vm0, %v12484_v63  ;;  %v169_v24 = vmul.f32 %v4742_v17, %v12720_v56 }
 0x18a   :  { %6409 = vmatpush2.msk.msra.mxu1 %vm914_vm10, %v12484_v63  ;;  %6346 = vmatprep.subr.msk.mxu0 %vm651_vm15, %v12484_v63 }
 0x18b   :  { %6410 = vmatprep.subr.msk.mxu1 %vm907_vm5, %v12484_v63  ;;  %v3790_v9 = vpop.f32.mrf.mxu0  ;;  %6347 = vmatpush2.msk.msra.mxu0 %vm650_vm1, %v12484_v63 }
 0x18c   :  { %6411 = vmatpush2.msk.msra.mxu1 %vm906_vm8, %v12484_v63  ;;  %v3791_v37 = vadd.f32 %v3790_v9, %v3720_v62  ;;  %6348 = vmatprep.subr.msk.mxu0 %vm643_vm3, %v12484_v63  ;;  %v12717_v62 = vld [vmem:[#allocation74_spill] sm:$0xff]  ;;  %v12718_v9 = vld [vmem:[#allocation75_spill] sm:$0xff] }
 0x18d   :  { %6412 = vmatprep.subr.msk.mxu1 %vm899_vm9, %v12484_v63  ;;  %vm1139_vm11 = vcmp.eq.s32.totalorder %v12717_v62, %v9984_v30  ;;  %v3861_v47 = vpop.f32.mrf.mxu1  ;;  %v3792_v35 = vpop.f32.mrf.mxu0  ;;  %6349 = vmatpush2.msk.msra.mxu0 %vm642_vm4, %v12484_v63  ;;  %vm1395_vm6 = vcmp.eq.s32.totalorder %v12718_v9, %v9984_v30  ;;  %vm1138_vm0 = vcmp.eq.s32.totalorder %v12717_v62, %v9996_v19 }
 0x18e   :  { %6413 = vmatpush2.msk.msra.mxu1 %vm898_vm14, %v12484_v63  ;;  %v3862_v38 = vadd.f32 %v3861_v47, %v3791_v37  ;;  %v3793_v39 = vadd.f32 %v3792_v35, %v3722_v53  ;;  %6350 = vmatprep.subr.msk.mxu0 %vm635_vm12, %v12484_v63  ;;  %v6954_v53 = vld [vmem:[%s12014_s1 + $0x8] sm:$0x3f]  ;;  %vm1394_vm10 = vcmp.eq.s32.totalorder %v12718_v9, %v9996_v19  ;;  %v12721_v37 = vld [vmem:[#allocation76_spill] sm:$0xff]  ;;  %v6955_v35 = vld [vmem:[%s12014_s1 + $0x18] sm:$0x3f] }
 0x18f   :  { %6414 = vmatprep.subr.msk.mxu1 %vm891_vm13, %v12484_v63  ;;  %v3863_v55 = vpop.f32.mrf.mxu1  ;;  %6351 = vmatpush2.msk.msra.mxu0 %vm634_vm2, %v12484_v63  ;;  %vm1131_vm15 = vcmp.eq.s32.totalorder %v12721_v37, %v9984_v30  ;;  %vm1130_vm1 = vcmp.eq.s32.totalorder %v12721_v37, %v9996_v19 }
 0x190   :  { %4214 = vmatprep.mubr.f32.mxu0 %v6954_v53  ;;  %4718 = vst [vmem:[%s12015_s2] sm:$0x3f] %v3862_v38  ;;  %v3864_v47 = vadd.f32 %v3863_v55, %v3793_v39  ;;  %6415 = vmatpush2.msk.msra.mxu1 %vm890_vm7, %v12484_v63  ;;  %v12722_v53 = vld [vmem:[#allocation77_spill] sm:$0xff]  ;;  %v128_v38 = vmul.f32 %v4742_v17, %v12719_v34  ;;  %v6956_v39 = vld [vmem:[%s12014_s1] sm:$0x3f]  ;;  %v6957_v55 = vld [vmem:[%s12014_s1 + $0x10] sm:$0x3f] }
 0x191   :  { %4285 = vmatprep.mubr.f32.mxu1 %v6955_v35  ;;  %vm1387_vm5 = vcmp.eq.s32.totalorder %v12722_v53, %v9984_v30  ;;  %4215 = vmatmul.mubr.f32.vlgmr.msra.gmra.mxu0 %v6956_v39  ;;  %v170_v35 = vmul.f32 %v4743_v29, %v12720_v56  ;;  %vm1386_vm8 = vcmp.eq.s32.totalorder %v12722_v53, %v9996_v19  ;;  %v12724_v29 = vld [vmem:[#allocation79_spill] sm:$0xff]  ;;  %v12726_v56 = vld [vmem:[#allocation81_spill] sm:$0xff] }
 0x192   :  { %4286 = vmatmul.mubr.f32.vlgmr.msra.gmra.mxu1 %v6957_v55  ;;  %4719 = vst [vmem:[%s12015_s2 + $0x8] sm:$0x3f] %v3864_v47  ;;  %6416 = vmatprep.subr.msk.mxu0 %vm1139_vm11, %v12484_v63  ;;  %v12723_v47 = vld [vmem:[#allocation78_spill] sm:$0xff]  ;;  %v146_v39 = vsub.f32 %v129_v14, %v138_v4  ;;  %vm1379_vm9 = vcmp.eq.s32.totalorder %v12724_v29, %v9984_v30  ;;  %v12728_v17 = vld [vmem:[#allocation83_spill] sm:$0xff] }
 0x193   :  { %6480 = vmatprep.subr.msk.mxu1 %vm1395_vm6, %v12484_v63  ;;  %vm1123_vm3 = vcmp.eq.s32.totalorder %v12723_v47, %v9984_v30  ;;  %6417 = vmatpush1.msk.msra.mxu0 %vm1138_vm0, %v12484_v63  ;;  %v177_v55 = vmul.f32 %v4750_v31, %v12719_v34  ;;  %vm1122_vm4 = vcmp.eq.s32.totalorder %v12723_v47, %v9996_v19  ;;  %v12725_v34 = vld [vmem:[#allocation80_spill] sm:$0xff] }
 0x194   :  { %6481 = vmatpush1.msk.msra.mxu1 %vm1394_vm10, %v12484_v63  ;;  %6418 = vmatprep.subr.msk.mxu0 %vm1131_vm15, %v12484_v63  ;;  %vm1378_vm14 = vcmp.eq.s32.totalorder %v12724_v29, %v9996_v19  ;;  %v145_v4 = vsub.f32 %v128_v38, %v137_v0  ;;  %vm1115_vm12 = vcmp.eq.s32.totalorder %v12725_v34, %v9984_v30  ;;  %v10558_v0 = vadd.f32 15.5, %v146_v39  ;;  %v12730_v39 = vld [vmem:[#allocation85_spill] sm:$0xff]  ;;  %v12739_v29 = vld [vmem:[#allocation94_spill] sm:$0xff] }
 0x195   :  { %6482 = vmatprep.subr.msk.mxu1 %vm1387_vm5, %v12484_v63  ;;  %6419 = vmatpush1.msk.msra.mxu0 %vm1130_vm1, %v12484_v63  ;;  %vm1371_vm13 = vcmp.eq.s32.totalorder %v12726_v56, %v9984_v30  ;;  %v186_v14 = vadd.f32 %v178_v40, %v170_v35  ;;  %vm1114_vm2 = vcmp.eq.s32.totalorder %v12725_v34, %v9996_v19  ;;  %v12727_v40 = vld [vmem:[#allocation82_spill] sm:$0xff]  ;;  %v12729_v35 = vld [vmem:[#allocation84_spill] sm:$0xff] }
 0x196   :  { %6483 = vmatpush1.msk.msra.mxu1 %vm1386_vm8, %v12484_v63  ;;  %6420 = vmatprep.subr.msk.mxu0 %vm1123_vm3, %v12484_v63  ;;  %vm1370_vm7 = vcmp.eq.s32.totalorder %v12726_v56, %v9996_v19  ;;  %vm1107_vm11 = vcmp.eq.s32.totalorder %v12727_v40, %v9984_v30  ;;  %vm1363_vm6 = vcmp.eq.s32.totalorder %v12728_v17, %v9984_v30  ;;  %v10572_v38 = vadd.f32 15.5, %v145_v4  ;;  %v12731_v4 = vld [vmem:[#allocation86_spill] sm:$0xff]  ;;  %v12736_v56 = vld [vmem:[#allocation91_spill] sm:$0xff] }
 0x197   :  { %6484 = vmatprep.subr.msk.mxu1 %vm1379_vm9, %v12484_v63  ;;  %6421 = vmatpush1.msk.msra.mxu0 %vm1122_vm4, %v12484_v63  ;;  %v185_v31 = vadd.f32 %v177_v55, %v169_v24  ;;  %vm1106_vm0 = vcmp.eq.s32.totalorder %v12727_v40, %v9996_v19  ;;  %vm1362_vm10 = vcmp.eq.s32.totalorder %v12728_v17, %v9996_v19  ;;  %v10580_v24 = vadd.f32 15.5, %v186_v14  ;;  %v12732_v14 = vld [vmem:[#allocation87_spill] sm:$0xff] }
 0x198   :  { %6485 = vmatpush1.msk.msra.mxu1 %vm1378_vm14, %v12484_v63  ;;  %6422 = vmatprep.subr.msk.mxu0 %vm1115_vm12, %v12484_v63  ;;  %vm1099_vm15 = vcmp.eq.s32.totalorder %v12729_v35, %v9984_v30  ;;  %vm1355_vm5 = vcmp.eq.s32.totalorder %v12730_v39, %v9984_v30  ;;  %vm1098_vm1 = vcmp.eq.s32.totalorder %v12729_v35, %v9996_v19  ;;  %v6858_v55 = vcvt.f32.s32 %v10558_v0  ;;  %v12733_v35 = vld [vmem:[#allocation88_spill] sm:$0xff] }
 0x199   :  { %6486 = vmatprep.subr.msk.mxu1 %vm1371_vm13, %v12484_v63  ;;  %6423 = vmatpush1.msk.msra.mxu0 %vm1114_vm2, %v12484_v63  ;;  %vm1354_vm8 = vcmp.eq.s32.totalorder %v12730_v39, %v9996_v19  ;;  %vm1091_vm3 = vcmp.eq.s32.totalorder %v12731_v4, %v9984_v30  ;;  %vm1347_vm9 = vcmp.eq.s32.totalorder %v12732_v14, %v9984_v30  ;;  %v10595_v17 = vadd.f32 15.5, %v185_v31  ;;  %v12734_v31 = vld [vmem:[#allocation89_spill] sm:$0xff] }
 0x19a   :  { %6487 = vmatpush1.msk.msra.mxu1 %vm1370_vm7, %v12484_v63  ;;  %6424 = vmatprep.subr.msk.mxu0 %vm1107_vm11, %v12484_v63  ;;  %vm1090_vm4 = vcmp.eq.s32.totalorder %v12731_v4, %v9996_v19  ;;  %vm1346_vm14 = vcmp.eq.s32.totalorder %v12732_v14, %v9996_v19  ;;  %v6850_v39 = vcvt.f32.s32 %v10572_v38  ;;  %vm1083_vm12 = vcmp.eq.s32.totalorder %v12733_v35, %v9984_v30  ;;  %v12735_v4 = vld [vmem:[#allocation90_spill] sm:$0xff] }
 0x19b   :  { %6488 = vmatprep.subr.msk.mxu1 %vm1363_vm6, %v12484_v63  ;;  %6425 = vmatpush1.msk.msra.mxu0 %vm1106_vm0, %v12484_v63  ;;  %vm1339_vm13 = vcmp.eq.s32.totalorder %v12734_v31, %v9984_v30  ;;  %v6922_v40 = vcvt.f32.s32 %v10580_v24  ;;  %vm1082_vm2 = vcmp.eq.s32.totalorder %v12733_v35, %v9996_v19  ;;  %vm1338_vm7 = vcmp.eq.s32.totalorder %v12734_v31, %v9996_v19  ;;  %v12738_v31 = vld [vmem:[#allocation93_spill] sm:$0xff] }
 0x19c   :  { %6489 = vmatpush1.msk.msra.mxu1 %vm1362_vm10, %v12484_v63  ;;  %6426 = vmatprep.subr.msk.mxu0 %vm1099_vm15, %v12484_v63  ;;  %v6859_v14 = vcvt.s32.f32 %v6858_v55  ;;  %vm1075_vm11 = vcmp.eq.s32.totalorder %v12735_v4, %v9984_v30  ;;  %vm1331_vm6 = vcmp.eq.s32.totalorder %v12736_v56, %v9984_v30  ;;  %vm1074_vm0 = vcmp.eq.s32.totalorder %v12735_v4, %v9996_v19  ;;  %v12737_v55 = vld [vmem:[#allocation92_spill] sm:$0xff] }
 0x19d   :  { %6490 = vmatprep.subr.msk.mxu1 %vm1355_vm5, %v12484_v63  ;;  %6427 = vmatpush1.msk.msra.mxu0 %vm1098_vm1, %v12484_v63  ;;  %v6914_v34 = vcvt.f32.s32 %v10595_v17  ;;  %vm1330_vm10 = vcmp.eq.s32.totalorder %v12736_v56, %v9996_v19  ;;  %vm1067_vm15 = vcmp.eq.s32.totalorder %v12737_v55, %v9984_v30  ;;  %vm1323_vm5 = vcmp.eq.s32.totalorder %v12738_v31, %v9984_v30 }
 0x19e   :  { %6491 = vmatpush1.msk.msra.mxu1 %vm1354_vm8, %v12484_v63  ;;  %6428 = vmatprep.subr.msk.mxu0 %vm1091_vm3, %v12484_v63  ;;  %v6851_v35 = vcvt.s32.f32 %v6850_v39  ;;  %vm1066_vm1 = vcmp.eq.s32.totalorder %v12737_v55, %v9996_v19  ;;  %vm1322_vm8 = vcmp.eq.s32.totalorder %v12738_v31, %v9996_v19  ;;  %vm1059_vm3 = vcmp.eq.s32.totalorder %v12739_v29, %v9984_v30  ;;  %v12740_v39 = vld [vmem:[#allocation95_spill] sm:$0xff] }
 0x19f   :  { %6492 = vmatprep.subr.msk.mxu1 %vm1347_vm9, %v12484_v63  ;;  %6429 = vmatpush1.msk.msra.mxu0 %vm1090_vm4, %v12484_v63  ;;  %v6923_v47 = vcvt.s32.f32 %v6922_v40  ;;  %vm1315_vm9 = vcmp.eq.s32.totalorder %v12740_v39, %v9984_v30  ;;  %vm1058_vm4 = vcmp.eq.s32.totalorder %v12739_v29, %v9996_v19  ;;  %v6860_v53 = vand.u32 2147483647, %v6859_v14  ;;  %v12783_v55 = vld [vmem:[#allocation19_spill] sm:$0xff] }
 0x1a0   :  { %6493 = vmatpush1.msk.msra.mxu1 %vm1346_vm14, %v12484_v63  ;;  %6430 = vmatprep.subr.msk.mxu0 %vm1083_vm12, %v12484_v63  ;;  %v6861_v37 = vand.u32 2147483648, %v10558_v0  ;;  %vm1314_vm14 = vcmp.eq.s32.totalorder %v12740_v39, %v9996_v19  ;;  %vm1051_vm12 = vcmp.eq.s32.totalorder %v12605_v3, %v9984_v30  ;;  %v6856_v40 = vand.u32 2147483647, %v10558_v0 }
 0x1a1   :  { %6494 = vmatprep.subr.msk.mxu1 %vm1339_vm13, %v12484_v63  ;;  %6431 = vmatpush1.msk.msra.mxu0 %vm1082_vm2, %v12484_v63  ;;  %v6915_v14 = vcvt.s32.f32 %v6914_v34  ;;  %vm1307_vm13 = vcmp.eq.s32.totalorder %v12606_v26, %v9984_v30  ;;  %vm1050_vm2 = vcmp.eq.s32.totalorder %v12605_v3, %v9996_v19  ;;  %v6852_v56 = vand.u32 2147483647, %v6851_v35 }
 0x1a2   :  { %6495 = vmatpush1.msk.msra.mxu1 %vm1338_vm7, %v12484_v63  ;;  %6432 = vmatprep.subr.msk.mxu0 %vm1075_vm11, %v12484_v63  ;;  %v6853_v4 = vand.u32 2147483648, %v10572_v38  ;;  %vm1306_vm7 = vcmp.eq.s32.totalorder %v12606_v26, %v9996_v19  ;;  %v6924_v34 = vand.u32 2147483647, %v6923_v47  ;;  %v6925_v9 = vand.u32 2147483648, %v10580_v24 }
 0x1a3   :  { %6496 = vmatprep.subr.msk.mxu1 %vm1331_vm6, %v12484_v63  ;;  %6433 = vmatpush1.msk.msra.mxu0 %vm1074_vm0, %v12484_v63  ;;  %v6848_v35 = vand.u32 2147483647, %v10572_v38  ;;  %vm1043_vm11 = vcmp.eq.s32.totalorder %v7816_v36, %v9984_v30  ;;  %vm1299_vm6 = vcmp.eq.s32.totalorder %v12607_v13, %v9984_v30  ;;  %v6862_v47 = vor.u32 %v6861_v37, %v6860_v53 }
 0x1a4   :  { %6497 = vmatpush1.msk.msra.mxu1 %vm1330_vm10, %v12484_v63  ;;  %6434 = vmatprep.subr.msk.mxu0 %vm1067_vm15, %v12484_v63  ;;  %v6920_v31 = vand.u32 2147483647, %v10580_v24  ;;  %vm1042_vm0 = vcmp.eq.s32.totalorder %v7816_v36, %v9996_v19  ;;  %vm10716_vm10 = vcmp.lt.f32.partialorder %v6856_v40, 8388608.0  ;;  %v6916_v37 = vand.u32 2147483647, %v6915_v14 }
 0x1a5   :  { %6498 = vmatprep.subr.msk.mxu1 %vm1323_vm5, %v12484_v63  ;;  %6435 = vmatpush1.msk.msra.mxu0 %vm1066_vm1, %v12484_v63  ;;  %v6917_v53 = vand.u32 2147483648, %v10595_v17  ;;  %vm1298_vm15 = vcmp.eq.s32.totalorder %v12607_v13, %v9996_v19  ;;  %vm1035_vm5 = vcmp.eq.s32.totalorder %v12610_v23, %v9984_v30  ;;  %v6854_v40 = vor.u32 %v6853_v4, %v6852_v56 }
 0x1a6   :  { %6499 = vmatpush1.msk.msra.mxu1 %vm1322_vm8, %v12484_v63  ;;  %6436 = vmatprep.subr.msk.mxu0 %vm1059_vm3, %v12484_v63  ;;  %v6912_v14 = vand.u32 2147483647, %v10595_v17  ;;  %vm1291_vm1 = vcmp.eq.s32.totalorder %v12611_v25, %v9984_v30  ;;  %vm1034_vm8 = vcmp.eq.s32.totalorder %v12610_v23, %v9996_v19  ;;  %v6926_v39 = vor.u32 %v6925_v9, %v6924_v34 }
 0x1a7   :  { %6500 = vmatprep.subr.msk.mxu1 %vm1315_vm9, %v12484_v63  ;;  %6437 = vmatpush1.msk.msra.mxu0 %vm1058_vm4, %v12484_v63  ;;  %vm10746_vm3 = vcmp.lt.f32.partialorder %v6848_v35, 8388608.0  ;;  %vm1290_vm9 = vcmp.eq.s32.totalorder %v12611_v25, %v9996_v19  ;;  %vm1027_vm4 = vcmp.eq.s32.totalorder %v12614_v1, %v9984_v30  ;;  %v6863_v9 = vsel %vm10716_vm10, %v6862_v47, %v10558_v0 }
 0x1a8   :  { %6501 = vmatpush1.msk.msra.mxu1 %vm1314_vm14, %v12484_v63  ;;  %6438 = vmatprep.subr.msk.mxu0 %vm1051_vm12, %v12484_v63  ;;  %vm6921_vm14 = vcmp.lt.f32.partialorder %v6920_v31, 8388608.0  ;;  %vm1283_vm12 = vcmp.eq.s32.totalorder %v12615_v10, %v9984_v30  ;;  %v6918_v4 = vor.u32 %v6917_v53, %v6916_v37  ;;  %v6855_v0 = vsel %vm10746_vm3, %v6854_v40, %v10572_v38  ;;  %v12773_v37 = vld [vmem:[#allocation106_spill] sm:$0xff]  ;;  %v12774_v53 = vld [vmem:[#allocation107_spill] sm:$0xff] }
 0x1a9   :  { %6502 = vmatprep.subr.msk.mxu1 %vm1307_vm13, %v12484_v63  ;;  %6439 = vmatpush1.msk.msra.mxu0 %vm1050_vm2, %v12484_v63  ;;  %vm1026_vm13 = vcmp.eq.s32.totalorder %v12614_v1, %v9996_v19  ;;  %vm1282_vm2 = vcmp.eq.s32.totalorder %v12615_v10, %v9996_v19  ;;  %v6927_v31 = vsel %vm6921_vm14, %v6926_v39, %v10580_v24  ;;  %vm218_vm10 = vcmp.le.f32.partialorder %v6863_v9, 31.0 }
 0x1aa   :  { %6503 = vmatpush1.msk.msra.mxu1 %vm1306_vm7, %v12484_v63  ;;  %6440 = vmatprep.subr.msk.mxu0 %vm1043_vm11, %v12484_v63  ;;  %vm1019_vm7 = vcmp.eq.s32.totalorder %v12616_v18, %v9984_v30  ;;  %vm6913_vm11 = vcmp.lt.f32.partialorder %v6912_v14, 8388608.0  ;;  %vm209_vm3 = vcmp.ge.f32.partialorder %v6855_v0, 0.0  ;;  %vm1522_vm14 = vcmp.eq.s32.totalorder %v12618_v22, %v9996_v19  ;;  %v12776_v14 = vld [vmem:[#allocation12_spill] sm:$0xff] }
 0x1ab   :  { %6504 = vmatprep.subr.msk.mxu1 %vm1299_vm6, %v12484_v63  ;;  %6441 = vmatpush1.msk.msra.mxu0 %vm1042_vm0, %v12484_v63  ;;  %vm1275_vm6 = vcmp.eq.s32.totalorder %v12617_v15, %v9984_v30  ;;  %vm210_vm0 = vcmp.ge.f32.partialorder %v6863_v9, 0.0  ;;  %v10828_v38 = vsel %vm6913_vm11, %v6918_v4, %v10595_v17  ;;  %vm1258_vm11 = vcmp.eq.s32.totalorder %v7940_v45, %v9996_v19  ;;  %v12778_v4 = vld [vmem:[#allocation14_spill] sm:$0xff]  ;;  %v12781_v17 = vld [vmem:[#allocation17_spill] sm:$0xff] }
 0x1ac   :  { %6505 = vmatpush1.msk.msra.mxu1 %vm1298_vm15, %v12484_v63  ;;  %6442 = vmatprep.subr.msk.mxu0 %vm1035_vm5, %v12484_v63  ;;  %vm1018_vm15 = vcmp.eq.s32.totalorder %v12616_v18, %v9996_v19  ;;  %vm1274_vm5 = vcmp.eq.s32.totalorder %v12617_v15, %v9996_v19  ;;  %v10864_v24 = vadd.f32 %v6863_v9, %v7035_v5  ;;  %v12777_v9 = vld [vmem:[#allocation13_spill] sm:$0xff] }
 0x1ad   :  { %6506 = vmatprep.subr.msk.mxu1 %vm1291_vm1, %v12484_v63  ;;  %6443 = vmatpush1.msk.msra.mxu0 %vm1034_vm8, %v12484_v63  ;;  %vm1267_vm1 = vcmp.eq.s32.totalorder %v7923_v2, %v9984_v30  ;;  %vm1523_vm8 = vcmp.eq.s32.totalorder %v12618_v22, %v9984_v30  ;;  %v10893_v34 = vadd.f32 %v6855_v0, %v7035_v5 }
 0x1ae   :  { %6507 = vmatpush1.msk.msra.mxu1 %vm1290_vm9, %v12484_v63  ;;  %6444 = vmatprep.subr.msk.mxu0 %vm1027_vm4, %v12484_v63  ;;  %vm217_vm9 = vcmp.le.f32.partialorder %v6855_v0, 31.0  ;;  %vm1266_vm4 = vcmp.eq.s32.totalorder %v7923_v2, %v9996_v19  ;;  %v276_v47 = vadd.f32 %v6927_v31, %v7037_v7  ;;  %v275_v40 = vadd.f32 %v10828_v38, %v7037_v7  ;;  %v6958_v7 = vld [vmem:[%s12014_s1 + $0x28] sm:$0x3f] }
 0x1af   :  { %6508 = vmatprep.subr.msk.mxu1 %vm1283_vm12, %v12484_v63  ;;  %6445 = vmatpush1.msk.msra.mxu0 %vm1026_vm13, %v12484_v63  ;;  %vm10844_vm12 = vmand %vm210_vm0, %vm218_vm10  ;;  %vm234_vm13 = vcmp.ge.f32.partialorder %v6927_v31, 0.0  ;;  %vm233_vm10 = vcmp.ge.f32.partialorder %v10828_v38, 0.0  ;;  %v348_v56 = vmul.f32 32.0, %v10864_v24  ;;  %v347_v0 = vmul.f32 32.0, %v10893_v34 }
 0x1b0   :  { %6509 = vmatpush1.msk.msra.mxu1 %vm1282_vm2, %v12484_v63  ;;  %6446 = vmatprep.subr.msk.mxu0 %vm1019_vm7, %v12484_v63  ;;  %vm1259_vm2 = vcmp.eq.s32.totalorder %v7940_v45, %v9984_v30  ;;  %vm1515_vm7 = vcmp.eq.s32.totalorder %v7943_v44, %v9984_v30  ;;  %vm10868_vm0 = vmand %vm209_vm3, %vm217_vm9  ;;  %vm1250_vm3 = vcmp.eq.s32.totalorder %v7946_v43, %v9996_v19 }
 0x1b1   :  { %6510 = vmatprep.subr.msk.mxu1 %vm1275_vm6, %v12484_v63  ;;  %6447 = vmatpush1.msk.msra.mxu0 %vm1018_vm15, %v12484_v63  ;;  %vm1514_vm6 = vcmp.eq.s32.totalorder %v7943_v44, %v9996_v19  ;;  %vm1251_vm15 = vcmp.eq.s32.totalorder %v7946_v43, %v9984_v30  ;;  %vm1506_vm9 = vcmp.eq.s32.totalorder %v7949_v12, %v9996_v19 }
 0x1b2   :  { %6511 = vmatpush1.msk.msra.mxu1 %vm1274_vm5, %v12484_v63  ;;  %6448 = vmatprep.subr.msk.mxu0 %vm1267_vm1, %v12484_v63  ;;  %vm1507_vm5 = vcmp.eq.s32.totalorder %v7949_v12, %v9984_v30  ;;  %vm10882_vm1 = vmand %vm10844_vm12, %vm234_vm13  ;;  %vm249_vm13 = vcmp.le.f32.partialorder %v10828_v38, 31.0  ;;  %v12780_v38 = vld [vmem:[#allocation16_spill] sm:$0xff] }
 0x1b3   :  { %6512 = vmatprep.subr.msk.mxu1 %vm1523_vm8, %v12484_v63  ;;  %6449 = vmatpush2.msk.msra.mxu0 %vm1266_vm4, %v12484_v63  ;;  %vm250_vm8 = vcmp.le.f32.partialorder %v6927_v31, 31.0  ;;  %vm1243_vm4 = vcmp.eq.s32.totalorder %v7990_v32, %v9984_v30  ;;  %vm10911_vm12 = vmand %vm10868_vm0, %vm233_vm10  ;;  %vm1235_vm0 = vcmp.eq.s32.totalorder %v8056_v41, %v9984_v30  ;;  %vm1491_vm10 = vcmp.eq.s32.totalorder %v8073_v11, %v9984_v30 }
 0x1b4   :  { %6513 = vmatpush2.msk.msra.mxu1 %vm1522_vm14, %v12484_v63  ;;  %6450 = vmatprep.subr.msk.mxu0 %vm1259_vm2, %v12484_v63  ;;  %vm1499_vm14 = vcmp.eq.s32.totalorder %v8007_v46, %v9984_v30  ;;  %vm1242_vm2 = vcmp.eq.s32.totalorder %v7990_v32, %v9996_v19  ;;  %v356_v31 = vadd.f32 %v348_v56, %v276_v47  ;;  %v6960_v56 = vld [vmem:[%s12014_s1 + $0x38] sm:$0x3f] }
 0x1b5   :  { %6514 = vmatprep.subr.msk.mxu1 %vm1515_vm7, %v12484_v63  ;;  %6451 = vmatpush2.msk.msra.mxu0 %vm1258_vm11, %v12484_v63  ;;  %vm1498_vm7 = vcmp.eq.s32.totalorder %v8007_v46, %v9996_v19  ;;  %vm10925_vm11 = vmand %vm10882_vm1, %vm250_vm8  ;;  %vm283_vm8 = vcmp.ge.f32.partialorder %v10893_v34, 0.0 }
 0x1b6   :  { %6515 = vmatpush2.msk.msra.mxu1 %vm1514_vm6, %v12484_v63  ;;  %6452 = vmatprep.subr.msk.mxu0 %vm1251_vm15, %v12484_v63  ;;  %vm284_vm6 = vcmp.ge.f32.partialorder %v10864_v24, 0.0  ;;  %vm1234_vm15 = vcmp.eq.s32.totalorder %v8056_v41, %v9996_v19  ;;  %vm10947_vm1 = vmand %vm10911_vm12, %vm249_vm13  ;;  %vm1226_vm12 = vcmp.eq.s32.totalorder %v8120_v42, %v9996_v19  ;;  %vm1482_vm13 = vcmp.eq.s32.totalorder %v8137_v59, %v9996_v19 }
 0x1b7   :  { %6516 = vmatprep.subr.msk.mxu1 %vm1507_vm5, %v12484_v63  ;;  %6453 = vmatpush2.msk.msra.mxu0 %vm1250_vm3, %v12484_v63  ;;  %vm1490_vm5 = vcmp.eq.s32.totalorder %v8073_v11, %v9996_v19  ;;  %vm1227_vm3 = vcmp.eq.s32.totalorder %v8120_v42, %v9984_v30 }
 0x1b8   :  { %6517 = vmatpush2.msk.msra.mxu1 %vm1506_vm9, %v12484_v63  ;;  %6454 = vmatprep.subr.msk.mxu0 %vm1243_vm4, %v12484_v63  ;;  %vm1483_vm9 = vcmp.eq.s32.totalorder %v8137_v59, %v9984_v30  ;;  %vm10962_vm4 = vmand %vm10925_vm11, %vm284_vm6  ;;  %vm299_vm6 = vcmp.le.f32.partialorder %v10893_v34, 31.0 }
 0x1b9   :  { %6518 = vmatprep.subr.msk.mxu1 %vm1499_vm14, %v12484_v63  ;;  %6455 = vmatpush2.msk.msra.mxu0 %vm1242_vm2, %v12484_v63  ;;  %vm300_vm14 = vcmp.le.f32.partialorder %v10864_v24, 31.0  ;;  %vm1219_vm2 = vcmp.eq.s32.totalorder %v8182_v20, %v9984_v30  ;;  %vm10991_vm11 = vmand %vm10947_vm1, %vm283_vm8  ;;  %vm1211_vm1 = vcmp.eq.s32.totalorder %v8214_v58, %v9984_v30  ;;  %vm1467_vm8 = vcmp.eq.s32.totalorder %v8231_v21, %v9984_v30 }
 0x1ba   :  { %6519 = vmatpush2.msk.msra.mxu1 %vm1498_vm7, %v12484_v63  ;;  %6456 = vmatprep.subr.msk.mxu0 %vm1235_vm0, %v12484_v63  ;;  %vm1475_vm7 = vcmp.eq.s32.totalorder %v8199_v57, %v9984_v30  ;;  %vm1218_vm0 = vcmp.eq.s32.totalorder %v8182_v20, %v9996_v19  ;;  %v355_v24 = vadd.f32 %v347_v0, %v275_v40  ;;  %v6961_v0 = vld [vmem:[%s12014_s1 + $0x30] sm:$0x3f] }
 0x1bb   :  { %6520 = vmatprep.subr.msk.mxu1 %vm1491_vm10, %v12484_v63  ;;  %6457 = vmatpush2.msk.msra.mxu0 %vm1234_vm15, %v12484_v63  ;;  %vm1474_vm10 = vcmp.eq.s32.totalorder %v8199_v57, %v9996_v19  ;;  %vm11006_vm15 = vmand %vm10962_vm4, %vm300_vm14  ;;  %vm315_vm14 = vcmp.ge.f32.partialorder %v275_v40, 0.0 }
 0x1bc   :  { %6521 = vmatpush2.msk.msra.mxu1 %vm1490_vm5, %v12484_v63  ;;  %6458 = vmatprep.subr.msk.mxu0 %vm1227_vm3, %v12484_v63  ;;  %vm316_vm5 = vcmp.ge.f32.partialorder %v276_v47, 0.0  ;;  %vm1210_vm3 = vcmp.eq.s32.totalorder %v8214_v58, %v9996_v19  ;;  %vm11027_vm4 = vmand %vm10991_vm11, %vm299_vm6  ;;  %vm1202_vm11 = vcmp.eq.s32.totalorder %v8274_v61, %v9996_v19  ;;  %vm1458_vm6 = vcmp.eq.s32.totalorder %v8290_v60, %v9996_v19 }
 0x1bd   :  { %6522 = vmatprep.subr.msk.mxu1 %vm1483_vm9, %v12484_v63  ;;  %6459 = vmatpush2.msk.msra.mxu0 %vm1226_vm12, %v12484_v63  ;;  %vm1466_vm9 = vcmp.eq.s32.totalorder %v8231_v21, %v9996_v19  ;;  %vm1203_vm12 = vcmp.eq.s32.totalorder %v8274_v61, %v9984_v30 }
 0x1be   :  { %6523 = vmatpush2.msk.msra.mxu1 %vm1482_vm13, %v12484_v63  ;;  %6460 = vmatprep.subr.msk.mxu0 %vm1219_vm2, %v12484_v63  ;;  %vm1459_vm13 = vcmp.eq.s32.totalorder %v8290_v60, %v9984_v30  ;;  %vm11040_vm2 = vmand %vm11006_vm15, %vm316_vm5  ;;  %vm331_vm5 = vcmp.le.f32.partialorder %v275_v40, 31.0 }
 0x1bf   :  { %6524 = vmatprep.subr.msk.mxu1 %vm1475_vm7, %v12484_v63  ;;  %6461 = vmatpush2.msk.msra.mxu0 %vm1218_vm0, %v12484_v63  ;;  %vm332_vm7 = vcmp.le.f32.partialorder %v276_v47, 31.0  ;;  %vm1195_vm0 = vcmp.eq.s32.totalorder %v8334_v16, %v9984_v30  ;;  %vm11066_vm15 = vmand %vm11027_vm4, %vm315_vm14  ;;  %vm1443_vm4 = vcmp.eq.s32.totalorder %v8381_v51, %v9984_v30  ;;  %vm1186_vm14 = vcmp.eq.s32.totalorder %v8368_v27, %v9996_v19 }
 0x1c0   :  { %6525 = vmatpush2.msk.msra.mxu1 %vm1474_vm10, %v12484_v63  ;;  %6462 = vmatprep.subr.msk.mxu0 %vm1211_vm1, %v12484_v63  ;;  %vm1451_vm10 = vcmp.eq.s32.totalorder %v8351_v28, %v9984_v30  ;;  %vm1194_vm1 = vcmp.eq.s32.totalorder %v8334_v16, %v9996_v19 }
 0x1c1   :  { %6526 = vmatprep.subr.msk.mxu1 %vm1467_vm8, %v12484_v63  ;;  %6463 = vmatpush2.msk.msra.mxu0 %vm1210_vm3, %v12484_v63  ;;  %vm1450_vm8 = vcmp.eq.s32.totalorder %v8351_v28, %v9996_v19  ;;  %vm11085_vm3 = vmand %vm11040_vm2, %vm332_vm7  ;;  %vm1179_vm2 = vcmp.eq.s32.totalorder %v8654_v49, %v9984_v30  ;;  %vm1435_vm7 = vcmp.eq.s32.totalorder %v8684_v52, %v9984_v30 }
 0x1c2   :  { %6527 = vmatpush2.msk.msra.mxu1 %vm1466_vm9, %v12484_v63  ;;  %6464 = vmatprep.subr.msk.mxu0 %vm1203_vm12, %v12484_v63  ;;  %vm1187_vm9 = vcmp.eq.s32.totalorder %v8368_v27, %v9984_v30  ;;  %vm1442_vm12 = vcmp.eq.s32.totalorder %v8381_v51, %v9996_v19  ;;  %v364_v39 = vsel %vm11085_vm3, %v356_v31, -1.0  ;;  %vm1162_vm3 = vcmp.eq.s32.totalorder %v8746_v48, %v9996_v19  ;;  %v12779_v31 = vld [vmem:[#allocation15_spill] sm:$0xff] }
 0x1c3   :  { %6528 = vmatprep.subr.msk.mxu1 %vm1459_vm13, %v12484_v63  ;;  %6465 = vmatpush2.msk.msra.mxu0 %vm1202_vm11, %v12484_v63  ;;  %vm11104_vm13 = vmand %vm11066_vm15, %vm331_vm5  ;;  %vm1178_vm11 = vcmp.eq.s32.totalorder %v8654_v49, %v9996_v19  ;;  %vm1170_vm15 = vcmp.eq.s32.totalorder %v8714_v8, %v9996_v19  ;;  %vm1426_vm5 = vcmp.eq.s32.totalorder %v8730_v6, %v9996_v19  ;;  %v6942_v5 = vtrunc.f32 %v364_v39  ;;  %v12784_v39 = vld [vmem:[#allocation20_spill] sm:$0xff] }
 0x1c4   :  { %6529 = vmatpush2.msk.msra.mxu1 %vm1458_vm6, %v12484_v63  ;;  %6466 = vmatprep.subr.msk.mxu0 %vm1195_vm0, %v12484_v63  ;;  %vm1434_vm6 = vcmp.eq.s32.totalorder %v8684_v52, %v9996_v19  ;;  %vm1171_vm0 = vcmp.eq.s32.totalorder %v8714_v8, %v9984_v30  ;;  %v363_v34 = vsel %vm11104_vm13, %v355_v24, -1.0  ;;  %vm1410_vm13 = vcmp.eq.s32.totalorder %v8792_v54, %v9996_v19  ;;  %v12782_v24 = vld [vmem:[#allocation18_spill] sm:$0xff] }
 0x1c5   :  { %6530 = vmatprep.subr.msk.mxu1 %vm1451_vm10, %v12484_v63  ;;  %6467 = vmatpush2.msk.msra.mxu0 %vm1194_vm1, %v12484_v63  ;;  %vm1427_vm10 = vcmp.eq.s32.totalorder %v8730_v6, %v9984_v30  ;;  %vm1163_vm1 = vcmp.eq.s32.totalorder %v8746_v48, %v9984_v30  ;;  %v6940_v35 = vtrunc.f32 %v363_v34  ;;  %v11160_v47 = vcvt.f32.s32 %v6942_v5  ;;  %v12785_v34 = vld [vmem:[#allocation21_spill] sm:$0xff]  ;;  %v12786_v5 = vld [vmem:[#allocation22_spill] sm:$0xff] }
 0x1c6   :  { %6531 = vmatpush2.msk.msra.mxu1 %vm1450_vm8, %v12484_v63  ;;  %6468 = vmatprep.subr.msk.mxu0 %vm1187_vm9, %v12484_v63  ;;  %vm1419_vm8 = vcmp.eq.s32.totalorder %v8766_v33, %v9984_v30  ;;  %vm1418_vm9 = vcmp.eq.s32.totalorder %v8766_v33, %v9996_v19 }
 0x1c7   :  { %6532 = vmatprep.subr.msk.mxu1 %vm1443_vm4, %v12484_v63  ;;  %6469 = vmatpush2.msk.msra.mxu0 %vm1186_vm14, %v12484_v63  ;;  %vm1155_vm4 = vcmp.eq.s32.totalorder %v8783_v50, %v9984_v30  ;;  %vm1411_vm14 = vcmp.eq.s32.totalorder %v8792_v54, %v9984_v30  ;;  %v11172_v40 = vcvt.f32.s32 %v6940_v35  ;;  %v12787_v35 = vld [vmem:[#allocation23_spill] sm:$0xff] }
 0x1c8   :  { %6533 = vmatpush2.msk.msra.mxu1 %vm1442_vm12, %v12484_v63  ;;  %6470 = vmatprep.subr.msk.mxu0 %vm1179_vm2, %v12484_v63  ;;  %vm1154_vm12 = vcmp.eq.s32.totalorder %v8783_v50, %v9996_v19  ;;  %vm1147_vm2 = vcmp.eq.s32.totalorder %v12773_v37, %v9984_v30 }
 0x1c9   :  { %6534 = vmatprep.subr.msk.mxu1 %vm1435_vm7, %v12484_v63  ;;  %6471 = vmatpush2.msk.msra.mxu0 %vm1178_vm11, %v12484_v63  ;;  %vm1403_vm7 = vcmp.eq.s32.totalorder %v12774_v53, %v9984_v30  ;;  %vm1146_vm11 = vcmp.eq.s32.totalorder %v12773_v37, %v9996_v19  ;;  %v12775_v30 = vld [vmem:[#allocation11_spill] sm:$0xff] }
 0x1ca   :  { %6535 = vmatpush2.msk.msra.mxu1 %vm1434_vm6, %v12484_v63  ;;  %6472 = vmatprep.subr.msk.mxu0 %vm1171_vm0, %v12484_v63  ;;  %vm1402_vm6 = vcmp.eq.s32.totalorder %v12774_v53, %v9996_v19  ;;  %vm629_vm0 = vcmp.eq.s32.totalorder %v12775_v30, %v11160_v47  ;;  %v6959_v19 = vld [vmem:[%s12014_s1 + $0x20] sm:$0x3f] }
 0x1cb   :  { %6536 = vmatprep.subr.msk.mxu1 %vm1427_vm10, %v12484_v63  ;;  %6473 = vmatpush2.msk.msra.mxu0 %vm1170_vm15, %v12484_v63  ;;  %vm885_vm10 = vcmp.eq.s32.totalorder %v12776_v14, %v11160_v47  ;;  %vm628_vm15 = vcmp.eq.s32.totalorder %v12775_v30, %v11172_v40  ;;  %v12788_v30 = vld [vmem:[#allocation24_spill] sm:$0xff] }
 0x1cc   :  { %6537 = vmatpush2.msk.msra.mxu1 %vm1426_vm5, %v12484_v63  ;;  %6474 = vmatprep.subr.msk.mxu0 %vm1163_vm1, %v12484_v63  ;;  %vm884_vm5 = vcmp.eq.s32.totalorder %v12776_v14, %v11172_v40  ;;  %vm621_vm1 = vcmp.eq.s32.totalorder %v12777_v9, %v11160_v47  ;;  %v12790_v14 = vld [vmem:[#allocation26_spill] sm:$0xff] }
 0x1cd   :  { %6538 = vmatprep.subr.msk.mxu1 %vm1419_vm8, %v12484_v63  ;;  %6475 = vmatpush2.msk.msra.mxu0 %vm1162_vm3, %v12484_v63  ;;  %vm877_vm8 = vcmp.eq.s32.totalorder %v12778_v4, %v11160_v47  ;;  %vm620_vm3 = vcmp.eq.s32.totalorder %v12777_v9, %v11172_v40  ;;  %v12793_v9 = vld [vmem:[#allocation29_spill] sm:$0xff] }
 0x1ce   :  { %6539 = vmatpush2.msk.msra.mxu1 %vm1418_vm9, %v12484_v63  ;;  %6476 = vmatprep.subr.msk.mxu0 %vm1155_vm4, %v12484_v63  ;;  %vm876_vm9 = vcmp.eq.s32.totalorder %v12778_v4, %v11172_v40  ;;  %vm613_vm4 = vcmp.eq.s32.totalorder %v12779_v31, %v11160_v47  ;;  %v12794_v4 = vld [vmem:[#allocation30_spill] sm:$0xff] }
 0x1cf   :  { %6540 = vmatprep.subr.msk.mxu1 %vm1411_vm14, %v12484_v63  ;;  %6477 = vmatpush2.msk.msra.mxu0 %vm1154_vm12, %v12484_v63  ;;  %vm869_vm14 = vcmp.eq.s32.totalorder %v12780_v38, %v11160_v47  ;;  %vm612_vm12 = vcmp.eq.s32.totalorder %v12779_v31, %v11172_v40  ;;  %v12796_v31 = vld [vmem:[#allocation32_spill] sm:$0xff] }
 0x1d0   :  { %6541 = vmatpush2.msk.msra.mxu1 %vm1410_vm13, %v12484_v63  ;;  %6478 = vmatprep.subr.msk.mxu0 %vm1147_vm2, %v12484_v63  ;;  %vm868_vm13 = vcmp.eq.s32.totalorder %v12780_v38, %v11172_v40  ;;  %vm605_vm2 = vcmp.eq.s32.totalorder %v12781_v17, %v11160_v47  ;;  %v12797_v38 = vld [vmem:[#allocation33_spill] sm:$0xff] }
 0x1d1   :  { %6542 = vmatprep.subr.msk.mxu1 %vm1403_vm7, %v12484_v63  ;;  %6479 = vmatpush2.msk.msra.mxu0 %vm1146_vm11, %v12484_v63  ;;  %vm861_vm7 = vcmp.eq.s32.totalorder %v12782_v24, %v11160_v47  ;;  %vm604_vm11 = vcmp.eq.s32.totalorder %v12781_v17, %v11172_v40  ;;  %v12798_v17 = vld [vmem:[#allocation34_spill] sm:$0xff] }
 0x1d2   :  { %4356 = vmatprep.mubr.f32.mxu0 %v6958_v7  ;;  %6543 = vmatpush2.msk.msra.mxu1 %vm1402_vm6, %v12484_v63  ;;  %vm860_vm6 = vcmp.eq.s32.totalorder %v12782_v24, %v11172_v40  ;;  %v12789_v7 = vld [vmem:[#allocation25_spill] sm:$0xff]  ;;  %v12799_v24 = vld [vmem:[#allocation35_spill] sm:$0xff] }
 0x1d3   :  { %4357 = vmatmul.mubr.f32.vlgmr.msra.gmra.mxu0 %v6959_v19  ;;  %4427 = vmatprep.mubr.f32.mxu1 %v6960_v56  ;;  %v12791_v19 = vld [vmem:[#allocation27_spill] sm:$0xff]  ;;  %v12792_v56 = vld [vmem:[#allocation28_spill] sm:$0xff] }
 0x1d4   :  { %6544 = vmatprep.subr.msk.mxu0 %vm629_vm0, %v12484_v63  ;;  %6608 = vmatprep.subr.msk.mxu1 %vm885_vm10, %v12484_v63  ;;  %vm597_vm0 = vcmp.eq.s32.totalorder %v12783_v55, %v11160_v47  ;;  %vm853_vm10 = vcmp.eq.s32.totalorder %v12784_v39, %v11160_v47 }
 0x1d5   :  { %4428 = vmatmul.mubr.f32.vlgmr.msra.gmra.mxu1 %v6961_v0  ;;  %6545 = vmatpush1.msk.msra.mxu0 %vm628_vm15, %v12484_v63  ;;  %vm596_vm15 = vcmp.eq.s32.totalorder %v12783_v55, %v11172_v40  ;;  %v12795_v0 = vld [vmem:[#allocation31_spill] sm:$0xff]  ;;  %v12800_v55 = vld [vmem:[#allocation36_spill] sm:$0xff] }
 0x1d6   :  { %6609 = vmatpush1.msk.msra.mxu1 %vm884_vm5, %v12484_v63  ;;  %6546 = vmatprep.subr.msk.mxu0 %vm621_vm1, %v12484_v63  ;;  %vm852_vm5 = vcmp.eq.s32.totalorder %v12784_v39, %v11172_v40  ;;  %vm589_vm1 = vcmp.eq.s32.totalorder %v12785_v34, %v11160_v47  ;;  %v12801_v39 = vld [vmem:[#allocation37_spill] sm:$0xff] }
 0x1d7   :  { %6610 = vmatprep.subr.msk.mxu1 %vm877_vm8, %v12484_v63  ;;  %6547 = vmatpush1.msk.msra.mxu0 %vm620_vm3, %v12484_v63  ;;  %vm845_vm8 = vcmp.eq.s32.totalorder %v12786_v5, %v11160_v47  ;;  %vm588_vm3 = vcmp.eq.s32.totalorder %v12785_v34, %v11172_v40  ;;  %v12802_v34 = vld [vmem:[#allocation38_spill] sm:$0xff] }
 0x1d8   :  { %6611 = vmatpush1.msk.msra.mxu1 %vm876_vm9, %v12484_v63  ;;  %6548 = vmatprep.subr.msk.mxu0 %vm613_vm4, %v12484_v63  ;;  %vm844_vm9 = vcmp.eq.s32.totalorder %v12786_v5, %v11172_v40  ;;  %vm581_vm4 = vcmp.eq.s32.totalorder %v12787_v35, %v11160_v47  ;;  %v12803_v5 = vld [vmem:[#allocation39_spill] sm:$0xff] }
 0x1d9   :  { %6612 = vmatprep.subr.msk.mxu1 %vm869_vm14, %v12484_v63  ;;  %6549 = vmatpush1.msk.msra.mxu0 %vm612_vm12, %v12484_v63  ;;  %vm837_vm14 = vcmp.eq.s32.totalorder %v12788_v30, %v11160_v47  ;;  %vm580_vm12 = vcmp.eq.s32.totalorder %v12787_v35, %v11172_v40  ;;  %v12804_v35 = vld [vmem:[#allocation40_spill] sm:$0xff] }
 0x1da   :  { %6613 = vmatpush1.msk.msra.mxu1 %vm868_vm13, %v12484_v63  ;;  %6550 = vmatprep.subr.msk.mxu0 %vm605_vm2, %v12484_v63  ;;  %vm836_vm13 = vcmp.eq.s32.totalorder %v12788_v30, %v11172_v40  ;;  %vm573_vm2 = vcmp.eq.s32.totalorder %v12789_v7, %v11160_v47  ;;  %v12805_v30 = vld [vmem:[#allocation10_spill] sm:$0xff] }
 0x1db   :  { %6614 = vmatprep.subr.msk.mxu1 %vm861_vm7, %v12484_v63  ;;  %6551 = vmatpush1.msk.msra.mxu0 %vm604_vm11, %v12484_v63  ;;  %vm829_vm7 = vcmp.eq.s32.totalorder %v12790_v14, %v11160_v47  ;;  %vm572_vm11 = vcmp.eq.s32.totalorder %v12789_v7, %v11172_v40  ;;  %v12806_v7 = vld [vmem:[#allocation41_spill] sm:$0xff] }
 0x1dc   :  { %6615 = vmatpush1.msk.msra.mxu1 %vm860_vm6, %v12484_v63  ;;  %6552 = vmatprep.subr.msk.mxu0 %vm597_vm0, %v12484_v63  ;;  %vm828_vm6 = vcmp.eq.s32.totalorder %v12790_v14, %v11172_v40  ;;  %vm565_vm0 = vcmp.eq.s32.totalorder %v12791_v19, %v11160_v47  ;;  %v12807_v14 = vld [vmem:[#allocation42_spill] sm:$0xff] }
 0x1dd   :  { %6616 = vmatprep.subr.msk.mxu1 %vm853_vm10, %v12484_v63  ;;  %6553 = vmatpush1.msk.msra.mxu0 %vm596_vm15, %v12484_v63  ;;  %vm821_vm10 = vcmp.eq.s32.totalorder %v12792_v56, %v11160_v47  ;;  %vm564_vm15 = vcmp.eq.s32.totalorder %v12791_v19, %v11172_v40  ;;  %v12808_v19 = vld [vmem:[#allocation43_spill] sm:$0xff] }
 0x1de   :  { %6617 = vmatpush1.msk.msra.mxu1 %vm852_vm5, %v12484_v63  ;;  %6554 = vmatprep.subr.msk.mxu0 %vm589_vm1, %v12484_v63  ;;  %vm820_vm5 = vcmp.eq.s32.totalorder %v12792_v56, %v11172_v40  ;;  %vm557_vm1 = vcmp.eq.s32.totalorder %v12793_v9, %v11160_v47  ;;  %v12809_v56 = vld [vmem:[#allocation44_spill] sm:$0xff] }
 0x1df   :  { %6618 = vmatprep.subr.msk.mxu1 %vm845_vm8, %v12484_v63  ;;  %6555 = vmatpush1.msk.msra.mxu0 %vm588_vm3, %v12484_v63  ;;  %vm813_vm8 = vcmp.eq.s32.totalorder %v12794_v4, %v11160_v47  ;;  %vm556_vm3 = vcmp.eq.s32.totalorder %v12793_v9, %v11172_v40  ;;  %v12810_v9 = vld [vmem:[#allocation45_spill] sm:$0xff] }
 0x1e0   :  { %6619 = vmatpush1.msk.msra.mxu1 %vm844_vm9, %v12484_v63  ;;  %6556 = vmatprep.subr.msk.mxu0 %vm581_vm4, %v12484_v63  ;;  %vm812_vm9 = vcmp.eq.s32.totalorder %v12794_v4, %v11172_v40  ;;  %vm549_vm4 = vcmp.eq.s32.totalorder %v12795_v0, %v11160_v47  ;;  %v12811_v4 = vld [vmem:[#allocation46_spill] sm:$0xff] }
 0x1e1   :  { %6620 = vmatprep.subr.msk.mxu1 %vm837_vm14, %v12484_v63  ;;  %6557 = vmatpush1.msk.msra.mxu0 %vm580_vm12, %v12484_v63  ;;  %vm805_vm14 = vcmp.eq.s32.totalorder %v12796_v31, %v11160_v47  ;;  %vm548_vm12 = vcmp.eq.s32.totalorder %v12795_v0, %v11172_v40  ;;  %v12812_v0 = vld [vmem:[#allocation47_spill] sm:$0xff] }
 0x1e2   :  { %6621 = vmatpush1.msk.msra.mxu1 %vm836_vm13, %v12484_v63  ;;  %6558 = vmatprep.subr.msk.mxu0 %vm573_vm2, %v12484_v63  ;;  %vm804_vm13 = vcmp.eq.s32.totalorder %v12796_v31, %v11172_v40  ;;  %vm541_vm2 = vcmp.eq.s32.totalorder %v12797_v38, %v11160_v47  ;;  %v12813_v31 = vld [vmem:[#allocation48_spill] sm:$0xff] }
 0x1e3   :  { %6622 = vmatprep.subr.msk.mxu1 %vm829_vm7, %v12484_v63  ;;  %6559 = vmatpush1.msk.msra.mxu0 %vm572_vm11, %v12484_v63  ;;  %vm797_vm7 = vcmp.eq.s32.totalorder %v12798_v17, %v11160_v47  ;;  %vm540_vm11 = vcmp.eq.s32.totalorder %v12797_v38, %v11172_v40  ;;  %v12814_v38 = vld [vmem:[#allocation49_spill] sm:$0xff] }
 0x1e4   :  { %6623 = vmatpush1.msk.msra.mxu1 %vm828_vm6, %v12484_v63  ;;  %6560 = vmatprep.subr.msk.mxu0 %vm565_vm0, %v12484_v63  ;;  %vm796_vm6 = vcmp.eq.s32.totalorder %v12798_v17, %v11172_v40  ;;  %vm533_vm0 = vcmp.eq.s32.totalorder %v12799_v24, %v11160_v47  ;;  %v12815_v17 = vld [vmem:[#allocation50_spill] sm:$0xff] }
 0x1e5   :  { %6624 = vmatprep.subr.msk.mxu1 %vm821_vm10, %v12484_v63  ;;  %6561 = vmatpush1.msk.msra.mxu0 %vm564_vm15, %v12484_v63  ;;  %vm789_vm10 = vcmp.eq.s32.totalorder %v12800_v55, %v11160_v47  ;;  %vm532_vm15 = vcmp.eq.s32.totalorder %v12799_v24, %v11172_v40  ;;  %v12816_v24 = vld [vmem:[#allocation51_spill] sm:$0xff] }
 0x1e6   :  { %6625 = vmatpush1.msk.msra.mxu1 %vm820_vm5, %v12484_v63  ;;  %6562 = vmatprep.subr.msk.mxu0 %vm557_vm1, %v12484_v63  ;;  %vm788_vm5 = vcmp.eq.s32.totalorder %v12800_v55, %v11172_v40  ;;  %vm525_vm1 = vcmp.eq.s32.totalorder %v12801_v39, %v11160_v47  ;;  %v12817_v55 = vld [vmem:[#allocation52_spill] sm:$0xff] }
 0x1e7   :  { %6626 = vmatprep.subr.msk.mxu1 %vm813_vm8, %v12484_v63  ;;  %6563 = vmatpush1.msk.msra.mxu0 %vm556_vm3, %v12484_v63  ;;  %vm781_vm8 = vcmp.eq.s32.totalorder %v12802_v34, %v11160_v47  ;;  %vm524_vm3 = vcmp.eq.s32.totalorder %v12801_v39, %v11172_v40  ;;  %v12818_v39 = vld [vmem:[#allocation53_spill] sm:$0xff] }
 0x1e8   :  { %6627 = vmatpush1.msk.msra.mxu1 %vm812_vm9, %v12484_v63  ;;  %6564 = vmatprep.subr.msk.mxu0 %vm549_vm4, %v12484_v63  ;;  %vm780_vm9 = vcmp.eq.s32.totalorder %v12802_v34, %v11172_v40  ;;  %vm517_vm4 = vcmp.eq.s32.totalorder %v12803_v5, %v11160_v47  ;;  %v12819_v34 = vld [vmem:[#allocation54_spill] sm:$0xff] }
 0x1e9   :  { %6628 = vmatprep.subr.msk.mxu1 %vm805_vm14, %v12484_v63  ;;  %6565 = vmatpush1.msk.msra.mxu0 %vm548_vm12, %v12484_v63  ;;  %vm773_vm14 = vcmp.eq.s32.totalorder %v12804_v35, %v11160_v47  ;;  %vm516_vm12 = vcmp.eq.s32.totalorder %v12803_v5, %v11172_v40  ;;  %v12820_v5 = vld [vmem:[#allocation55_spill] sm:$0xff] }
 0x1ea   :  { %6629 = vmatpush1.msk.msra.mxu1 %vm804_vm13, %v12484_v63  ;;  %6566 = vmatprep.subr.msk.mxu0 %vm541_vm2, %v12484_v63  ;;  %vm772_vm13 = vcmp.eq.s32.totalorder %v12804_v35, %v11172_v40  ;;  %vm509_vm2 = vcmp.eq.s32.totalorder %v12805_v30, %v11160_v47  ;;  %v12821_v35 = vld [vmem:[#allocation56_spill] sm:$0xff] }
 0x1eb   :  { %6630 = vmatprep.subr.msk.mxu1 %vm797_vm7, %v12484_v63  ;;  %6567 = vmatpush1.msk.msra.mxu0 %vm540_vm11, %v12484_v63  ;;  %vm765_vm7 = vcmp.eq.s32.totalorder %v12806_v7, %v11160_v47  ;;  %vm508_vm11 = vcmp.eq.s32.totalorder %v12805_v30, %v11172_v40  ;;  %v12822_v30 = vld [vmem:[#allocation57_spill] sm:$0xff] }
 0x1ec   :  { %6631 = vmatpush1.msk.msra.mxu1 %vm796_vm6, %v12484_v63  ;;  %6568 = vmatprep.subr.msk.mxu0 %vm533_vm0, %v12484_v63  ;;  %vm764_vm6 = vcmp.eq.s32.totalorder %v12806_v7, %v11172_v40  ;;  %vm757_vm0 = vcmp.eq.s32.totalorder %v12807_v14, %v11160_v47  ;;  %v12823_v7 = vld [vmem:[#allocation58_spill] sm:$0xff] }
 0x1ed   :  { %6632 = vmatprep.subr.msk.mxu1 %vm789_vm10, %v12484_v63  ;;  %6569 = vmatpush1.msk.msra.mxu0 %vm532_vm15, %v12484_v63  ;;  %vm1013_vm10 = vcmp.eq.s32.totalorder %v12808_v19, %v11160_v47  ;;  %vm756_vm15 = vcmp.eq.s32.totalorder %v12807_v14, %v11172_v40  ;;  %v12824_v14 = vld [vmem:[#allocation59_spill] sm:$0xff] }
 0x1ee   :  { %6633 = vmatpush1.msk.msra.mxu1 %vm788_vm5, %v12484_v63  ;;  %6570 = vmatprep.subr.msk.mxu0 %vm525_vm1, %v12484_v63  ;;  %vm1012_vm5 = vcmp.eq.s32.totalorder %v12808_v19, %v11172_v40  ;;  %vm749_vm1 = vcmp.eq.s32.totalorder %v12809_v56, %v11160_v47  ;;  %v12825_v19 = vld [vmem:[#allocation60_spill] sm:$0xff] }
 0x1ef   :  { %6634 = vmatprep.subr.msk.mxu1 %vm781_vm8, %v12484_v63  ;;  %6571 = vmatpush1.msk.msra.mxu0 %vm524_vm3, %v12484_v63  ;;  %vm1005_vm8 = vcmp.eq.s32.totalorder %v12810_v9, %v11160_v47  ;;  %vm748_vm3 = vcmp.eq.s32.totalorder %v12809_v56, %v11172_v40  ;;  %v12826_v56 = vld [vmem:[#allocation61_spill] sm:$0xff] }
 0x1f0   :  { %6635 = vmatpush1.msk.msra.mxu1 %vm780_vm9, %v12484_v63  ;;  %6572 = vmatprep.subr.msk.mxu0 %vm517_vm4, %v12484_v63  ;;  %vm1004_vm9 = vcmp.eq.s32.totalorder %v12810_v9, %v11172_v40  ;;  %vm741_vm4 = vcmp.eq.s32.totalorder %v12811_v4, %v11160_v47  ;;  %v12827_v9 = vld [vmem:[#allocation62_spill] sm:$0xff] }
 0x1f1   :  { %6636 = vmatprep.subr.msk.mxu1 %vm773_vm14, %v12484_v63  ;;  %6573 = vmatpush1.msk.msra.mxu0 %vm516_vm12, %v12484_v63  ;;  %vm997_vm14 = vcmp.eq.s32.totalorder %v12812_v0, %v11160_v47  ;;  %vm740_vm12 = vcmp.eq.s32.totalorder %v12811_v4, %v11172_v40  ;;  %v12828_v4 = vld [vmem:[#allocation63_spill] sm:$0xff] }
 0x1f2   :  { %6637 = vmatpush1.msk.msra.mxu1 %vm772_vm13, %v12484_v63  ;;  %6574 = vmatprep.subr.msk.mxu0 %vm509_vm2, %v12484_v63  ;;  %vm996_vm13 = vcmp.eq.s32.totalorder %v12812_v0, %v11172_v40  ;;  %vm733_vm2 = vcmp.eq.s32.totalorder %v12813_v31, %v11160_v47  ;;  %v12829_v0 = vld [vmem:[#allocation64_spill] sm:$0xff] }
 0x1f3   :  { %6638 = vmatprep.subr.msk.mxu1 %vm765_vm7, %v12484_v63  ;;  %6575 = vmatpush1.msk.msra.mxu0 %vm508_vm11, %v12484_v63  ;;  %vm989_vm7 = vcmp.eq.s32.totalorder %v12814_v38, %v11160_v47  ;;  %vm732_vm11 = vcmp.eq.s32.totalorder %v12813_v31, %v11172_v40  ;;  %v12830_v31 = vld [vmem:[#allocation65_spill] sm:$0xff] }
 0x1f4   :  { %6639 = vmatpush1.msk.msra.mxu1 %vm764_vm6, %v12484_v63  ;;  %6576 = vmatprep.subr.msk.mxu0 %vm757_vm0, %v12484_v63  ;;  %vm988_vm6 = vcmp.eq.s32.totalorder %v12814_v38, %v11172_v40  ;;  %vm725_vm0 = vcmp.eq.s32.totalorder %v12815_v17, %v11160_v47  ;;  %v3932_v38 = vpop.f32.mrf.mxu0 }
 0x1f5   :  { %6640 = vmatprep.subr.msk.mxu1 %vm1013_vm10, %v12484_v63  ;;  %6577 = vmatpush2.msk.msra.mxu0 %vm756_vm15, %v12484_v63  ;;  %vm981_vm10 = vcmp.eq.s32.totalorder %v12816_v24, %v11160_v47  ;;  %vm724_vm15 = vcmp.eq.s32.totalorder %v12815_v17, %v11172_v40  ;;  %v4003_v17 = vpop.f32.mrf.mxu1 }
 0x1f6   :  { %6641 = vmatpush2.msk.msra.mxu1 %vm1012_vm5, %v12484_v63  ;;  %6578 = vmatprep.subr.msk.mxu0 %vm749_vm1, %v12484_v63  ;;  %vm980_vm5 = vcmp.eq.s32.totalorder %v12816_v24, %v11172_v40  ;;  %vm717_vm1 = vcmp.eq.s32.totalorder %v12817_v55, %v11160_v47  ;;  %v12831_v24 = vld [vmem:[#allocation66_spill] sm:$0xff] }
 0x1f7   :  { %6642 = vmatprep.subr.msk.mxu1 %vm1005_vm8, %v12484_v63  ;;  %6579 = vmatpush2.msk.msra.mxu0 %vm748_vm3, %v12484_v63  ;;  %vm973_vm8 = vcmp.eq.s32.totalorder %v12818_v39, %v11160_v47  ;;  %vm716_vm3 = vcmp.eq.s32.totalorder %v12817_v55, %v11172_v40  ;;  %v12832_v55 = vld [vmem:[#allocation67_spill] sm:$0xff] }
 0x1f8   :  { %6643 = vmatpush2.msk.msra.mxu1 %vm1004_vm9, %v12484_v63  ;;  %6580 = vmatprep.subr.msk.mxu0 %vm741_vm4, %v12484_v63  ;;  %vm972_vm9 = vcmp.eq.s32.totalorder %v12818_v39, %v11172_v40  ;;  %vm709_vm4 = vcmp.eq.s32.totalorder %v12819_v34, %v11160_v47  ;;  %v12833_v39 = vld [vmem:[#allocation68_spill] sm:$0xff] }
 0x1f9   :  { %6644 = vmatprep.subr.msk.mxu1 %vm997_vm14, %v12484_v63  ;;  %6581 = vmatpush2.msk.msra.mxu0 %vm740_vm12, %v12484_v63  ;;  %vm965_vm14 = vcmp.eq.s32.totalorder %v12820_v5, %v11160_v47  ;;  %vm708_vm12 = vcmp.eq.s32.totalorder %v12819_v34, %v11172_v40  ;;  %v12834_v34 = vld [vmem:[#allocation69_spill] sm:$0xff] }
 0x1fa   :  { %6645 = vmatpush2.msk.msra.mxu1 %vm996_vm13, %v12484_v63  ;;  %6582 = vmatprep.subr.msk.mxu0 %vm733_vm2, %v12484_v63  ;;  %vm964_vm13 = vcmp.eq.s32.totalorder %v12820_v5, %v11172_v40  ;;  %vm701_vm2 = vcmp.eq.s32.totalorder %v12821_v35, %v11160_v47  ;;  %v3934_v5 = vpop.f32.mrf.mxu0 }
 0x1fb   :  { %6646 = vmatprep.subr.msk.mxu1 %vm989_vm7, %v12484_v63  ;;  %6583 = vmatpush2.msk.msra.mxu0 %vm732_vm11, %v12484_v63  ;;  %vm957_vm7 = vcmp.eq.s32.totalorder %v12822_v30, %v11160_v47  ;;  %vm700_vm11 = vcmp.eq.s32.totalorder %v12821_v35, %v11172_v40  ;;  %v4005_v35 = vpop.f32.mrf.mxu1 }
 0x1fc   :  { %6647 = vmatpush2.msk.msra.mxu1 %vm988_vm6, %v12484_v63  ;;  %6584 = vmatprep.subr.msk.mxu0 %vm725_vm0, %v12484_v63  ;;  %vm956_vm6 = vcmp.eq.s32.totalorder %v12822_v30, %v11172_v40  ;;  %vm693_vm0 = vcmp.eq.s32.totalorder %v12823_v7, %v11160_v47  ;;  %v4004_v30 = vadd.f32 %v4003_v17, %v3932_v38 }
 0x1fd   :  { %6648 = vmatprep.subr.msk.mxu1 %vm981_vm10, %v12484_v63  ;;  %6585 = vmatpush2.msk.msra.mxu0 %vm724_vm15, %v12484_v63  ;;  %vm949_vm10 = vcmp.eq.s32.totalorder %v12824_v14, %v11160_v47  ;;  %vm692_vm15 = vcmp.eq.s32.totalorder %v12823_v7, %v11172_v40  ;;  %v12835_v7 = vld [vmem:[#allocation70_spill] sm:$0xff] }
 0x1fe   :  { %6649 = vmatpush2.msk.msra.mxu1 %vm980_vm5, %v12484_v63  ;;  %6586 = vmatprep.subr.msk.mxu0 %vm717_vm1, %v12484_v63  ;;  %vm948_vm5 = vcmp.eq.s32.totalorder %v12824_v14, %v11172_v40  ;;  %vm685_vm1 = vcmp.eq.s32.totalorder %v12825_v19, %v11160_v47  ;;  %v12836_v14 = vld [vmem:[#allocation71_spill] sm:$0xff] }
 0x1ff   :  { %6650 = vmatprep.subr.msk.mxu1 %vm973_vm8, %v12484_v63  ;;  %6587 = vmatpush2.msk.msra.mxu0 %vm716_vm3, %v12484_v63  ;;  %vm941_vm8 = vcmp.eq.s32.totalorder %v12826_v56, %v11160_v47  ;;  %vm684_vm3 = vcmp.eq.s32.totalorder %v12825_v19, %v11172_v40  ;;  %v12837_v19 = vld [vmem:[#allocation72_spill] sm:$0xff] }
 0x200   :  { %6651 = vmatpush2.msk.msra.mxu1 %vm972_vm9, %v12484_v63  ;;  %6588 = vmatprep.subr.msk.mxu0 %vm709_vm4, %v12484_v63  ;;  %vm940_vm9 = vcmp.eq.s32.totalorder %v12826_v56, %v11172_v40  ;;  %vm677_vm4 = vcmp.eq.s32.totalorder %v12827_v9, %v11160_v47 }
 0x201   :  { %6652 = vmatprep.subr.msk.mxu1 %vm965_vm14, %v12484_v63  ;;  %6589 = vmatpush2.msk.msra.mxu0 %vm708_vm12, %v12484_v63  ;;  %vm933_vm14 = vcmp.eq.s32.totalorder %v12828_v4, %v11160_v47  ;;  %vm676_vm12 = vcmp.eq.s32.totalorder %v12827_v9, %v11172_v40  ;;  %v4006_v9 = vadd.f32 %v4005_v35, %v3934_v5  ;;  %v6963_v35 = vld [vmem:[%s12014_s1 + $0x18] sm:$0x3f] }
 0x202   :  { %6653 = vmatpush2.msk.msra.mxu1 %vm964_vm13, %v12484_v63  ;;  %6590 = vmatprep.subr.msk.mxu0 %vm701_vm2, %v12484_v63  ;;  %vm932_vm13 = vcmp.eq.s32.totalorder %v12828_v4, %v11172_v40  ;;  %vm669_vm2 = vcmp.eq.s32.totalorder %v12829_v0, %v11160_v47  ;;  %v12838_v4 = vld [vmem:[#allocation73_spill] sm:$0xff] }
 0x203   :  { %6654 = vmatprep.subr.msk.mxu1 %vm957_vm7, %v12484_v63  ;;  %6591 = vmatpush2.msk.msra.mxu0 %vm700_vm11, %v12484_v63  ;;  %vm925_vm7 = vcmp.eq.s32.totalorder %v12830_v31, %v11160_v47  ;;  %vm668_vm11 = vcmp.eq.s32.totalorder %v12829_v0, %v11172_v40 }
 0x204   :  { %6655 = vmatpush2.msk.msra.mxu1 %vm956_vm6, %v12484_v63  ;;  %6592 = vmatprep.subr.msk.mxu0 %vm693_vm0, %v12484_v63  ;;  %vm924_vm6 = vcmp.eq.s32.totalorder %v12830_v31, %v11172_v40  ;;  %vm661_vm0 = vcmp.eq.s32.totalorder %v12831_v24, %v11160_v47 }
 0x205   :  { %6656 = vmatprep.subr.msk.mxu1 %vm949_vm10, %v12484_v63  ;;  %6593 = vmatpush2.msk.msra.mxu0 %vm692_vm15, %v12484_v63  ;;  %vm917_vm10 = vcmp.eq.s32.totalorder %v12832_v55, %v11160_v47  ;;  %vm660_vm15 = vcmp.eq.s32.totalorder %v12831_v24, %v11172_v40 }
 0x206   :  { %6657 = vmatpush2.msk.msra.mxu1 %vm948_vm5, %v12484_v63  ;;  %6594 = vmatprep.subr.msk.mxu0 %vm685_vm1, %v12484_v63  ;;  %vm916_vm5 = vcmp.eq.s32.totalorder %v12832_v55, %v11172_v40  ;;  %vm653_vm1 = vcmp.eq.s32.totalorder %v12833_v39, %v11160_v47 }
 0x207   :  { %6658 = vmatprep.subr.msk.mxu1 %vm941_vm8, %v12484_v63  ;;  %6595 = vmatpush2.msk.msra.mxu0 %vm684_vm3, %v12484_v63  ;;  %vm909_vm8 = vcmp.eq.s32.totalorder %v12834_v34, %v11160_v47  ;;  %vm652_vm3 = vcmp.eq.s32.totalorder %v12833_v39, %v11172_v40  ;;  %v6962_v39 = vld [vmem:[%s12014_s1 + $0x8] sm:$0x3f] }
 0x208   :  { %6659 = vmatpush2.msk.msra.mxu1 %vm940_vm9, %v12484_v63  ;;  %6596 = vmatprep.subr.msk.mxu0 %vm677_vm4, %v12484_v63  ;;  %vm908_vm9 = vcmp.eq.s32.totalorder %v12834_v34, %v11172_v40  ;;  %vm645_vm4 = vcmp.eq.s32.totalorder %v12835_v7, %v11160_v47  ;;  %v12839_v34 = vld [vmem:[#allocation75_spill] sm:$0xff] }
 0x209   :  { %6660 = vmatprep.subr.msk.mxu1 %vm933_vm14, %v12484_v63  ;;  %6597 = vmatpush2.msk.msra.mxu0 %vm676_vm12, %v12484_v63  ;;  %vm901_vm14 = vcmp.eq.s32.totalorder %v12836_v14, %v11160_v47  ;;  %vm644_vm12 = vcmp.eq.s32.totalorder %v12835_v7, %v11172_v40  ;;  %v6965_v7 = vld [vmem:[%s12014_s1 + $0x10] sm:$0x3f] }
 0x20a   :  { %6661 = vmatpush2.msk.msra.mxu1 %vm932_vm13, %v12484_v63  ;;  %6598 = vmatprep.subr.msk.mxu0 %vm669_vm2, %v12484_v63  ;;  %vm900_vm13 = vcmp.eq.s32.totalorder %v12836_v14, %v11172_v40  ;;  %vm637_vm2 = vcmp.eq.s32.totalorder %v12837_v19, %v11160_v47  ;;  %v12840_v14 = vld [vmem:[#allocation76_spill] sm:$0xff] }
 0x20b   :  { %6662 = vmatprep.subr.msk.mxu1 %vm925_vm7, %v12484_v63  ;;  %6599 = vmatpush2.msk.msra.mxu0 %vm668_vm11, %v12484_v63  ;;  %vm893_vm7 = vcmp.eq.s32.totalorder %v12838_v4, %v11160_v47  ;;  %vm636_vm11 = vcmp.eq.s32.totalorder %v12837_v19, %v11172_v40  ;;  %v12841_v19 = vld [vmem:[#allocation77_spill] sm:$0xff] }
 0x20c   :  { %6663 = vmatpush2.msk.msra.mxu1 %vm924_vm6, %v12484_v63  ;;  %6600 = vmatprep.subr.msk.mxu0 %vm661_vm0, %v12484_v63  ;;  %vm892_vm6 = vcmp.eq.s32.totalorder %v12838_v4, %v11172_v40  ;;  %vm1141_vm0 = vcmp.eq.s32.totalorder %v12717_v62, %v11160_v47  ;;  %v12845_v4 = vld [vmem:[#allocation81_spill] sm:$0xff] }
 0x20d   :  { %6664 = vmatprep.subr.msk.mxu1 %vm917_vm10, %v12484_v63  ;;  %6601 = vmatpush2.msk.msra.mxu0 %vm660_vm15, %v12484_v63  ;;  %vm1397_vm10 = vcmp.eq.s32.totalorder %v12839_v34, %v11160_v47  ;;  %vm1140_vm15 = vcmp.eq.s32.totalorder %v12717_v62, %v11172_v40  ;;  %v12843_v62 = vld [vmem:[#allocation79_spill] sm:$0xff] }
 0x20e   :  { %6665 = vmatpush2.msk.msra.mxu1 %vm916_vm5, %v12484_v63  ;;  %6602 = vmatprep.subr.msk.mxu0 %vm653_vm1, %v12484_v63  ;;  %vm1396_vm5 = vcmp.eq.s32.totalorder %v12839_v34, %v11172_v40  ;;  %vm1133_vm1 = vcmp.eq.s32.totalorder %v12840_v14, %v11160_v47  ;;  %v12853_v34 = vld [vmem:[#allocation89_spill] sm:$0xff] }
 0x20f   :  { %6666 = vmatprep.subr.msk.mxu1 %vm909_vm8, %v12484_v63  ;;  %v4074_v56 = vpop.f32.mrf.mxu0  ;;  %6603 = vmatpush2.msk.msra.mxu0 %vm652_vm3, %v12484_v63  ;;  %vm1389_vm8 = vcmp.eq.s32.totalorder %v12841_v19, %v11160_v47  ;;  %vm1132_vm3 = vcmp.eq.s32.totalorder %v12840_v14, %v11172_v40  ;;  %v12858_v14 = vld [vmem:[#allocation95_spill] sm:$0xff] }
 0x210   :  { %6667 = vmatpush2.msk.msra.mxu1 %vm908_vm9, %v12484_v63  ;;  %v4075_v0 = vadd.f32 %v4074_v56, %v4004_v30  ;;  %6604 = vmatprep.subr.msk.mxu0 %vm645_vm4, %v12484_v63  ;;  %v6964_v30 = vld [vmem:[%s12014_s1] sm:$0x3f]  ;;  %vm1388_vm9 = vcmp.eq.s32.totalorder %v12841_v19, %v11172_v40  ;;  %v12842_v56 = vld [vmem:[#allocation78_spill] sm:$0xff] }
 0x211   :  { %6668 = vmatprep.subr.msk.mxu1 %vm901_vm14, %v12484_v63  ;;  %v4145_v31 = vpop.f32.mrf.mxu1  ;;  %v4076_v38 = vpop.f32.mrf.mxu0  ;;  %6605 = vmatpush2.msk.msra.mxu0 %vm644_vm12, %v12484_v63  ;;  %vm1125_vm4 = vcmp.eq.s32.totalorder %v12842_v56, %v11160_v47  ;;  %vm1381_vm14 = vcmp.eq.s32.totalorder %v12843_v62, %v11160_v47  ;;  %vm1124_vm12 = vcmp.eq.s32.totalorder %v12842_v56, %v11172_v40 }
 0x212   :  { %6669 = vmatpush2.msk.msra.mxu1 %vm900_vm13, %v12484_v63  ;;  %v4146_v17 = vadd.f32 %v4145_v31, %v4075_v0  ;;  %v4077_v24 = vadd.f32 %v4076_v38, %v4006_v9  ;;  %6606 = vmatprep.subr.msk.mxu0 %vm637_vm2, %v12484_v63  ;;  %vm1380_vm13 = vcmp.eq.s32.totalorder %v12843_v62, %v11172_v40  ;;  %v12844_v9 = vld [vmem:[#allocation80_spill] sm:$0xff]  ;;  %v12846_v0 = vld [vmem:[#allocation82_spill] sm:$0xff]  ;;  %v12847_v31 = vld [vmem:[#allocation83_spill] sm:$0xff] }
 0x213   :  { %6670 = vmatprep.subr.msk.mxu1 %vm893_vm7, %v12484_v63  ;;  %v4147_v55 = vpop.f32.mrf.mxu1  ;;  %6607 = vmatpush2.msk.msra.mxu0 %vm636_vm11, %v12484_v63  ;;  %vm1117_vm2 = vcmp.eq.s32.totalorder %v12844_v9, %v11160_v47  ;;  %vm1373_vm7 = vcmp.eq.s32.totalorder %v12845_v4, %v11160_v47  ;;  %vm1116_vm11 = vcmp.eq.s32.totalorder %v12844_v9, %v11172_v40  ;;  %v12848_v38 = vld [vmem:[#allocation84_spill] sm:$0xff] }
 0x214   :  { %4498 = vmatprep.mubr.f32.mxu0 %v6962_v39  ;;  %4720 = vst [vmem:[%s12015_s2 + $0x10] sm:$0x3f] %v4146_v17  ;;  %v4148_v5 = vadd.f32 %v4147_v55, %v4077_v24  ;;  %6671 = vmatpush2.msk.msra.mxu1 %vm892_vm6, %v12484_v63  ;;  %vm1372_vm6 = vcmp.eq.s32.totalorder %v12845_v4, %v11172_v40  ;;  %v12849_v17 = vld [vmem:[#allocation85_spill] sm:$0xff]  ;;  %v12850_v24 = vld [vmem:[#allocation86_spill] sm:$0xff]  ;;  %v12851_v55 = vld [vmem:[#allocation87_spill] sm:$0xff] }
 0x215   :  { %4569 = vmatprep.mubr.f32.mxu1 %v6963_v35  ;;  %4499 = vmatmul.mubr.f32.vlgmr.msra.gmra.mxu0 %v6964_v30  ;;  %v12852_v39 = vld [vmem:[#allocation88_spill] sm:$0xff]  ;;  %v12855_v35 = vld [vmem:[#allocation91_spill] sm:$0xff] }
 0x216   :  { %4570 = vmatmul.mubr.f32.vlgmr.msra.gmra.mxu1 %v6965_v7  ;;  %4721 = vst [vmem:[%s12015_s2 + $0x18] sm:$0x3f] %v4148_v5  ;;  %6672 = vmatprep.subr.msk.mxu0 %vm1141_vm0, %v12484_v63  ;;  %vm1109_vm0 = vcmp.eq.s32.totalorder %v12846_v0, %v11160_v47  ;;  %v12854_v5 = vld [vmem:[#allocation90_spill] sm:$0xff]  ;;  %v12856_v30 = vld [vmem:[#allocation92_spill] sm:$0xff]  ;;  %v12857_v7 = vld [vmem:[#allocation93_spill] sm:$0xff] }
 0x217   :  { %6736 = vmatprep.subr.msk.mxu1 %vm1397_vm10, %v12484_v63  ;;  %6673 = vmatpush1.msk.msra.mxu0 %vm1140_vm15, %v12484_v63  ;;  %vm1365_vm10 = vcmp.eq.s32.totalorder %v12847_v31, %v11160_v47  ;;  %vm1108_vm15 = vcmp.eq.s32.totalorder %v12846_v0, %v11172_v40 }
 0x218   :  { %6737 = vmatpush1.msk.msra.mxu1 %vm1396_vm5, %v12484_v63  ;;  %6674 = vmatprep.subr.msk.mxu0 %vm1133_vm1, %v12484_v63  ;;  %vm1364_vm5 = vcmp.eq.s32.totalorder %v12847_v31, %v11172_v40  ;;  %vm1101_vm1 = vcmp.eq.s32.totalorder %v12848_v38, %v11160_v47 }
 0x219   :  { %6738 = vmatprep.subr.msk.mxu1 %vm1389_vm8, %v12484_v63  ;;  %6675 = vmatpush1.msk.msra.mxu0 %vm1132_vm3, %v12484_v63  ;;  %vm1357_vm8 = vcmp.eq.s32.totalorder %v12849_v17, %v11160_v47  ;;  %vm1100_vm3 = vcmp.eq.s32.totalorder %v12848_v38, %v11172_v40 }
 0x21a   :  { %6739 = vmatpush1.msk.msra.mxu1 %vm1388_vm9, %v12484_v63  ;;  %6676 = vmatprep.subr.msk.mxu0 %vm1125_vm4, %v12484_v63  ;;  %vm1356_vm9 = vcmp.eq.s32.totalorder %v12849_v17, %v11172_v40  ;;  %vm1093_vm4 = vcmp.eq.s32.totalorder %v12850_v24, %v11160_v47 }
 0x21b   :  { %6740 = vmatprep.subr.msk.mxu1 %vm1381_vm14, %v12484_v63  ;;  %6677 = vmatpush1.msk.msra.mxu0 %vm1124_vm12, %v12484_v63  ;;  %vm1349_vm14 = vcmp.eq.s32.totalorder %v12851_v55, %v11160_v47  ;;  %vm1092_vm12 = vcmp.eq.s32.totalorder %v12850_v24, %v11172_v40 }
 0x21c   :  { %6741 = vmatpush1.msk.msra.mxu1 %vm1380_vm13, %v12484_v63  ;;  %6678 = vmatprep.subr.msk.mxu0 %vm1117_vm2, %v12484_v63  ;;  %vm1348_vm13 = vcmp.eq.s32.totalorder %v12851_v55, %v11172_v40  ;;  %vm1085_vm2 = vcmp.eq.s32.totalorder %v12852_v39, %v11160_v47 }
 0x21d   :  { %6742 = vmatprep.subr.msk.mxu1 %vm1373_vm7, %v12484_v63  ;;  %6679 = vmatpush1.msk.msra.mxu0 %vm1116_vm11, %v12484_v63  ;;  %vm1341_vm7 = vcmp.eq.s32.totalorder %v12853_v34, %v11160_v47  ;;  %vm1084_vm11 = vcmp.eq.s32.totalorder %v12852_v39, %v11172_v40 }
 0x21e   :  { %6743 = vmatpush1.msk.msra.mxu1 %vm1372_vm6, %v12484_v63  ;;  %6680 = vmatprep.subr.msk.mxu0 %vm1109_vm0, %v12484_v63  ;;  %vm1340_vm6 = vcmp.eq.s32.totalorder %v12853_v34, %v11172_v40  ;;  %vm1077_vm0 = vcmp.eq.s32.totalorder %v12854_v5, %v11160_v47 }
 0x21f   :  { %6744 = vmatprep.subr.msk.mxu1 %vm1365_vm10, %v12484_v63  ;;  %6681 = vmatpush1.msk.msra.mxu0 %vm1108_vm15, %v12484_v63  ;;  %vm1333_vm10 = vcmp.eq.s32.totalorder %v12855_v35, %v11160_v47  ;;  %vm1076_vm15 = vcmp.eq.s32.totalorder %v12854_v5, %v11172_v40 }
 0x220   :  { %6745 = vmatpush1.msk.msra.mxu1 %vm1364_vm5, %v12484_v63  ;;  %6682 = vmatprep.subr.msk.mxu0 %vm1101_vm1, %v12484_v63  ;;  %vm1332_vm5 = vcmp.eq.s32.totalorder %v12855_v35, %v11172_v40  ;;  %vm1069_vm1 = vcmp.eq.s32.totalorder %v12856_v30, %v11160_v47 }
 0x221   :  { %6746 = vmatprep.subr.msk.mxu1 %vm1357_vm8, %v12484_v63  ;;  %6683 = vmatpush1.msk.msra.mxu0 %vm1100_vm3, %v12484_v63  ;;  %vm1325_vm8 = vcmp.eq.s32.totalorder %v12857_v7, %v11160_v47  ;;  %vm1068_vm3 = vcmp.eq.s32.totalorder %v12856_v30, %v11172_v40 }
 0x222   :  { %6747 = vmatpush1.msk.msra.mxu1 %vm1356_vm9, %v12484_v63  ;;  %6684 = vmatprep.subr.msk.mxu0 %vm1093_vm4, %v12484_v63  ;;  %vm1324_vm9 = vcmp.eq.s32.totalorder %v12857_v7, %v11172_v40  ;;  %vm1061_vm4 = vcmp.eq.s32.totalorder %v12739_v29, %v11160_v47 }
 0x223   :  { %6748 = vmatprep.subr.msk.mxu1 %vm1349_vm14, %v12484_v63  ;;  %6685 = vmatpush1.msk.msra.mxu0 %vm1092_vm12, %v12484_v63  ;;  %vm1317_vm14 = vcmp.eq.s32.totalorder %v12858_v14, %v11160_v47  ;;  %vm1060_vm12 = vcmp.eq.s32.totalorder %v12739_v29, %v11172_v40 }
 0x224   :  { %6749 = vmatpush1.msk.msra.mxu1 %vm1348_vm13, %v12484_v63  ;;  %6686 = vmatprep.subr.msk.mxu0 %vm1085_vm2, %v12484_v63  ;;  %vm1316_vm13 = vcmp.eq.s32.totalorder %v12858_v14, %v11172_v40  ;;  %vm1053_vm2 = vcmp.eq.s32.totalorder %v12605_v3, %v11160_v47 }
 0x225   :  { %6750 = vmatprep.subr.msk.mxu1 %vm1341_vm7, %v12484_v63  ;;  %6687 = vmatpush1.msk.msra.mxu0 %vm1084_vm11, %v12484_v63  ;;  %vm1309_vm7 = vcmp.eq.s32.totalorder %v12606_v26, %v11160_v47  ;;  %vm1052_vm11 = vcmp.eq.s32.totalorder %v12605_v3, %v11172_v40 }
 0x226   :  { %6751 = vmatpush1.msk.msra.mxu1 %vm1340_vm6, %v12484_v63  ;;  %6688 = vmatprep.subr.msk.mxu0 %vm1077_vm0, %v12484_v63  ;;  %vm1308_vm6 = vcmp.eq.s32.totalorder %v12606_v26, %v11172_v40  ;;  %vm1045_vm0 = vcmp.eq.s32.totalorder %v7816_v36, %v11160_v47 }
 0x227   :  { %6752 = vmatprep.subr.msk.mxu1 %vm1333_vm10, %v12484_v63  ;;  %6689 = vmatpush1.msk.msra.mxu0 %vm1076_vm15, %v12484_v63  ;;  %vm1301_vm10 = vcmp.eq.s32.totalorder %v12607_v13, %v11160_v47  ;;  %vm1044_vm15 = vcmp.eq.s32.totalorder %v7816_v36, %v11172_v40 }
 0x228   :  { %6753 = vmatpush1.msk.msra.mxu1 %vm1332_vm5, %v12484_v63  ;;  %6690 = vmatprep.subr.msk.mxu0 %vm1069_vm1, %v12484_v63  ;;  %vm1300_vm5 = vcmp.eq.s32.totalorder %v12607_v13, %v11172_v40  ;;  %vm1037_vm1 = vcmp.eq.s32.totalorder %v12610_v23, %v11160_v47 }
 0x229   :  { %6754 = vmatprep.subr.msk.mxu1 %vm1325_vm8, %v12484_v63  ;;  %6691 = vmatpush1.msk.msra.mxu0 %vm1068_vm3, %v12484_v63  ;;  %vm1293_vm8 = vcmp.eq.s32.totalorder %v12611_v25, %v11160_v47  ;;  %vm1036_vm3 = vcmp.eq.s32.totalorder %v12610_v23, %v11172_v40 }
 0x22a   :  { %6755 = vmatpush1.msk.msra.mxu1 %vm1324_vm9, %v12484_v63  ;;  %6692 = vmatprep.subr.msk.mxu0 %vm1061_vm4, %v12484_v63  ;;  %vm1292_vm9 = vcmp.eq.s32.totalorder %v12611_v25, %v11172_v40  ;;  %vm1029_vm4 = vcmp.eq.s32.totalorder %v12614_v1, %v11160_v47  ;;  %v6966_v25 = vld [vmem:[%s12014_s1 + $0x28] sm:$0x3f] }
 0x22b   :  { %6756 = vmatprep.subr.msk.mxu1 %vm1317_vm14, %v12484_v63  ;;  %6693 = vmatpush1.msk.msra.mxu0 %vm1060_vm12, %v12484_v63  ;;  %vm1285_vm14 = vcmp.eq.s32.totalorder %v12615_v10, %v11160_v47  ;;  %vm1028_vm12 = vcmp.eq.s32.totalorder %v12614_v1, %v11172_v40 }
 0x22c   :  { %6757 = vmatpush1.msk.msra.mxu1 %vm1316_vm13, %v12484_v63  ;;  %6694 = vmatprep.subr.msk.mxu0 %vm1053_vm2, %v12484_v63  ;;  %vm1284_vm13 = vcmp.eq.s32.totalorder %v12615_v10, %v11172_v40  ;;  %vm1021_vm2 = vcmp.eq.s32.totalorder %v12616_v18, %v11160_v47 }
 0x22d   :  { %6758 = vmatprep.subr.msk.mxu1 %vm1309_vm7, %v12484_v63  ;;  %6695 = vmatpush1.msk.msra.mxu0 %vm1052_vm11, %v12484_v63  ;;  %vm1277_vm7 = vcmp.eq.s32.totalorder %v12617_v15, %v11160_v47  ;;  %vm1020_vm11 = vcmp.eq.s32.totalorder %v12616_v18, %v11172_v40 }
 0x22e   :  { %6759 = vmatpush1.msk.msra.mxu1 %vm1308_vm6, %v12484_v63  ;;  %6696 = vmatprep.subr.msk.mxu0 %vm1045_vm0, %v12484_v63  ;;  %vm1276_vm6 = vcmp.eq.s32.totalorder %v12617_v15, %v11172_v40  ;;  %vm1269_vm0 = vcmp.eq.s32.totalorder %v7923_v2, %v11160_v47 }
 0x22f   :  { %6760 = vmatprep.subr.msk.mxu1 %vm1301_vm10, %v12484_v63  ;;  %6697 = vmatpush1.msk.msra.mxu0 %vm1044_vm15, %v12484_v63  ;;  %vm1525_vm10 = vcmp.eq.s32.totalorder %v12618_v22, %v11160_v47  ;;  %vm1268_vm15 = vcmp.eq.s32.totalorder %v7923_v2, %v11172_v40 }
 0x230   :  { %6761 = vmatpush1.msk.msra.mxu1 %vm1300_vm5, %v12484_v63  ;;  %6698 = vmatprep.subr.msk.mxu0 %vm1037_vm1, %v12484_v63  ;;  %vm1524_vm5 = vcmp.eq.s32.totalorder %v12618_v22, %v11172_v40  ;;  %vm1261_vm1 = vcmp.eq.s32.totalorder %v7940_v45, %v11160_v47 }
 0x231   :  { %6762 = vmatprep.subr.msk.mxu1 %vm1293_vm8, %v12484_v63  ;;  %6699 = vmatpush1.msk.msra.mxu0 %vm1036_vm3, %v12484_v63  ;;  %vm1517_vm8 = vcmp.eq.s32.totalorder %v7943_v44, %v11160_v47  ;;  %vm1260_vm3 = vcmp.eq.s32.totalorder %v7940_v45, %v11172_v40 }
 0x232   :  { %6763 = vmatpush1.msk.msra.mxu1 %vm1292_vm9, %v12484_v63  ;;  %6700 = vmatprep.subr.msk.mxu0 %vm1029_vm4, %v12484_v63  ;;  %vm1516_vm9 = vcmp.eq.s32.totalorder %v7943_v44, %v11172_v40  ;;  %vm1253_vm4 = vcmp.eq.s32.totalorder %v7946_v43, %v11160_v47  ;;  %v6969_v44 = vld [vmem:[%s12014_s1 + $0x30] sm:$0x3f] }
 0x233   :  { %6764 = vmatprep.subr.msk.mxu1 %vm1285_vm14, %v12484_v63  ;;  %6701 = vmatpush1.msk.msra.mxu0 %vm1028_vm12, %v12484_v63  ;;  %vm1509_vm14 = vcmp.eq.s32.totalorder %v7949_v12, %v11160_v47  ;;  %vm1252_vm12 = vcmp.eq.s32.totalorder %v7946_v43, %v11172_v40  ;;  %v6968_v43 = vld [vmem:[%s12014_s1 + $0x20] sm:$0x3f] }
 0x234   :  { %6765 = vmatpush1.msk.msra.mxu1 %vm1284_vm13, %v12484_v63  ;;  %6702 = vmatprep.subr.msk.mxu0 %vm1021_vm2, %v12484_v63  ;;  %vm1508_vm13 = vcmp.eq.s32.totalorder %v7949_v12, %v11172_v40  ;;  %vm1245_vm2 = vcmp.eq.s32.totalorder %v7990_v32, %v11160_v47 }
 0x235   :  { %6766 = vmatprep.subr.msk.mxu1 %vm1277_vm7, %v12484_v63  ;;  %6703 = vmatpush1.msk.msra.mxu0 %vm1020_vm11, %v12484_v63  ;;  %vm1501_vm7 = vcmp.eq.s32.totalorder %v8007_v46, %v11160_v47  ;;  %vm1244_vm11 = vcmp.eq.s32.totalorder %v7990_v32, %v11172_v40  ;;  %v6967_v32 = vld [vmem:[%s12014_s1 + $0x38] sm:$0x3f] }
 0x236   :  { %6767 = vmatpush1.msk.msra.mxu1 %vm1276_vm6, %v12484_v63  ;;  %6704 = vmatprep.subr.msk.mxu0 %vm1269_vm0, %v12484_v63  ;;  %vm1500_vm6 = vcmp.eq.s32.totalorder %v8007_v46, %v11172_v40  ;;  %vm1237_vm0 = vcmp.eq.s32.totalorder %v8056_v41, %v11160_v47 }
 0x237   :  { %6768 = vmatprep.subr.msk.mxu1 %vm1525_vm10, %v12484_v63  ;;  %6705 = vmatpush2.msk.msra.mxu0 %vm1268_vm15, %v12484_v63  ;;  %vm1493_vm10 = vcmp.eq.s32.totalorder %v8073_v11, %v11160_v47  ;;  %vm1236_vm15 = vcmp.eq.s32.totalorder %v8056_v41, %v11172_v40 }
 0x238   :  { %6769 = vmatpush2.msk.msra.mxu1 %vm1524_vm5, %v12484_v63  ;;  %6706 = vmatprep.subr.msk.mxu0 %vm1261_vm1, %v12484_v63  ;;  %vm1492_vm5 = vcmp.eq.s32.totalorder %v8073_v11, %v11172_v40  ;;  %vm1229_vm1 = vcmp.eq.s32.totalorder %v8120_v42, %v11160_v47 }
 0x239   :  { %6770 = vmatprep.subr.msk.mxu1 %vm1517_vm8, %v12484_v63  ;;  %6707 = vmatpush2.msk.msra.mxu0 %vm1260_vm3, %v12484_v63  ;;  %vm1485_vm8 = vcmp.eq.s32.totalorder %v8137_v59, %v11160_v47  ;;  %vm1228_vm3 = vcmp.eq.s32.totalorder %v8120_v42, %v11172_v40 }
 0x23a   :  { %6771 = vmatpush2.msk.msra.mxu1 %vm1516_vm9, %v12484_v63  ;;  %6708 = vmatprep.subr.msk.mxu0 %vm1253_vm4, %v12484_v63  ;;  %vm1484_vm9 = vcmp.eq.s32.totalorder %v8137_v59, %v11172_v40  ;;  %vm1221_vm4 = vcmp.eq.s32.totalorder %v8182_v20, %v11160_v47 }
 0x23b   :  { %6772 = vmatprep.subr.msk.mxu1 %vm1509_vm14, %v12484_v63  ;;  %6709 = vmatpush2.msk.msra.mxu0 %vm1252_vm12, %v12484_v63  ;;  %vm1477_vm14 = vcmp.eq.s32.totalorder %v8199_v57, %v11160_v47  ;;  %vm1220_vm12 = vcmp.eq.s32.totalorder %v8182_v20, %v11172_v40 }
 0x23c   :  { %6773 = vmatpush2.msk.msra.mxu1 %vm1508_vm13, %v12484_v63  ;;  %6710 = vmatprep.subr.msk.mxu0 %vm1245_vm2, %v12484_v63  ;;  %vm1476_vm13 = vcmp.eq.s32.totalorder %v8199_v57, %v11172_v40  ;;  %vm1213_vm2 = vcmp.eq.s32.totalorder %v8214_v58, %v11160_v47 }
 0x23d   :  { %6774 = vmatprep.subr.msk.mxu1 %vm1501_vm7, %v12484_v63  ;;  %6711 = vmatpush2.msk.msra.mxu0 %vm1244_vm11, %v12484_v63  ;;  %vm1469_vm7 = vcmp.eq.s32.totalorder %v8231_v21, %v11160_v47  ;;  %vm1212_vm11 = vcmp.eq.s32.totalorder %v8214_v58, %v11172_v40 }
 0x23e   :  { %6775 = vmatpush2.msk.msra.mxu1 %vm1500_vm6, %v12484_v63  ;;  %6712 = vmatprep.subr.msk.mxu0 %vm1237_vm0, %v12484_v63  ;;  %vm1468_vm6 = vcmp.eq.s32.totalorder %v8231_v21, %v11172_v40  ;;  %vm1205_vm0 = vcmp.eq.s32.totalorder %v8274_v61, %v11160_v47 }
 0x23f   :  { %6776 = vmatprep.subr.msk.mxu1 %vm1493_vm10, %v12484_v63  ;;  %6713 = vmatpush2.msk.msra.mxu0 %vm1236_vm15, %v12484_v63  ;;  %vm1461_vm10 = vcmp.eq.s32.totalorder %v8290_v60, %v11160_v47  ;;  %vm1204_vm15 = vcmp.eq.s32.totalorder %v8274_v61, %v11172_v40 }
 0x240   :  { %6777 = vmatpush2.msk.msra.mxu1 %vm1492_vm5, %v12484_v63  ;;  %6714 = vmatprep.subr.msk.mxu0 %vm1229_vm1, %v12484_v63  ;;  %vm1460_vm5 = vcmp.eq.s32.totalorder %v8290_v60, %v11172_v40  ;;  %vm1197_vm1 = vcmp.eq.s32.totalorder %v8334_v16, %v11160_v47 }
 0x241   :  { %6778 = vmatprep.subr.msk.mxu1 %vm1485_vm8, %v12484_v63  ;;  %6715 = vmatpush2.msk.msra.mxu0 %vm1228_vm3, %v12484_v63  ;;  %vm1453_vm8 = vcmp.eq.s32.totalorder %v8351_v28, %v11160_v47  ;;  %vm1196_vm3 = vcmp.eq.s32.totalorder %v8334_v16, %v11172_v40 }
 0x242   :  { %6779 = vmatpush2.msk.msra.mxu1 %vm1484_vm9, %v12484_v63  ;;  %6716 = vmatprep.subr.msk.mxu0 %vm1221_vm4, %v12484_v63  ;;  %vm1452_vm9 = vcmp.eq.s32.totalorder %v8351_v28, %v11172_v40  ;;  %vm1189_vm4 = vcmp.eq.s32.totalorder %v8368_v27, %v11160_v47 }
 0x243   :  { %6780 = vmatprep.subr.msk.mxu1 %vm1477_vm14, %v12484_v63  ;;  %6717 = vmatpush2.msk.msra.mxu0 %vm1220_vm12, %v12484_v63  ;;  %vm1445_vm14 = vcmp.eq.s32.totalorder %v8381_v51, %v11160_v47  ;;  %vm1188_vm12 = vcmp.eq.s32.totalorder %v8368_v27, %v11172_v40 }
 0x244   :  { %6781 = vmatpush2.msk.msra.mxu1 %vm1476_vm13, %v12484_v63  ;;  %6718 = vmatprep.subr.msk.mxu0 %vm1213_vm2, %v12484_v63  ;;  %vm1444_vm13 = vcmp.eq.s32.totalorder %v8381_v51, %v11172_v40  ;;  %vm1181_vm2 = vcmp.eq.s32.totalorder %v8654_v49, %v11160_v47 }
 0x245   :  { %6782 = vmatprep.subr.msk.mxu1 %vm1469_vm7, %v12484_v63  ;;  %6719 = vmatpush2.msk.msra.mxu0 %vm1212_vm11, %v12484_v63  ;;  %vm1437_vm7 = vcmp.eq.s32.totalorder %v8684_v52, %v11160_v47  ;;  %vm1180_vm11 = vcmp.eq.s32.totalorder %v8654_v49, %v11172_v40 }
 0x246   :  { %6783 = vmatpush2.msk.msra.mxu1 %vm1468_vm6, %v12484_v63  ;;  %6720 = vmatprep.subr.msk.mxu0 %vm1205_vm0, %v12484_v63  ;;  %vm1436_vm6 = vcmp.eq.s32.totalorder %v8684_v52, %v11172_v40  ;;  %vm1173_vm0 = vcmp.eq.s32.totalorder %v8714_v8, %v11160_v47 }
 0x247   :  { %6784 = vmatprep.subr.msk.mxu1 %vm1461_vm10, %v12484_v63  ;;  %6721 = vmatpush2.msk.msra.mxu0 %vm1204_vm15, %v12484_v63  ;;  %vm1429_vm10 = vcmp.eq.s32.totalorder %v8730_v6, %v11160_v47  ;;  %vm1172_vm15 = vcmp.eq.s32.totalorder %v8714_v8, %v11172_v40 }
 0x248   :  { %6785 = vmatpush2.msk.msra.mxu1 %vm1460_vm5, %v12484_v63  ;;  %6722 = vmatprep.subr.msk.mxu0 %vm1197_vm1, %v12484_v63  ;;  %vm1428_vm5 = vcmp.eq.s32.totalorder %v8730_v6, %v11172_v40  ;;  %vm1165_vm1 = vcmp.eq.s32.totalorder %v8746_v48, %v11160_v47 }
 0x249   :  { %6786 = vmatprep.subr.msk.mxu1 %vm1453_vm8, %v12484_v63  ;;  %6723 = vmatpush2.msk.msra.mxu0 %vm1196_vm3, %v12484_v63  ;;  %vm1421_vm8 = vcmp.eq.s32.totalorder %v8766_v33, %v11160_v47  ;;  %vm1164_vm3 = vcmp.eq.s32.totalorder %v8746_v48, %v11172_v40 }
 0x24a   :  { %6787 = vmatpush2.msk.msra.mxu1 %vm1452_vm9, %v12484_v63  ;;  %6724 = vmatprep.subr.msk.mxu0 %vm1189_vm4, %v12484_v63  ;;  %vm1420_vm9 = vcmp.eq.s32.totalorder %v8766_v33, %v11172_v40  ;;  %vm1157_vm4 = vcmp.eq.s32.totalorder %v8783_v50, %v11160_v47 }
 0x24b   :  { %6788 = vmatprep.subr.msk.mxu1 %vm1445_vm14, %v12484_v63  ;;  %6725 = vmatpush2.msk.msra.mxu0 %vm1188_vm12, %v12484_v63  ;;  %vm1413_vm14 = vcmp.eq.s32.totalorder %v8792_v54, %v11160_v47  ;;  %vm1156_vm12 = vcmp.eq.s32.totalorder %v8783_v50, %v11172_v40 }
 0x24c   :  { %6789 = vmatpush2.msk.msra.mxu1 %vm1444_vm13, %v12484_v63  ;;  %6726 = vmatprep.subr.msk.mxu0 %vm1181_vm2, %v12484_v63  ;;  %vm1412_vm13 = vcmp.eq.s32.totalorder %v8792_v54, %v11172_v40  ;;  %vm1149_vm2 = vcmp.eq.s32.totalorder %v12773_v37, %v11160_v47 }
 0x24d   :  { %6790 = vmatprep.subr.msk.mxu1 %vm1437_vm7, %v12484_v63  ;;  %6727 = vmatpush2.msk.msra.mxu0 %vm1180_vm11, %v12484_v63  ;;  %vm1405_vm7 = vcmp.eq.s32.totalorder %v12774_v53, %v11160_v47  ;;  %vm1148_vm11 = vcmp.eq.s32.totalorder %v12773_v37, %v11172_v40 }
 0x24e   :  { %6791 = vmatpush2.msk.msra.mxu1 %vm1436_vm6, %v12484_v63  ;;  %6728 = vmatprep.subr.msk.mxu0 %vm1173_vm0, %v12484_v63  ;;  %vm1404_vm6 = vcmp.eq.s32.totalorder %v12774_v53, %v11172_v40 }
 0x24f   :  { %6792 = vmatprep.subr.msk.mxu1 %vm1429_vm10, %v12484_v63  ;;  %6729 = vmatpush2.msk.msra.mxu0 %vm1172_vm15, %v12484_v63 }
 0x250   :  { %6793 = vmatpush2.msk.msra.mxu1 %vm1428_vm5, %v12484_v63  ;;  %6730 = vmatprep.subr.msk.mxu0 %vm1165_vm1, %v12484_v63 }
 0x251   :  { %6794 = vmatprep.subr.msk.mxu1 %vm1421_vm8, %v12484_v63  ;;  %6731 = vmatpush2.msk.msra.mxu0 %vm1164_vm3, %v12484_v63  ;;  %v4216_v45 = vpop.f32.mrf.mxu0 }
 0x252   :  { %6795 = vmatpush2.msk.msra.mxu1 %vm1420_vm9, %v12484_v63  ;;  %6732 = vmatprep.subr.msk.mxu0 %vm1157_vm4, %v12484_v63  ;;  %v4287_v51 = vpop.f32.mrf.mxu1 }
 0x253   :  { %6796 = vmatprep.subr.msk.mxu1 %vm1413_vm14, %v12484_v63  ;;  %6733 = vmatpush2.msk.msra.mxu0 %vm1156_vm12, %v12484_v63  ;;  %v4218_v57 = vpop.f32.mrf.mxu0  ;;  %v4288_v59 = vadd.f32 %v4287_v51, %v4216_v45 }
 0x254   :  { %6797 = vmatpush2.msk.msra.mxu1 %vm1412_vm13, %v12484_v63  ;;  %6734 = vmatprep.subr.msk.mxu0 %vm1149_vm2, %v12484_v63  ;;  %v4289_v58 = vpop.f32.mrf.mxu1 }
 0x255   :  { %6798 = vmatprep.subr.msk.mxu1 %vm1405_vm7, %v12484_v63  ;;  %6735 = vmatpush2.msk.msra.mxu0 %vm1148_vm11, %v12484_v63  ;;  %v4290_v2 = vadd.f32 %v4289_v58, %v4218_v57 }
 0x256   :  { %4640 = vmatprep.mubr.f32.mxu0 %v6966_v25  ;;  %6799 = vmatpush2.msk.msra.mxu1 %vm1404_vm6, %v12484_v63 }
 0x257   :  { %4711 = vmatprep.mubr.f32.mxu1 %v6967_v32  ;;  %4641 = vmatmul.mubr.f32.vlgmr.msra.gmra.mxu0 %v6968_v43 }
 0x258   :  { %4712 = vmatmul.mubr.f32.vlgmr.msra.gmra.mxu1 %v6969_v44 }
 0x293   :  { %v4358_v63 = vpop.f32.mrf.mxu0 }
 0x294   :  { %v4359_v12 = vadd.f32 %v4358_v63, %v4288_v59 }
 0x295   :  { %v4429_v20 = vpop.f32.mrf.mxu1  ;;  %v4360_v21 = vpop.f32.mrf.mxu0 }
 0x296   :  { %v4430_v27 = vadd.f32 %v4429_v20, %v4359_v12  ;;  %v4361_v28 = vadd.f32 %v4360_v21, %v4290_v2 }
 0x297   :  { %v4431_v36 = vpop.f32.mrf.mxu1 }
 0x298   :  { %4722 = vst [vmem:[%s12015_s2 + $0x20] sm:$0x3f] %v4430_v27  ;;  %v4432_v46 = vadd.f32 %v4431_v36, %v4361_v28 }
 0x29a   :  { %4723 = vst [vmem:[%s12015_s2 + $0x28] sm:$0x3f] %v4432_v46 }
 0x2d5   :  { %v4500_v41 = vpop.f32.mrf.mxu0 }
 0x2d6   :  { %v4571_v11 = vpop.f32.mrf.mxu1 }
 0x2d7   :  { %v4502_v42 = vpop.f32.mrf.mxu0  ;;  %v4572_v60 = vadd.f32 %v4571_v11, %v4500_v41 }
 0x2d8   :  { %v4573_v61 = vpop.f32.mrf.mxu1 }
 0x2d9   :  { %v4574_v52 = vadd.f32 %v4573_v61, %v4502_v42 }
 0x317   :  { %v4642_v16 = vpop.f32.mrf.mxu0 }
 0x318   :  { %v4713_v49 = vpop.f32.mrf.mxu1  ;;  %v4643_v8 = vadd.f32 %v4642_v16, %v4572_v60 }
 0x319   :  { %v4644_v6 = vpop.f32.mrf.mxu0 }
 0x31a   :  { %v4714_v48 = vadd.f32 %v4713_v49, %v4643_v8  ;;  %v4645_v33 = vadd.f32 %v4644_v6, %v4574_v52  ;;  %v4715_v50 = vpop.f32.mrf.mxu1 }
 0x31c   :  { %4724 = vst [vmem:[%s12015_s2 + $0x30] sm:$0x3f] %v4714_v48  ;;  %v4716_v54 = vadd.f32 %v4715_v50, %v4645_v33 }
 0x31e   :  { %4725 = vst [vmem:[%s12015_s2 + $0x38] sm:$0x3f] %v4716_v54 }
 0x31f   :  { %4730 = vsyncpa [#allocation3], 1 }

</bundles_post_ra>
